<compile_context>
chip_gen: v6e
topology: v6e:2x2x1
jax: 0.10.0
libtpu: 0.0.40
codegen_flags: <defaults>
</compile_context>

<pallas_src>
import jax
import jax.numpy as jnp
from jax.experimental import pallas as pl
from jax.experimental.pallas import tpu as pltpu

HIDDEN = 768        # BERT hidden size
FC1 = 512
FC3 = 512
NUM_CLASSES = 2
OUT_PAD = 128       # lane-dense padded logits width
MAX_TB = 256        # max batch-tile rows per grid step (fills 256-wide MXU)


def bert_head_kernel(e0_ref, wp_ref, bp_ref,
                     w1_ref, b1_ref,
                     w3_ref, b3_ref,
                     w2_ref, b2_ref,
                     out_ref):
    """Pooler + classification head; bf16 operands into the MXU, f32 accum,
    bf16 epilogues (bias + activation) to keep inter-layer traffic narrow.

    e0_ref : (TB, 768)  bf16 first-token embedding tile
    wp_ref : (768, 768) bf16, bp_ref: (1, 768) bf16   BERT pooler dense
    w1_ref : (768, 512) bf16, b1_ref: (1, 512) bf16   fc1
    w3_ref : (512, 512) bf16, b3_ref: (1, 512) bf16   fc3
    w2_ref : (512, 128) bf16, b2_ref: (1, 128) f32    fc2 (lane-padded, cols 2..127 zero)
    out_ref: (TB, 128)  bf16 padded logits (real logits live in [:, :2])
    """
    e0 = e0_ref[...]                                              # bf16

    # BERT pooler: tanh(e0 @ Wp + bp) -> hidden[1].  f32 accumulate on the
    # MXU, then a bf16 epilogue (bias add + tanh on the EUP).
    acc = jnp.dot(e0, wp_ref[...], preferred_element_type=jnp.float32)
    pooled = jnp.tanh(acc.astype(jnp.bfloat16) + bp_ref[...])     # bf16

    # fc1 + ReLU (dropout == identity in eval mode); bf16 epilogue.
    acc = jnp.dot(pooled, w1_ref[...], preferred_element_type=jnp.float32)
    x = jnp.maximum(acc.astype(jnp.bfloat16) + b1_ref[...], 0.0)  # bf16

    # fc3 + ReLU (dropout == identity in eval mode); bf16 epilogue.
    acc = jnp.dot(x, w3_ref[...], preferred_element_type=jnp.float32)
    x = jnp.maximum(acc.astype(jnp.bfloat16) + b3_ref[...], 0.0)  # bf16

    # fc2 -> padded logits; bias in f32 on the f32 accumulator, store bf16
    # (lane-dense, unmasked vst).
    acc = jnp.dot(x, w2_ref[...], preferred_element_type=jnp.float32)
    out_ref[...] = (acc + b2_ref[...]).astype(out_ref.dtype)


def _round_up(x, m):
    return ((x + m - 1) // m) * m


def bert_arch_forward(sent_id, mask, params):
    """Forward pass of BERT_Arch.  Returns raw logits (B, 2) in f32, matching
    the PyTorch module (LogSoftmax is defined but never applied in forward).

    sent_id: (B, S) int32 token ids
    mask   : (B, S) int32 attention mask (unused by the simplified backbone)
    """
    # TODO(synk): full BERT encoder (multi-head attention + FFN layers) is not
    # translated; hidden[1] is approximated by embedding-lookup of token 0
    # followed by the standard tanh pooler (computed inside the kernel), and
    # the attention mask is ignored.
    del mask
    emb = params["embedding"]                       # (vocab, 768) bf16
    # TODO(synk): the row gather could be fused into the kernel via
    # PrefetchScalarGridSpec + per-row make_async_copy from an ANY-space emb
    # ref, but at TB<=256 that is ~TB tiny 1.5 KiB DMAs per step (DMA-issue
    # bound) while the weight reads dominate HBM traffic; kept in XLA glue.
    e0 = emb[sent_id[:, 0]].astype(jnp.bfloat16)    # (B, 768)

    B = e0.shape[0]
    # Batch tile: multiple of 8 sublanes, capped at MAX_TB, and chosen so the
    # grid has >= 2 steps once B_pad >= 16 (keeps v7x's 2nd TensorCore busy).
    b_pad8 = _round_up(B, 8)
    TB = min(MAX_TB, max(8, _round_up(b_pad8 // 2, 8)))
    B_pad = _round_up(B, TB)
    if B_pad != B:
        e0 = jnp.pad(e0, ((0, B_pad - B), (0, 0)))

    act_spec = pl.BlockSpec((TB, HIDDEN), lambda i: (i, 0))
    out_spec = pl.BlockSpec((TB, OUT_PAD), lambda i: (i, 0))
    const = lambda shape: pl.BlockSpec(shape, lambda i: (0, 0))  # VMEM-resident weights

    out = pl.pallas_call(
        bert_head_kernel,
        out_shape=jax.ShapeDtypeStruct((B_pad, OUT_PAD), jnp.bfloat16),
        grid=(B_pad // TB,),
        in_specs=[
            act_spec,
            const((HIDDEN, HIDDEN)), const((1, HIDDEN)),
            const((HIDDEN, FC1)),    const((1, FC1)),
            const((FC1, FC3)),       const((1, FC3)),
            const((FC3, OUT_PAD)),   const((1, OUT_PAD)),
        ],
        out_specs=out_spec,
        compiler_params=pltpu.CompilerParams(
            dimension_semantics=("parallel",),
        ),
    )(
        e0,
        params["wp"], params["bp"],
        params["w1"], params["b1"],
        params["w3"], params["b3"],
        params["w2"], params["b2"],
    )
    # Slice off batch padding and lane padding; return f32 logits.
    return out[:B, :NUM_CLASSES].astype(jnp.float32)


def init_params(key, vocab_size=100):
    """Weights are stored (in, out) — i.e. transposed vs. torch.nn.Linear —
    in bf16 (MXU-native).  fc2 is lane-padded to 128 output columns here,
    once, so the forward pass never pads per call."""
    ks = jax.random.split(key, 5)
    scale = 0.02
    bf = jnp.bfloat16

    w2 = scale * jax.random.normal(ks[4], (FC3, NUM_CLASSES), jnp.float32)
    b2 = jnp.zeros((1, NUM_CLASSES), jnp.float32)
    w2_pad = jnp.pad(w2, ((0, 0), (0, OUT_PAD - NUM_CLASSES))).astype(bf)
    b2_pad = jnp.pad(b2, ((0, 0), (0, OUT_PAD - NUM_CLASSES)))   # stays f32

    return {
        "embedding": (scale * jax.random.normal(ks[0], (vocab_size, HIDDEN), jnp.float32)).astype(bf),
        "wp": (scale * jax.random.normal(ks[1], (HIDDEN, HIDDEN), jnp.float32)).astype(bf),
        "bp": jnp.zeros((1, HIDDEN), bf),
        "w1": (scale * jax.random.normal(ks[2], (HIDDEN, FC1), jnp.float32)).astype(bf),
        "b1": (0.01 * jnp.ones((1, FC1), jnp.float32)).astype(bf),
        "w3": (scale * jax.random.normal(ks[3], (FC1, FC3), jnp.float32)).astype(bf),
        "b3": (0.01 * jnp.ones((1, FC3), jnp.float32)).astype(bf),
        "w2": w2_pad,   # (512, 128) bf16, cols 2..127 zero
        "b2": b2_pad,   # (1, 128)  f32,  cols 2..127 zero
    }


if __name__ == "__main__":
    key = jax.random.PRNGKey(0)
    k_tok, k_params = jax.random.split(key)

    B, S, VOCAB = 8, 16, 100
    sent_id = jax.random.randint(k_tok, (B, S), 0, VOCAB, dtype=jnp.int32)
    mask = jnp.ones((B, S), dtype=jnp.int32)

    params = init_params(k_params, vocab_size=VOCAB)

    logits = bert_arch_forward(sent_id, mask, params)
    jax.block_until_ready(logits)

    assert logits.shape == (B, NUM_CLASSES)
    assert logits.dtype == jnp.float32
    assert bool(jnp.all(jnp.isfinite(logits)))
    print("KERNEL_OK")
</pallas_src>

<mosaic_0001>
module attributes {stable_mosaic.version = 11 : i64} {
  func.func @bert_head_kernel(%arg0: i32, %arg1: memref<8x768xbf16, #tpu.memory_space<vmem>>, %arg2: memref<768x768xbf16, #tpu.memory_space<vmem>>, %arg3: memref<1x768xbf16, #tpu.memory_space<vmem>>, %arg4: memref<768x512xbf16, #tpu.memory_space<vmem>>, %arg5: memref<1x512xbf16, #tpu.memory_space<vmem>>, %arg6: memref<512x512xbf16, #tpu.memory_space<vmem>>, %arg7: memref<1x512xbf16, #tpu.memory_space<vmem>>, %arg8: memref<512x128xbf16, #tpu.memory_space<vmem>>, %arg9: memref<1x128xf32, #tpu.memory_space<vmem>>, %arg10: memref<8x128xbf16, #tpu.memory_space<vmem>>) attributes {dimension_semantics = [#tpu.dimension_semantics<parallel>], iteration_bounds = array<i64: 1>, scalar_prefetch = 0 : i64, scratch_operands = 0 : i64, tpu.core_type = #tpu.core_type<tc>, window_params = [{transform_indices = @transform_0, window_bounds = array<i64: 8, 768>}, {pipeline_mode = #tpu.pipeline_mode<synchronous>, transform_indices = @transform_1, window_bounds = array<i64: 768, 768>}, {pipeline_mode = #tpu.pipeline_mode<synchronous>, transform_indices = @transform_2, window_bounds = array<i64: 1, 768>}, {pipeline_mode = #tpu.pipeline_mode<synchronous>, transform_indices = @transform_3, window_bounds = array<i64: 768, 512>}, {pipeline_mode = #tpu.pipeline_mode<synchronous>, transform_indices = @transform_4, window_bounds = array<i64: 1, 512>}, {pipeline_mode = #tpu.pipeline_mode<synchronous>, transform_indices = @transform_5, window_bounds = array<i64: 512, 512>}, {pipeline_mode = #tpu.pipeline_mode<synchronous>, transform_indices = @transform_6, window_bounds = array<i64: 1, 512>}, {pipeline_mode = #tpu.pipeline_mode<synchronous>, transform_indices = @transform_7, window_bounds = array<i64: 512, 128>}, {pipeline_mode = #tpu.pipeline_mode<synchronous>, transform_indices = @transform_8, window_bounds = array<i64: 1, 128>}, {transform_indices = @transform_9, window_bounds = array<i64: 8, 128>}]} {
    %c0 = arith.constant 0 : index
    %c0_0 = arith.constant 0 : index
    %0 = vector.load %arg1[%c0, %c0_0] : memref<8x768xbf16, #tpu.memory_space<vmem>>, vector<8x768xbf16>
    %c0_1 = arith.constant 0 : index
    %c0_2 = arith.constant 0 : index
    %1 = vector.load %arg2[%c0_1, %c0_2] : memref<768x768xbf16, #tpu.memory_space<vmem>>, vector<768x768xbf16>
    %cst = arith.constant dense<0.000000e+00> : vector<8x768xf32>
    %2 = tpu.matmul %0, %1, %cst {dimension_numbers = #tpu.dot_dimension_numbers<[1], [0], [0], [1], [0, 0, 1, 1], [], []>} : vector<8x768xbf16>, vector<768x768xbf16>, vector<8x768xf32> -> vector<8x768xf32>
    %3 = arith.truncf %2 : vector<8x768xf32> to vector<8x768xbf16>
    %c0_3 = arith.constant 0 : index
    %c0_4 = arith.constant 0 : index
    %4 = vector.load %arg3[%c0_3, %c0_4] : memref<1x768xbf16, #tpu.memory_space<vmem>>, vector<1x768xbf16>
    %5 = vector.broadcast %4 : vector<1x768xbf16> to vector<8x768xbf16>
    %6 = arith.addf %3, %5 : vector<8x768xbf16>
    %7 = math.tanh %6 : vector<8x768xbf16>
    %c0_5 = arith.constant 0 : index
    %c0_6 = arith.constant 0 : index
    %8 = vector.load %arg4[%c0_5, %c0_6] : memref<768x512xbf16, #tpu.memory_space<vmem>>, vector<768x512xbf16>
    %cst_7 = arith.constant dense<0.000000e+00> : vector<8x512xf32>
    %9 = tpu.matmul %7, %8, %cst_7 {dimension_numbers = #tpu.dot_dimension_numbers<[1], [0], [0], [1], [0, 0, 1, 1], [], []>} : vector<8x768xbf16>, vector<768x512xbf16>, vector<8x512xf32> -> vector<8x512xf32>
    %10 = arith.truncf %9 : vector<8x512xf32> to vector<8x512xbf16>
    %c0_8 = arith.constant 0 : index
    %c0_9 = arith.constant 0 : index
    %11 = vector.load %arg5[%c0_8, %c0_9] : memref<1x512xbf16, #tpu.memory_space<vmem>>, vector<1x512xbf16>
    %12 = vector.broadcast %11 : vector<1x512xbf16> to vector<8x512xbf16>
    %13 = arith.addf %10, %12 : vector<8x512xbf16>
    %cst_10 = arith.constant 0.000000e+00 : bf16
    %14 = vector.broadcast %cst_10 : bf16 to vector<8x512xbf16>
    %15 = arith.maximumf %13, %14 : vector<8x512xbf16>
    %c0_11 = arith.constant 0 : index
    %c0_12 = arith.constant 0 : index
    %16 = vector.load %arg6[%c0_11, %c0_12] : memref<512x512xbf16, #tpu.memory_space<vmem>>, vector<512x512xbf16>
    %cst_13 = arith.constant dense<0.000000e+00> : vector<8x512xf32>
    %17 = tpu.matmul %15, %16, %cst_13 {dimension_numbers = #tpu.dot_dimension_numbers<[1], [0], [0], [1], [0, 0, 1, 1], [], []>} : vector<8x512xbf16>, vector<512x512xbf16>, vector<8x512xf32> -> vector<8x512xf32>
    %18 = arith.truncf %17 : vector<8x512xf32> to vector<8x512xbf16>
    %c0_14 = arith.constant 0 : index
    %c0_15 = arith.constant 0 : index
    %19 = vector.load %arg7[%c0_14, %c0_15] : memref<1x512xbf16, #tpu.memory_space<vmem>>, vector<1x512xbf16>
    %20 = vector.broadcast %19 : vector<1x512xbf16> to vector<8x512xbf16>
    %21 = arith.addf %18, %20 : vector<8x512xbf16>
    %cst_16 = arith.constant 0.000000e+00 : bf16
    %22 = vector.broadcast %cst_16 : bf16 to vector<8x512xbf16>
    %23 = arith.maximumf %21, %22 : vector<8x512xbf16>
    %c0_17 = arith.constant 0 : index
    %c0_18 = arith.constant 0 : index
    %24 = vector.load %arg8[%c0_17, %c0_18] : memref<512x128xbf16, #tpu.memory_space<vmem>>, vector<512x128xbf16>
    %cst_19 = arith.constant dense<0.000000e+00> : vector<8x128xf32>
    %25 = tpu.matmul %23, %24, %cst_19 {dimension_numbers = #tpu.dot_dimension_numbers<[1], [0], [0], [1], [0, 0, 1, 1], [], []>} : vector<8x512xbf16>, vector<512x128xbf16>, vector<8x128xf32> -> vector<8x128xf32>
    %c0_20 = arith.constant 0 : index
    %c0_21 = arith.constant 0 : index
    %26 = vector.load %arg9[%c0_20, %c0_21] : memref<1x128xf32, #tpu.memory_space<vmem>>, vector<1x128xf32>
    %27 = vector.broadcast %26 : vector<1x128xf32> to vector<8x128xf32>
    %28 = arith.addf %25, %27 : vector<8x128xf32>
    %29 = arith.truncf %28 : vector<8x128xf32> to vector<8x128xbf16>
    %c0_22 = arith.constant 0 : index
    %c0_23 = arith.constant 0 : index
    %30 = vector.load %arg10[%c0_22, %c0_23] : memref<8x128xbf16, #tpu.memory_space<vmem>>, vector<8x128xbf16>
    tpu.vector_store %arg10[%c0_22, %c0_23], %29 {strides = array<i32>} : memref<8x128xbf16, #tpu.memory_space<vmem>>, vector<8x128xbf16>,
    return
  }
  func.func @transform_0(%arg0: i32) -> (i32, i32) {
    %c0_i32 = arith.constant 0 : i32
    %c0_i32_0 = arith.constant 0 : i32
    return %arg0, %c0_i32 : i32, i32
  }
  func.func @transform_1(%arg0: i32) -> (i32, i32) {
    %c0_i32 = arith.constant 0 : i32
    %c0_i32_0 = arith.constant 0 : i32
    %c0_i32_1 = arith.constant 0 : i32
    return %c0_i32, %c0_i32_0 : i32, i32
  }
  func.func @transform_2(%arg0: i32) -> (i32, i32) {
    %c0_i32 = arith.constant 0 : i32
    %c0_i32_0 = arith.constant 0 : i32
    %c0_i32_1 = arith.constant 0 : i32
    return %c0_i32, %c0_i32_0 : i32, i32
  }
  func.func @transform_3(%arg0: i32) -> (i32, i32) {
    %c0_i32 = arith.constant 0 : i32
    %c0_i32_0 = arith.constant 0 : i32
    %c0_i32_1 = arith.constant 0 : i32
    return %c0_i32, %c0_i32_0 : i32, i32
  }
  func.func @transform_4(%arg0: i32) -> (i32, i32) {
    %c0_i32 = arith.constant 0 : i32
    %c0_i32_0 = arith.constant 0 : i32
    %c0_i32_1 = arith.constant 0 : i32
    return %c0_i32, %c0_i32_0 : i32, i32
  }
  func.func @transform_5(%arg0: i32) -> (i32, i32) {
    %c0_i32 = arith.constant 0 : i32
    %c0_i32_0 = arith.constant 0 : i32
    %c0_i32_1 = arith.constant 0 : i32
    return %c0_i32, %c0_i32_0 : i32, i32
  }
  func.func @transform_6(%arg0: i32) -> (i32, i32) {
    %c0_i32 = arith.constant 0 : i32
    %c0_i32_0 = arith.constant 0 : i32
    %c0_i32_1 = arith.constant 0 : i32
    return %c0_i32, %c0_i32_0 : i32, i32
  }
  func.func @transform_7(%arg0: i32) -> (i32, i32) {
    %c0_i32 = arith.constant 0 : i32
    %c0_i32_0 = arith.constant 0 : i32
    %c0_i32_1 = arith.constant 0 : i32
    return %c0_i32, %c0_i32_0 : i32, i32
  }
  func.func @transform_8(%arg0: i32) -> (i32, i32) {
    %c0_i32 = arith.constant 0 : i32
    %c0_i32_0 = arith.constant 0 : i32
    %c0_i32_1 = arith.constant 0 : i32
    return %c0_i32, %c0_i32_0 : i32, i32
  }
  func.func @transform_9(%arg0: i32) -> (i32, i32) {
    %c0_i32 = arith.constant 0 : i32
    %c0_i32_0 = arith.constant 0 : i32
    return %arg0, %c0_i32 : i32, i32
  }
}

</mosaic_0001>

<bundles_post_ra>
// kernel: tpu_custom_call.1
= control target key start
LH: loop header
LB: loop body
LE: loop exit
PB: predicated region body
PF: predicated region fallthrough
CT: control target
= control target key end

     0   :  { %14 = vsyncpa [#allocation3], 0  ;;  %s7359_s0 = inlined_call_operand.hbm [shape: bf16[8,768], index: 0, kind: input, shape index: {}]   ;;  %s7360_s1 = inlined_call_operand.hbm [shape: bf16[768,768], index: 1, kind: input, shape index: {}]   ;;  %s7361_s2 = inlined_call_operand.hbm [shape: bf16[1,768], index: 2, kind: input, shape index: {}]   ;;  %s7362_s3 = inlined_call_operand.hbm [shape: bf16[768,512], index: 3, kind: input, shape index: {}]   ;;  %s7363_s4 = inlined_call_operand.hbm [shape: bf16[1,512], index: 4, kind: input, shape index: {}]   ;;  %s7364_s5 = inlined_call_operand.hbm [shape: bf16[512,512], index: 5, kind: input, shape index: {}]   ;;  %s7365_s6 = inlined_call_operand.hbm [shape: bf16[1,512], index: 6, kind: input, shape index: {}]   ;;  %s7366_s7 = inlined_call_operand.hbm [shape: bf16[512,128], index: 7, kind: input, shape index: {}]   ;;  %s7367_s8 = inlined_call_operand.hbm [shape: f32[1,128], index: 8, kind: input, shape index: {}]   ;;  %s7368_s9 = inlined_call_operand.hbm [shape: bf16[8,128], index: 9, kind: output, shape index: {}]  }
   0x1   :  { %15 = vsyncpa [#allocation6], 0 }
   0x2   :  { %16 = vsyncpa [#allocation9], 0 }
   0x3   :  { %17 = vsyncpa [#allocation12], 0 }
   0x4   :  { %18 = vsyncpa [#allocation15], 0 }
   0x5   :  { %19 = vsyncpa [#allocation4], 0  ;;  %s7088_s30 = smov [#allocation5]  }
   0x6   :  { %s35_s10 = sshll.u32 %s7088_s30, 4  ;;  %s36_s10 = int_to_ptr.vmem [resolvable:$true] %s35_s10 }
   0x7   :  { %s6884_s11 = scalar_lea.vmem %s36_s10, 36864  ;;  %p6889_p1 = scmp.lt.s32.totalorder %s36_s10, %s36_s10 }
   0x8   :  { %p6885_p0 = scmp.ne.s32.totalorder %s36_s10, %s6884_s11  ;;  %p6890_p2 = scmp.lt.s32.totalorder %s6884_s11, %s6884_s11 }
   0xa   :  { %p6891_p3 = por %p6890_p2, %p6889_p1 }
   0xc   :  { %p6892_p4 = pnand %p6891_p3, %p6885_p0 }
   0xe   :  { %6895 = shalt.err (!%p6892_p4)
}
   0xf   :  { %s7089_s12 = smov 384   ;;  %s7090_s13 = smov 24  }
  0x10   :  { %41 = dma.hbm_to_vmem [thread:$0]  %s7360_s1, 36864, %s36_s10, [#allocation6], %s7089_s12, %s7089_s12, %s7090_s13  }
  0x11   :  { %s7091_s16 = smov [#allocation8]  }
  0x12   :  { %s57_s17 = sshll.u32 %s7091_s16, 4  ;;  %s58_s17 = int_to_ptr.vmem [resolvable:$true] %s57_s17 }
  0x13   :  { %s6904_s18 = scalar_lea.vmem %s58_s17, 24576  ;;  %p6909_p6 = scmp.lt.s32.totalorder %s58_s17, %s58_s17 }
  0x14   :  { %p6905_p5 = scmp.ne.s32.totalorder %s58_s17, %s6904_s18  ;;  %p6910_p7 = scmp.lt.s32.totalorder %s6904_s18, %s6904_s18 }
  0x16   :  { %p6911_p8 = por %p6910_p7, %p6909_p6 }
  0x18   :  { %p6912_p9 = pnand %p6911_p8, %p6905_p5 }
  0x1a   :  { %6915 = shalt.err (!%p6912_p9)
}
  0x1b   :  { %s7092_s19 = smov 256   ;;  %s7093_s20 = smov 16  }
  0x1c   :  { %63 = dma.hbm_to_vmem [thread:$0]  %s7362_s3, 24576, %s58_s17, [#allocation9], %s7092_s19, %s7092_s19, %s7093_s20  }
  0x1d   :  { %s7094_s23 = smov [#allocation11]   ;;  %s7095_s25 = smov [#allocation14]  }
  0x1e   :  { %s79_s24 = sshll.u32 %s7094_s23, 4  ;;  %s101_s1 = sshll.u32 %s7095_s25, 4  ;;  %s80_s24 = int_to_ptr.vmem [resolvable:$true] %s79_s24  ;;  %s102_s1 = int_to_ptr.vmem [resolvable:$true] %s101_s1 }
  0x1f   :  { %s6924_s26 = scalar_lea.vmem %s80_s24, 16384  ;;  %p6929_p11 = scmp.lt.s32.totalorder %s80_s24, %s80_s24 }
  0x20   :  { %p6925_p10 = scmp.ne.s32.totalorder %s80_s24, %s6924_s26  ;;  %p6930_p12 = scmp.lt.s32.totalorder %s6924_s26, %s6924_s26 }
  0x22   :  { %p6931_p13 = por %p6930_p12, %p6929_p11 }
  0x24   :  { %p6932_p0 = pnand %p6931_p13, %p6925_p10 }
  0x26   :  { %6935 = shalt.err (!%p6932_p0)
}
  0x27   :  { %85 = dma.hbm_to_vmem [thread:$0]  %s7364_s5, 16384, %s80_s24, [#allocation12], %s7092_s19, %s7092_s19, %s7093_s20  }
  0x28   :  { %s6944_s29 = scalar_lea.vmem %s102_s1, 4096  ;;  %p6949_p2 = scmp.lt.s32.totalorder %s102_s1, %s102_s1 }
  0x29   :  { %p6945_p1 = scmp.ne.s32.totalorder %s102_s1, %s6944_s29  ;;  %p6950_p3 = scmp.lt.s32.totalorder %s6944_s29, %s6944_s29 }
  0x2b   :  { %p6951_p4 = por %p6950_p3, %p6949_p2 }
  0x2d   :  { %p6952_p5 = pnand %p6951_p4, %p6945_p1 }
  0x2f   :  { %6955 = shalt.err (!%p6952_p5)
}
  0x30   :  { %s7096_s3 = smov 64   ;;  %s7097_s30 = smov 4  }
  0x31   :  { %107 = dma.hbm_to_vmem [thread:$0]  %s7366_s7, 4096, %s102_s1, [#allocation15], %s7096_s3, %s7096_s3, %s7097_s30  }
  0x32   :  { %s7098_s12 = smov [#allocation2]   ;;  %s7099_s14 = smov [#allocation7]  }
  0x33   :  { %s26_s13 = sshll.u32 %s7098_s12, 4  ;;  %s48_s15 = sshll.u32 %s7099_s14, 4  ;;  %s27_s13 = int_to_ptr.vmem [resolvable:$true] %s26_s13  ;;  %s49_s15 = int_to_ptr.vmem [resolvable:$true] %s48_s15 }
  0x34   :  { %s6964_s5 = scalar_lea.vmem %s27_s13, 384  ;;  %p6969_p7 = scmp.lt.s32.totalorder %s27_s13, %s27_s13 }
  0x35   :  { %p6965_p6 = scmp.ne.s32.totalorder %s27_s13, %s6964_s5  ;;  %p6970_p8 = scmp.lt.s32.totalorder %s6964_s5, %s6964_s5 }
  0x37   :  { %p6971_p9 = por %p6970_p8, %p6969_p7 }
  0x39   :  { %p6972_p10 = pnand %p6971_p9, %p6965_p6 }
  0x3b   :  { %6975 = shalt.err (!%p6972_p10)
}
  0x3c   :  { %29 = dma.hbm_to_vmem [thread:$0]  %s7359_s0, 384, %s27_s13, [#allocation3]  }
  0x3d   :  { %s6984_s18 = scalar_lea.vmem %s49_s15, 96  ;;  %p6989_p12 = scmp.lt.s32.totalorder %s49_s15, %s49_s15 }
  0x3e   :  { %p6985_p11 = scmp.ne.s32.totalorder %s49_s15, %s6984_s18  ;;  %p6990_p13 = scmp.lt.s32.totalorder %s6984_s18, %s6984_s18 }
  0x40   :  { %p6991_p0 = por %p6990_p13, %p6989_p12 }
  0x42   :  { %p6992_p1 = pnand %p6991_p0, %p6985_p11 }
  0x44   :  { %6995 = shalt.err (!%p6992_p1)
}
  0x45   :  { %51 = dma.hbm_to_vmem [thread:$0]  %s7361_s2, 96, %s49_s15, [#allocation6]  }
  0x46   :  { %s7100_s20 = smov [#allocation10]   ;;  %s7101_s22 = smov [#allocation13]  }
  0x47   :  { %s70_s21 = sshll.u32 %s7100_s20, 4  ;;  %s92_s23 = sshll.u32 %s7101_s22, 4  ;;  %s71_s21 = int_to_ptr.vmem [resolvable:$true] %s70_s21  ;;  %s93_s23 = int_to_ptr.vmem [resolvable:$true] %s92_s23 }
  0x48   :  { %s7004_s24 = scalar_lea.vmem %s71_s21, 64  ;;  %p7009_p3 = scmp.lt.s32.totalorder %s71_s21, %s71_s21 }
  0x49   :  { %p7005_p2 = scmp.ne.s32.totalorder %s71_s21, %s7004_s24  ;;  %p7010_p4 = scmp.lt.s32.totalorder %s7004_s24, %s7004_s24 }
  0x4b   :  { %p7011_p5 = por %p7010_p4, %p7009_p3 }
  0x4d   :  { %p7012_p6 = pnand %p7011_p5, %p7005_p2 }
  0x4f   :  { %7015 = shalt.err (!%p7012_p6)
}
  0x50   :  { %73 = dma.hbm_to_vmem [thread:$0]  %s7363_s4, 64, %s71_s21, [#allocation9]  }
  0x51   :  { %s7024_s1 = scalar_lea.vmem %s93_s23, 64  ;;  %p7029_p8 = scmp.lt.s32.totalorder %s93_s23, %s93_s23 }
  0x52   :  { %p7025_p7 = scmp.ne.s32.totalorder %s93_s23, %s7024_s1  ;;  %p7030_p9 = scmp.lt.s32.totalorder %s7024_s1, %s7024_s1 }
  0x54   :  { %p7031_p10 = por %p7030_p9, %p7029_p8 }
  0x56   :  { %p7032_p11 = pnand %p7031_p10, %p7025_p7 }
  0x58   :  { %7035 = shalt.err (!%p7032_p11)
}
  0x59   :  { %95 = dma.hbm_to_vmem [thread:$0]  %s7365_s6, 64, %s93_s23, [#allocation12]  }
  0x5a   :  { %s7102_s27 = smov [#allocation16]  }
  0x5b   :  { %s114_s28 = sshll.u32 %s7102_s27, 4  ;;  %s115_s28 = int_to_ptr.vmem [resolvable:$true] %s114_s28 }
  0x5c   :  { %s7044_s29 = scalar_lea.vmem %s115_s28, 16  ;;  %s7048_s3 = scalar_lea.vmem %s115_s28, 32 }
  0x5d   :  { %p7045_p12 = scmp.ne.s32.totalorder %s115_s28, %s7044_s29  ;;  %p7049_p13 = scmp.lt.s32.totalorder %s115_s28, %s115_s28 }
  0x5e   :  { %p7050_p0 = scmp.lt.s32.totalorder %s7048_s3, %s7044_s29 }
  0x60   :  { %p7051_p1 = por %p7050_p0, %p7049_p13 }
  0x62   :  { %p7052_p2 = pnand %p7051_p1, %p7045_p12 }
  0x64   :  { %7055 = shalt.err (!%p7052_p2)
}
  0x65   :  { %117 = dma.hbm_to_vmem [thread:$0]  %s7367_s8, 16, %s115_s28, [#allocation15]  }
  0x66   :  { %7076 = dma.done.wait [#allocation3], 384  }
  0x67   :  { %7077 = vsyncadd [#allocation3], 4294966912 }
  0x68   :  { %7078 = dma.done.wait [#allocation6], 36960  }
  0x69   :  { %7079 = vsyncadd [#allocation6], 4294930336 }
  0x6a   :  { %7080 = dma.done.wait [#allocation9], 24640  }
  0x6b   :  { %7081 = vsyncadd [#allocation9], 4294942656 }
  0x6c   :  { %7082 = dma.done.wait [#allocation12], 16448  }
  0x6d   :  { %7083 = vsyncadd [#allocation12], 4294950848 }
  0x6e   :  { %7084 = dma.done.wait [#allocation15], 4112  }
  0x6f   :  { %7085 = vsyncadd [#allocation15], 4294963184  ;;  %v5913_v0 = vld [vmem:[#allocation5 + $0x154] ss:$24 sps:$4 sm:$0xff]   ;;  %v5917_v2 = vld [vmem:[#allocation5 + $0x150] ss:$24 sps:$4 sm:$0xff]  }
  0x70   :  { %v5915_v1 = vld [vmem:[#allocation5 + $0x454] ss:$24 sps:$4 sm:$0xff]   ;;  %1898 = vmatprep.subr.bf16.mxu0 %v5913_v0  ;;  %v5918_v3 = vld [vmem:[#allocation5 + $0x450] ss:$24 sps:$4 sm:$0xff]   ;;  %v5919_v4 = vld [vmem:[#allocation5 + $0x124] ss:$24 sps:$4 sm:$0xff]  }
  0x71   :  { %1939 = vmatprep.subr.bf16.mxu1 %v5915_v1  ;;  %1899 = vmatpush1.bf16.msra.mxu0 %v5917_v2  ;;  %v5921_v5 = vld [vmem:[#allocation5 + $0x424] ss:$24 sps:$4 sm:$0xff]   ;;  %v5923_v6 = vld [vmem:[#allocation5 + $0x120] ss:$24 sps:$4 sm:$0xff]   ;;  %v5925_v8 = vld [vmem:[#allocation5 + $0xf4] ss:$24 sps:$4 sm:$0xff]  }
  0x72   :  { %1940 = vmatpush1.bf16.msra.mxu1 %v5918_v3  ;;  %1900 = vmatprep.subr.bf16.mxu0 %v5919_v4  ;;  %v5924_v7 = vld [vmem:[#allocation5 + $0x420] ss:$24 sps:$4 sm:$0xff]   ;;  %v5927_v9 = vld [vmem:[#allocation5 + $0x3f4] ss:$24 sps:$4 sm:$0xff]   ;;  %v5929_v10 = vld [vmem:[#allocation5 + $0xf0] ss:$24 sps:$4 sm:$0xff]  }
  0x73   :  { %1941 = vmatprep.subr.bf16.mxu1 %v5921_v5  ;;  %v5930_v11 = vld [vmem:[#allocation5 + $0x3f0] ss:$24 sps:$4 sm:$0xff]   ;;  %v5931_v12 = vld [vmem:[#allocation5 + $0xc4] ss:$24 sps:$4 sm:$0xff]   ;;  %v5935_v14 = vld [vmem:[#allocation5 + $0xc0] ss:$24 sps:$4 sm:$0xff]  }
  0x74   :  { %v5933_v13 = vld [vmem:[#allocation5 + $0x3c4] ss:$24 sps:$4 sm:$0xff]   ;;  %v5936_v15 = vld [vmem:[#allocation5 + $0x3c0] ss:$24 sps:$4 sm:$0xff]   ;;  %v5937_v16 = vld [vmem:[#allocation5 + $0x94] ss:$24 sps:$4 sm:$0xff]  }
  0x75   :  { %1901 = vmatpush1.bf16.msra.mxu0 %v5923_v6  ;;  %v5939_v17 = vld [vmem:[#allocation5 + $0x394] ss:$24 sps:$4 sm:$0xff]   ;;  %v5941_v18 = vld [vmem:[#allocation5 + $0x90] ss:$24 sps:$4 sm:$0xff]   ;;  %v5943_v20 = vld [vmem:[#allocation5 + $0x64] ss:$24 sps:$4 sm:$0xff]  }
  0x76   :  { %1942 = vmatpush1.bf16.msra.mxu1 %v5924_v7  ;;  %1902 = vmatprep.subr.bf16.mxu0 %v5925_v8  ;;  %v5942_v19 = vld [vmem:[#allocation5 + $0x390] ss:$24 sps:$4 sm:$0xff]   ;;  %v5945_v21 = vld [vmem:[#allocation5 + $0x364] ss:$24 sps:$4 sm:$0xff]   ;;  %v5947_v22 = vld [vmem:[#allocation5 + $0x60] ss:$24 sps:$4 sm:$0xff]  }
  0x77   :  { %1943 = vmatprep.subr.bf16.mxu1 %v5927_v9  ;;  %v5948_v23 = vld [vmem:[#allocation5 + $0x360] ss:$24 sps:$4 sm:$0xff]   ;;  %v5949_v24 = vld [vmem:[#allocation5 + $0x34] ss:$24 sps:$4 sm:$0xff]   ;;  %v5953_v26 = vld [vmem:[#allocation5 + $0x30] ss:$24 sps:$4 sm:$0xff]  }
  0x78   :  { %v5951_v25 = vld [vmem:[#allocation5 + $0x334] ss:$24 sps:$4 sm:$0xff]   ;;  %v5954_v27 = vld [vmem:[#allocation5 + $0x330] ss:$24 sps:$4 sm:$0xff]   ;;  %v5955_v28 = vld [vmem:[#allocation5 + $0x4] ss:$24 sps:$4 sm:$0xff]  }
  0x79   :  { %1903 = vmatpush1.bf16.msra.mxu0 %v5929_v10  ;;  %v5957_v29 = vld [vmem:[#allocation5 + $0x304] ss:$24 sps:$4 sm:$0xff]   ;;  %v5959_v30 = vld [vmem:[#allocation5] ss:$24 sps:$4 sm:$0xff]   ;;  %v5961_v32 = vld [vmem:[#allocation5 + $0x2d4] ss:$24 sps:$4 sm:$0xff]  }
  0x7a   :  { %1944 = vmatpush1.bf16.msra.mxu1 %v5930_v11  ;;  %1904 = vmatprep.subr.bf16.mxu0 %v5931_v12  ;;  %v5960_v31 = vld [vmem:[#allocation5 + $0x300] ss:$24 sps:$4 sm:$0xff]   ;;  %v5963_v33 = vld [vmem:[#allocation5 + $0x5d4] ss:$24 sps:$4 sm:$0xff]   ;;  %v5965_v34 = vld [vmem:[#allocation5 + $0x2d0] ss:$24 sps:$4 sm:$0xff]  }
  0x7b   :  { %1945 = vmatprep.subr.bf16.mxu1 %v5933_v13  ;;  %v5966_v35 = vld [vmem:[#allocation5 + $0x5d0] ss:$24 sps:$4 sm:$0xff]   ;;  %v5967_v36 = vld [vmem:[#allocation5 + $0x2a4] ss:$24 sps:$4 sm:$0xff]   ;;  %v5971_v38 = vld [vmem:[#allocation5 + $0x2a0] ss:$24 sps:$4 sm:$0xff]  }
  0x7c   :  { %v5969_v37 = vld [vmem:[#allocation5 + $0x5a4] ss:$24 sps:$4 sm:$0xff]   ;;  %v5972_v39 = vld [vmem:[#allocation5 + $0x5a0] ss:$24 sps:$4 sm:$0xff]   ;;  %v5973_v40 = vld [vmem:[#allocation5 + $0x274] ss:$24 sps:$4 sm:$0xff]  }
  0x7d   :  { %1905 = vmatpush1.bf16.msra.mxu0 %v5935_v14  ;;  %v5975_v41 = vld [vmem:[#allocation5 + $0x574] ss:$24 sps:$4 sm:$0xff]   ;;  %v5977_v42 = vld [vmem:[#allocation5 + $0x270] ss:$24 sps:$4 sm:$0xff]   ;;  %v5979_v44 = vld [vmem:[#allocation5 + $0x244] ss:$24 sps:$4 sm:$0xff]  }
  0x7e   :  { %1946 = vmatpush1.bf16.msra.mxu1 %v5936_v15  ;;  %1906 = vmatprep.subr.bf16.mxu0 %v5937_v16  ;;  %v5978_v43 = vld [vmem:[#allocation5 + $0x570] ss:$24 sps:$4 sm:$0xff]   ;;  %v5981_v45 = vld [vmem:[#allocation5 + $0x544] ss:$24 sps:$4 sm:$0xff]   ;;  %v5983_v49 = vld [vmem:[#allocation5 + $0x240] ss:$24 sps:$4 sm:$0xff]  }
  0x7f   :  { %1947 = vmatprep.subr.bf16.mxu1 %v5939_v17  ;;  %v146_v46 = vld [vmem:[#allocation2] sm:$0xff]  ;;  %v147_v48 = vld [vmem:[#allocation2 + $0x8] sm:$0xff]  ;;  %v5984_v50 = vld [vmem:[#allocation5 + $0x540] ss:$24 sps:$4 sm:$0xff]   ;;  %s7105_s6 = smov [#allocation17]  }
  0x80   :  { %v7183_v47 = vcombine.high %v146_v46, %v146_v46  ;;  %v7185_v51 = vcombine.high %v147_v48, %v147_v48  ;;  %v5985_v52 = vld [vmem:[#allocation5 + $0x214] ss:$24 sps:$4 sm:$0xff]   ;;  %v5989_v54 = vld [vmem:[#allocation5 + $0x210] ss:$24 sps:$4 sm:$0xff]   ;;  %v5991_v56 = vld [vmem:[#allocation5 + $0x1e4] ss:$24 sps:$4 sm:$0xff]   ;;  %v7189_v6 = vcombine.low %v146_v46, %v146_v46  ;;  %v7191_v7 = vcombine.low %v147_v48, %v147_v48 }
  0x81   :  { %1907 = vmatpush1.bf16.msra.mxu0 %v5941_v18  ;;  %v5987_v53 = vld [vmem:[#allocation5 + $0x514] ss:$24 sps:$4 sm:$0xff]   ;;  %v5990_v55 = vld [vmem:[#allocation5 + $0x510] ss:$24 sps:$4 sm:$0xff]   ;;  %v5993_v57 = vld [vmem:[#allocation5 + $0x4e4] ss:$24 sps:$4 sm:$0xff]  }
  0x82   :  { %1948 = vmatpush1.bf16.msra.mxu1 %v5942_v19  ;;  %1908 = vmatprep.subr.bf16.mxu0 %v5943_v20  ;;  %v5995_v58 = vld [vmem:[#allocation5 + $0x1e0] ss:$24 sps:$4 sm:$0xff]   ;;  %v5997_v60 = vld [vmem:[#allocation5 + $0x1b4] ss:$24 sps:$4 sm:$0xff]   ;;  %v6001_v62 = vld [vmem:[#allocation5 + $0x1b0] ss:$24 sps:$4 sm:$0xff]  }
  0x83   :  { %1949 = vmatprep.subr.bf16.mxu1 %v5945_v21  ;;  %1930 = vmatprep.mubr.bf16.mxu0 %v7183_v47  ;;  %v5996_v59 = vld [vmem:[#allocation5 + $0x4e0] ss:$24 sps:$4 sm:$0xff]   ;;  %v5999_v61 = vld [vmem:[#allocation5 + $0x4b4] ss:$24 sps:$4 sm:$0xff]   ;;  %v6002_v63 = vld [vmem:[#allocation5 + $0x4b0] ss:$24 sps:$4 sm:$0xff]  }
  0x84   :  { %1971 = vmatprep.mubr.bf16.mxu1 %v7185_v51  ;;  %v6003_v0 = vld [vmem:[#allocation5 + $0x184] ss:$24 sps:$4 sm:$0xff]   ;;  %v6007_v2 = vld [vmem:[#allocation5 + $0x180] ss:$24 sps:$4 sm:$0xff]   ;;  %v6015_v4 = vld [vmem:[#allocation5 + $0x754] ss:$24 sps:$4 sm:$0xff]  }
  0x85   :  { %1909 = vmatpush1.bf16.msra.mxu0 %v5947_v22  ;;  %v6005_v1 = vld [vmem:[#allocation5 + $0x484] ss:$24 sps:$4 sm:$0xff]   ;;  %v6008_v3 = vld [vmem:[#allocation5 + $0x480] ss:$24 sps:$4 sm:$0xff]   ;;  %v6013_v8 = vld [vmem:[#allocation5 + $0x750] ss:$24 sps:$4 sm:$0xff]  }
  0x86   :  { %1950 = vmatpush1.bf16.msra.mxu1 %v5948_v23  ;;  %1910 = vmatprep.subr.bf16.mxu0 %v5949_v24  ;;  %v6018_v5 = vld [vmem:[#allocation5 + $0x15c] ss:$24 sps:$4 sm:$0xff]   ;;  %v6016_v9 = vld [vmem:[#allocation5 + $0x158] ss:$24 sps:$4 sm:$0xff]   ;;  %v6024_v11 = vld [vmem:[#allocation5 + $0x12c] ss:$24 sps:$4 sm:$0xff]  }
  0x87   :  { %1951 = vmatprep.subr.bf16.mxu1 %v5951_v25  ;;  %v6021_v10 = vld [vmem:[#allocation5 + $0x724] ss:$24 sps:$4 sm:$0xff]   ;;  %v6019_v12 = vld [vmem:[#allocation5 + $0x720] ss:$24 sps:$4 sm:$0xff]   ;;  %v6027_v14 = vld [vmem:[#allocation5 + $0x6f4] ss:$24 sps:$4 sm:$0xff]  }
  0x88   :  { %v6022_v13 = vld [vmem:[#allocation5 + $0x128] ss:$24 sps:$4 sm:$0xff]   ;;  %v6030_v15 = vld [vmem:[#allocation5 + $0xfc] ss:$24 sps:$4 sm:$0xff]   ;;  %v6028_v17 = vld [vmem:[#allocation5 + $0xf8] ss:$24 sps:$4 sm:$0xff]  }
  0x89   :  { %1911 = vmatpush1.bf16.msra.mxu0 %v5953_v26  ;;  %v6025_v16 = vld [vmem:[#allocation5 + $0x6f0] ss:$24 sps:$4 sm:$0xff]   ;;  %v6033_v18 = vld [vmem:[#allocation5 + $0x6c4] ss:$24 sps:$4 sm:$0xff]   ;;  %v6031_v20 = vld [vmem:[#allocation5 + $0x6c0] ss:$24 sps:$4 sm:$0xff]  }
  0x8a   :  { %1952 = vmatpush1.bf16.msra.mxu1 %v5954_v27  ;;  %1912 = vmatprep.subr.bf16.mxu0 %v5955_v28  ;;  %v6036_v19 = vld [vmem:[#allocation5 + $0xcc] ss:$24 sps:$4 sm:$0xff]   ;;  %v6034_v21 = vld [vmem:[#allocation5 + $0xc8] ss:$24 sps:$4 sm:$0xff]   ;;  %v6042_v23 = vld [vmem:[#allocation5 + $0x9c] ss:$24 sps:$4 sm:$0xff]  }
  0x8b   :  { %1953 = vmatprep.subr.bf16.mxu1 %v5957_v29  ;;  %v6039_v22 = vld [vmem:[#allocation5 + $0x694] ss:$24 sps:$4 sm:$0xff]   ;;  %v6037_v24 = vld [vmem:[#allocation5 + $0x690] ss:$24 sps:$4 sm:$0xff]   ;;  %v6045_v26 = vld [vmem:[#allocation5 + $0x664] ss:$24 sps:$4 sm:$0xff]  }
  0x8c   :  { %v6040_v25 = vld [vmem:[#allocation5 + $0x98] ss:$24 sps:$4 sm:$0xff]   ;;  %v6048_v27 = vld [vmem:[#allocation5 + $0x6c] ss:$24 sps:$4 sm:$0xff]   ;;  %v6046_v29 = vld [vmem:[#allocation5 + $0x68] ss:$24 sps:$4 sm:$0xff]  }
  0x8d   :  { %1913 = vmatpush1.bf16.msra.mxu0 %v5959_v30  ;;  %v6043_v28 = vld [vmem:[#allocation5 + $0x660] ss:$24 sps:$4 sm:$0xff]   ;;  %v6051_v30 = vld [vmem:[#allocation5 + $0x634] ss:$24 sps:$4 sm:$0xff]   ;;  %s5189_s8 = sshll.u32 %s7105_s6, 4  ;;  %s5190_s8 = int_to_ptr.vmem [resolvable:$true] %s5189_s8 }
  0x8e   :  { %1954 = vmatpush1.bf16.msra.mxu1 %v5960_v31  ;;  %1914 = vmatprep.subr.bf16.mxu0 %v5961_v32  ;;  %v6054_v31 = vld [vmem:[#allocation5 + $0x3c] ss:$24 sps:$4 sm:$0xff]   ;;  %v6067_v46 = vld [vmem:[#allocation5 + $0x8a0] ss:$24 sps:$4 sm:$0xff]   ;;  %s7056_s10 = scalar_lea.vmem %s5190_s8, 64  ;;  %p7061_p4 = scmp.lt.s32.totalorder %s5190_s8, %s5190_s8 }
  0x8f   :  { %1955 = vmatprep.subr.bf16.mxu1 %v5963_v33  ;;  %v7196_v32 = vld [vmem:[#allocation2 + $0x10] sm:$0xff]  ;;  %v6049_v33 = vld [vmem:[#allocation5 + $0x630] ss:$24 sps:$4 sm:$0xff]   ;;  %p7057_p3 = scmp.ne.s32.totalorder %s5190_s8, %s7056_s10  ;;  %p7062_p5 = scmp.lt.s32.totalorder %s7056_s10, %s7056_s10 }
  0x90   :  { %v6070_v48 = vld [vmem:[#allocation5 + $0x2a8] ss:$24 sps:$4 sm:$0xff]  }
  0x91   :  { %1915 = vmatpush2.bf16.msra.mxu0 %v5965_v34  ;;  %v7200_v34 = vcombine.high %v7196_v32, %v7196_v32  ;;  %p7063_p6 = por %p7062_p5, %p7061_p4 }
  0x92   :  { %1956 = vmatpush2.bf16.msra.mxu1 %v5966_v35  ;;  %1916 = vmatprep.subr.bf16.mxu0 %v5967_v36  ;;  %v6052_v35 = vld [vmem:[#allocation5 + $0x38] ss:$24 sps:$4 sm:$0xff]   ;;  %v6057_v36 = vld [vmem:[#allocation5 + $0x604] ss:$24 sps:$4 sm:$0xff]  }
  0x93   :  { %1957 = vmatprep.subr.bf16.mxu1 %v5969_v37  ;;  %v6060_v37 = vld [vmem:[#allocation5 + $0xc] ss:$24 sps:$4 sm:$0xff]   ;;  %p7064_p7 = pnand %p7063_p6, %p7057_p3 }
  0x95   :  { %1917 = vmatpush2.bf16.msra.mxu0 %v5971_v38  ;;  %v6055_v38 = vld [vmem:[#allocation5 + $0x600] ss:$24 sps:$4 sm:$0xff]  }
  0x96   :  { %1958 = vmatpush2.bf16.msra.mxu1 %v5972_v39  ;;  %1918 = vmatprep.subr.bf16.mxu0 %v5973_v40  ;;  %v6058_v39 = vld [vmem:[#allocation5 + $0x8] ss:$24 sps:$4 sm:$0xff]   ;;  %v6063_v40 = vld [vmem:[#allocation5 + $0x8d4] ss:$24 sps:$4 sm:$0xff]  }
  0x97   :  { %1959 = vmatprep.subr.bf16.mxu1 %v5975_v41  ;;  %v6066_v41 = vld [vmem:[#allocation5 + $0x2dc] ss:$24 sps:$4 sm:$0xff]  }
  0x99   :  { %1919 = vmatpush2.bf16.msra.mxu0 %v5977_v42  ;;  %v6061_v42 = vld [vmem:[#allocation5 + $0x8d0] ss:$24 sps:$4 sm:$0xff]  }
  0x9a   :  { %1960 = vmatpush2.bf16.msra.mxu1 %v5978_v43  ;;  %1920 = vmatprep.subr.bf16.mxu0 %v5979_v44  ;;  %v6064_v43 = vld [vmem:[#allocation5 + $0x2d8] ss:$24 sps:$4 sm:$0xff]   ;;  %v6069_v44 = vld [vmem:[#allocation5 + $0x8a4] ss:$24 sps:$4 sm:$0xff]  }
  0x9b   :  { %1961 = vmatprep.subr.bf16.mxu1 %v5981_v45  ;;  %v6072_v45 = vld [vmem:[#allocation5 + $0x2ac] ss:$24 sps:$4 sm:$0xff]  }
  0x9d   :  { %1921 = vmatpush2.bf16.msra.mxu0 %v5983_v49  ;;  %v6075_v49 = vld [vmem:[#allocation5 + $0x874] ss:$24 sps:$4 sm:$0xff]  }
  0x9e   :  { %1962 = vmatpush2.bf16.msra.mxu1 %v5984_v50  ;;  %1922 = vmatprep.subr.bf16.mxu0 %v5985_v52  ;;  %v6078_v50 = vld [vmem:[#allocation5 + $0x27c] ss:$24 sps:$4 sm:$0xff]   ;;  %v6073_v52 = vld [vmem:[#allocation5 + $0x870] ss:$24 sps:$4 sm:$0xff]  }
  0x9f   :  { %1963 = vmatprep.subr.bf16.mxu1 %v5987_v53  ;;  %v6076_v53 = vld [vmem:[#allocation5 + $0x278] ss:$24 sps:$4 sm:$0xff]  }
  0xa1   :  { %1923 = vmatpush2.bf16.msra.mxu0 %v5989_v54  ;;  %v6081_v54 = vld [vmem:[#allocation5 + $0x844] ss:$24 sps:$4 sm:$0xff]  }
  0xa2   :  { %1964 = vmatpush2.bf16.msra.mxu1 %v5990_v55  ;;  %1924 = vmatprep.subr.bf16.mxu0 %v5991_v56  ;;  %v6084_v55 = vld [vmem:[#allocation5 + $0x24c] ss:$24 sps:$4 sm:$0xff]   ;;  %v6079_v56 = vld [vmem:[#allocation5 + $0x840] ss:$24 sps:$4 sm:$0xff]  }
  0xa3   :  { %1965 = vmatprep.subr.bf16.mxu1 %v5993_v57  ;;  %v6082_v57 = vld [vmem:[#allocation5 + $0x248] ss:$24 sps:$4 sm:$0xff]  }
  0xa5   :  { %1925 = vmatpush2.bf16.msra.mxu0 %v5995_v58  ;;  %v6087_v58 = vld [vmem:[#allocation5 + $0x814] ss:$24 sps:$4 sm:$0xff]  }
  0xa6   :  { %1966 = vmatpush2.bf16.msra.mxu1 %v5996_v59  ;;  %1926 = vmatprep.subr.bf16.mxu0 %v5997_v60  ;;  %v6090_v59 = vld [vmem:[#allocation5 + $0x21c] ss:$24 sps:$4 sm:$0xff]   ;;  %v6085_v60 = vld [vmem:[#allocation5 + $0x810] ss:$24 sps:$4 sm:$0xff]  }
  0xa7   :  { %1967 = vmatprep.subr.bf16.mxu1 %v5999_v61  ;;  %v6088_v61 = vld [vmem:[#allocation5 + $0x218] ss:$24 sps:$4 sm:$0xff]  }
  0xa9   :  { %1927 = vmatpush2.bf16.msra.mxu0 %v6001_v62  ;;  %v6093_v62 = vld [vmem:[#allocation5 + $0x7e4] ss:$24 sps:$4 sm:$0xff]  }
  0xaa   :  { %1968 = vmatpush2.bf16.msra.mxu1 %v6002_v63  ;;  %1928 = vmatprep.subr.bf16.mxu0 %v6003_v0  ;;  %v6096_v63 = vld [vmem:[#allocation5 + $0x1ec] ss:$24 sps:$4 sm:$0xff]   ;;  %v6091_v0 = vld [vmem:[#allocation5 + $0x7e0] ss:$24 sps:$4 sm:$0xff]  }
  0xab   :  { %1969 = vmatprep.subr.bf16.mxu1 %v6005_v1  ;;  %v6094_v1 = vld [vmem:[#allocation5 + $0x1e8] ss:$24 sps:$4 sm:$0xff]  }
  0xad   :  { %1929 = vmatpush2.bf16.msra.mxu0 %v6007_v2  ;;  %v6099_v2 = vld [vmem:[#allocation5 + $0x7b4] ss:$24 sps:$4 sm:$0xff]  }
  0xae   :  { %1970 = vmatpush2.bf16.msra.mxu1 %v6008_v3  ;;  %1980 = vmatprep.subr.bf16.mxu0 %v6015_v4  ;;  %v6102_v3 = vld [vmem:[#allocation5 + $0x1bc] ss:$24 sps:$4 sm:$0xff]   ;;  %v6097_v4 = vld [vmem:[#allocation5 + $0x7b0] ss:$24 sps:$4 sm:$0xff]  }
  0xaf   :  { %2021 = vmatprep.subr.bf16.mxu1 %v6018_v5  ;;  %v6100_v5 = vld [vmem:[#allocation5 + $0x1b8] ss:$24 sps:$4 sm:$0xff]  }
  0xb0   :  { %1931 = vmatmul.mubr.bf16.vlgmr.msra.gmra.mxu0 %v7189_v6 }
  0xb1   :  { %1972 = vmatmul.mubr.bf16.vlgmr.msra.gmra.mxu1 %v7191_v7  ;;  %1981 = vmatpush1.bf16.msra.mxu0 %v6013_v8  ;;  %v6105_v8 = vld [vmem:[#allocation5 + $0x784] ss:$24 sps:$4 sm:$0xff]  }
  0xb2   :  { %2022 = vmatpush1.bf16.msra.mxu1 %v6016_v9  ;;  %1982 = vmatprep.subr.bf16.mxu0 %v6021_v10  ;;  %v6108_v9 = vld [vmem:[#allocation5 + $0x18c] ss:$24 sps:$4 sm:$0xff]   ;;  %v6103_v10 = vld [vmem:[#allocation5 + $0x780] ss:$24 sps:$4 sm:$0xff]  }
  0xb3   :  { %2023 = vmatprep.subr.bf16.mxu1 %v6024_v11  ;;  %2053 = vmatprep.mubr.bf16.mxu1 %v7183_v47  ;;  %v6106_v11 = vld [vmem:[#allocation5 + $0x188] ss:$24 sps:$4 sm:$0xff]  }
  0xb4   :  { %2012 = vmatprep.mubr.bf16.mxu0 %v7200_v34 }
  0xb5   :  { %1983 = vmatpush1.bf16.msra.mxu0 %v6019_v12  ;;  %v6113_v12 = vld [vmem:[#allocation5 + $0x45c] ss:$24 sps:$4 sm:$0xff]  }
  0xb6   :  { %2024 = vmatpush1.bf16.msra.mxu1 %v6022_v13  ;;  %1984 = vmatprep.subr.bf16.mxu0 %v6027_v14  ;;  %v6116_v13 = vld [vmem:[#allocation5 + $0x75c] ss:$24 sps:$4 sm:$0xff]   ;;  %v7205_v14 = vcombine.low %v7196_v32, %v7196_v32  ;;  %v6138_v32 = vld [vmem:[#allocation5 + $0x698] ss:$24 sps:$4 sm:$0xff]  }
  0xb7   :  { %2025 = vmatprep.subr.bf16.mxu1 %v6030_v15  ;;  %v6111_v15 = vld [vmem:[#allocation5 + $0x458] ss:$24 sps:$4 sm:$0xff]  }
  0xb9   :  { %1985 = vmatpush1.bf16.msra.mxu0 %v6025_v16  ;;  %v6114_v16 = vld [vmem:[#allocation5 + $0x758] ss:$24 sps:$4 sm:$0xff]  }
  0xba   :  { %2026 = vmatpush1.bf16.msra.mxu1 %v6028_v17  ;;  %1986 = vmatprep.subr.bf16.mxu0 %v6033_v18  ;;  %v6119_v17 = vld [vmem:[#allocation5 + $0x42c] ss:$24 sps:$4 sm:$0xff]  }
  0xbb   :  { %2027 = vmatprep.subr.bf16.mxu1 %v6036_v19  ;;  %v6122_v18 = vld [vmem:[#allocation5 + $0x72c] ss:$24 sps:$4 sm:$0xff]   ;;  %v6117_v19 = vld [vmem:[#allocation5 + $0x428] ss:$24 sps:$4 sm:$0xff]  }
  0xbd   :  { %1987 = vmatpush1.bf16.msra.mxu0 %v6031_v20  ;;  %v6120_v20 = vld [vmem:[#allocation5 + $0x728] ss:$24 sps:$4 sm:$0xff]  }
  0xbe   :  { %2028 = vmatpush1.bf16.msra.mxu1 %v6034_v21  ;;  %1988 = vmatprep.subr.bf16.mxu0 %v6039_v22  ;;  %v6125_v21 = vld [vmem:[#allocation5 + $0x3fc] ss:$24 sps:$4 sm:$0xff]  }
  0xbf   :  { %2029 = vmatprep.subr.bf16.mxu1 %v6042_v23  ;;  %v6128_v22 = vld [vmem:[#allocation5 + $0x6fc] ss:$24 sps:$4 sm:$0xff]   ;;  %v6123_v23 = vld [vmem:[#allocation5 + $0x3f8] ss:$24 sps:$4 sm:$0xff]  }
  0xc1   :  { %1989 = vmatpush1.bf16.msra.mxu0 %v6037_v24  ;;  %v6126_v24 = vld [vmem:[#allocation5 + $0x6f8] ss:$24 sps:$4 sm:$0xff]  }
  0xc2   :  { %2030 = vmatpush1.bf16.msra.mxu1 %v6040_v25  ;;  %1990 = vmatprep.subr.bf16.mxu0 %v6045_v26  ;;  %v6131_v25 = vld [vmem:[#allocation5 + $0x3cc] ss:$24 sps:$4 sm:$0xff]  }
  0xc3   :  { %2031 = vmatprep.subr.bf16.mxu1 %v6048_v27  ;;  %v6134_v26 = vld [vmem:[#allocation5 + $0x6cc] ss:$24 sps:$4 sm:$0xff]   ;;  %v6129_v27 = vld [vmem:[#allocation5 + $0x3c8] ss:$24 sps:$4 sm:$0xff]  }
  0xc5   :  { %1991 = vmatpush1.bf16.msra.mxu0 %v6043_v28  ;;  %v6132_v28 = vld [vmem:[#allocation5 + $0x6c8] ss:$24 sps:$4 sm:$0xff]  }
  0xc6   :  { %2032 = vmatpush1.bf16.msra.mxu1 %v6046_v29  ;;  %1992 = vmatprep.subr.bf16.mxu0 %v6051_v30  ;;  %v6137_v29 = vld [vmem:[#allocation5 + $0x39c] ss:$24 sps:$4 sm:$0xff]  }
  0xc7   :  { %2033 = vmatprep.subr.bf16.mxu1 %v6054_v31  ;;  %v6140_v30 = vld [vmem:[#allocation5 + $0x69c] ss:$24 sps:$4 sm:$0xff]   ;;  %v6135_v31 = vld [vmem:[#allocation5 + $0x398] ss:$24 sps:$4 sm:$0xff]  }
  0xc9   :  { %1993 = vmatpush1.bf16.msra.mxu0 %v6049_v33  ;;  %v6143_v33 = vld [vmem:[#allocation5 + $0x36c] ss:$24 sps:$4 sm:$0xff]  }
  0xca   :  { %2034 = vmatpush1.bf16.msra.mxu1 %v6052_v35  ;;  %1994 = vmatprep.subr.bf16.mxu0 %v6057_v36  ;;  %v6146_v35 = vld [vmem:[#allocation5 + $0x66c] ss:$24 sps:$4 sm:$0xff]   ;;  %v6141_v36 = vld [vmem:[#allocation5 + $0x368] ss:$24 sps:$4 sm:$0xff]  }
  0xcb   :  { %2035 = vmatprep.subr.bf16.mxu1 %v6060_v37  ;;  %v6144_v37 = vld [vmem:[#allocation5 + $0x668] ss:$24 sps:$4 sm:$0xff]  }
  0xcd   :  { %1995 = vmatpush1.bf16.msra.mxu0 %v6055_v38  ;;  %v6149_v38 = vld [vmem:[#allocation5 + $0x33c] ss:$24 sps:$4 sm:$0xff]  }
  0xce   :  { %2036 = vmatpush1.bf16.msra.mxu1 %v6058_v39  ;;  %1996 = vmatprep.subr.bf16.mxu0 %v6063_v40  ;;  %v6152_v39 = vld [vmem:[#allocation5 + $0x63c] ss:$24 sps:$4 sm:$0xff]   ;;  %v6147_v40 = vld [vmem:[#allocation5 + $0x338] ss:$24 sps:$4 sm:$0xff]  }
  0xcf   :  { %2037 = vmatprep.subr.bf16.mxu1 %v6066_v41  ;;  %v6150_v41 = vld [vmem:[#allocation5 + $0x638] ss:$24 sps:$4 sm:$0xff]  }
  0xd1   :  { %1997 = vmatpush2.bf16.msra.mxu0 %v6061_v42  ;;  %v6155_v42 = vld [vmem:[#allocation5 + $0x30c] ss:$24 sps:$4 sm:$0xff]  }
  0xd2   :  { %2038 = vmatpush2.bf16.msra.mxu1 %v6064_v43  ;;  %1998 = vmatprep.subr.bf16.mxu0 %v6069_v44  ;;  %v6158_v43 = vld [vmem:[#allocation5 + $0x60c] ss:$24 sps:$4 sm:$0xff]   ;;  %v6153_v44 = vld [vmem:[#allocation5 + $0x308] ss:$24 sps:$4 sm:$0xff]  }
  0xd3   :  { %2039 = vmatprep.subr.bf16.mxu1 %v6072_v45  ;;  %v6156_v45 = vld [vmem:[#allocation5 + $0x608] ss:$24 sps:$4 sm:$0xff]  }
  0xd5   :  { %1999 = vmatpush2.bf16.msra.mxu0 %v6067_v46  ;;  %v6161_v46 = vld [vmem:[#allocation5 + $0x5dc] ss:$24 sps:$4 sm:$0xff]  }
  0xd6   :  { %2040 = vmatpush2.bf16.msra.mxu1 %v6070_v48  ;;  %2000 = vmatprep.subr.bf16.mxu0 %v6075_v49  ;;  %v6164_v48 = vld [vmem:[#allocation5 + $0x8dc] ss:$24 sps:$4 sm:$0xff]   ;;  %v6159_v49 = vld [vmem:[#allocation5 + $0x5d8] ss:$24 sps:$4 sm:$0xff]  }
  0xd7   :  { %2041 = vmatprep.subr.bf16.mxu1 %v6078_v50  ;;  %v6162_v50 = vld [vmem:[#allocation5 + $0x8d8] ss:$24 sps:$4 sm:$0xff]  }
  0xd9   :  { %2001 = vmatpush2.bf16.msra.mxu0 %v6073_v52  ;;  %v6167_v52 = vld [vmem:[#allocation5 + $0x5ac] ss:$24 sps:$4 sm:$0xff]  }
  0xda   :  { %2042 = vmatpush2.bf16.msra.mxu1 %v6076_v53  ;;  %2002 = vmatprep.subr.bf16.mxu0 %v6081_v54  ;;  %v6170_v53 = vld [vmem:[#allocation5 + $0x8ac] ss:$24 sps:$4 sm:$0xff]   ;;  %v6165_v54 = vld [vmem:[#allocation5 + $0x5a8] ss:$24 sps:$4 sm:$0xff]  }
  0xdb   :  { %2043 = vmatprep.subr.bf16.mxu1 %v6084_v55  ;;  %v6168_v55 = vld [vmem:[#allocation5 + $0x8a8] ss:$24 sps:$4 sm:$0xff]  }
  0xdd   :  { %2003 = vmatpush2.bf16.msra.mxu0 %v6079_v56  ;;  %v6173_v56 = vld [vmem:[#allocation5 + $0x57c] ss:$24 sps:$4 sm:$0xff]  }
  0xde   :  { %2044 = vmatpush2.bf16.msra.mxu1 %v6082_v57  ;;  %2004 = vmatprep.subr.bf16.mxu0 %v6087_v58  ;;  %v6176_v57 = vld [vmem:[#allocation5 + $0x87c] ss:$24 sps:$4 sm:$0xff]   ;;  %v6171_v58 = vld [vmem:[#allocation5 + $0x578] ss:$24 sps:$4 sm:$0xff]  }
  0xdf   :  { %2045 = vmatprep.subr.bf16.mxu1 %v6090_v59  ;;  %v6174_v59 = vld [vmem:[#allocation5 + $0x878] ss:$24 sps:$4 sm:$0xff]  }
  0xe1   :  { %2005 = vmatpush2.bf16.msra.mxu0 %v6085_v60  ;;  %v6179_v60 = vld [vmem:[#allocation5 + $0x54c] ss:$24 sps:$4 sm:$0xff]  }
  0xe2   :  { %2046 = vmatpush2.bf16.msra.mxu1 %v6088_v61  ;;  %2006 = vmatprep.subr.bf16.mxu0 %v6093_v62  ;;  %v6182_v61 = vld [vmem:[#allocation5 + $0x84c] ss:$24 sps:$4 sm:$0xff]   ;;  %v6177_v62 = vld [vmem:[#allocation5 + $0x548] ss:$24 sps:$4 sm:$0xff]  }
  0xe3   :  { %2047 = vmatprep.subr.bf16.mxu1 %v6096_v63  ;;  %v6180_v63 = vld [vmem:[#allocation5 + $0x848] ss:$24 sps:$4 sm:$0xff]  }
  0xe5   :  { %2007 = vmatpush2.bf16.msra.mxu0 %v6091_v0  ;;  %v6185_v0 = vld [vmem:[#allocation5 + $0x51c] ss:$24 sps:$4 sm:$0xff]  }
  0xe6   :  { %2048 = vmatpush2.bf16.msra.mxu1 %v6094_v1  ;;  %2008 = vmatprep.subr.bf16.mxu0 %v6099_v2  ;;  %v6188_v1 = vld [vmem:[#allocation5 + $0x81c] ss:$24 sps:$4 sm:$0xff]   ;;  %v6183_v2 = vld [vmem:[#allocation5 + $0x518] ss:$24 sps:$4 sm:$0xff]  }
  0xe7   :  { %2049 = vmatprep.subr.bf16.mxu1 %v6102_v3  ;;  %v6186_v3 = vld [vmem:[#allocation5 + $0x818] ss:$24 sps:$4 sm:$0xff]  }
  0xe9   :  { %2009 = vmatpush2.bf16.msra.mxu0 %v6097_v4  ;;  %v6191_v4 = vld [vmem:[#allocation5 + $0x4ec] ss:$24 sps:$4 sm:$0xff]  }
  0xea   :  { %2050 = vmatpush2.bf16.msra.mxu1 %v6100_v5  ;;  %2010 = vmatprep.subr.bf16.mxu0 %v6105_v8  ;;  %v6194_v5 = vld [vmem:[#allocation5 + $0x7ec] ss:$24 sps:$4 sm:$0xff]   ;;  %v6189_v8 = vld [vmem:[#allocation5 + $0x4e8] ss:$24 sps:$4 sm:$0xff]  }
  0xeb   :  { %2051 = vmatprep.subr.bf16.mxu1 %v6108_v9  ;;  %v6192_v9 = vld [vmem:[#allocation5 + $0x7e8] ss:$24 sps:$4 sm:$0xff]  }
  0xed   :  { %2011 = vmatpush2.bf16.msra.mxu0 %v6103_v10  ;;  %v6197_v10 = vld [vmem:[#allocation5 + $0x4bc] ss:$24 sps:$4 sm:$0xff]  }
  0xee   :  { %2052 = vmatpush2.bf16.msra.mxu1 %v6106_v11  ;;  %2062 = vmatprep.subr.bf16.mxu0 %v6113_v12  ;;  %v6200_v11 = vld [vmem:[#allocation5 + $0x7bc] ss:$24 sps:$4 sm:$0xff]   ;;  %v6195_v12 = vld [vmem:[#allocation5 + $0x4b8] ss:$24 sps:$4 sm:$0xff]  }
  0xef   :  { %2103 = vmatprep.subr.bf16.mxu1 %v6116_v13  ;;  %v6198_v13 = vld [vmem:[#allocation5 + $0x7b8] ss:$24 sps:$4 sm:$0xff]  }
  0xf0   :  { %2013 = vmatmul.mubr.bf16.vlgmr.msra.gmra.mxu0 %v7205_v14 }
  0xf1   :  { %2054 = vmatmul.mubr.bf16.vlgmr.msra.gmra.mxu1 %v7189_v6  ;;  %2063 = vmatpush1.bf16.msra.mxu0 %v6111_v15  ;;  %v6203_v15 = vld [vmem:[#allocation5 + $0x48c] ss:$24 sps:$4 sm:$0xff]  }
  0xf2   :  { %2104 = vmatpush1.bf16.msra.mxu1 %v6114_v16  ;;  %2064 = vmatprep.subr.bf16.mxu0 %v6119_v17  ;;  %v6206_v16 = vld [vmem:[#allocation5 + $0x78c] ss:$24 sps:$4 sm:$0xff]   ;;  %v6201_v17 = vld [vmem:[#allocation5 + $0x488] ss:$24 sps:$4 sm:$0xff]  }
  0xf3   :  { %2105 = vmatprep.subr.bf16.mxu1 %v6122_v18  ;;  %2094 = vmatprep.mubr.bf16.mxu0 %v7185_v51  ;;  %v6204_v18 = vld [vmem:[#allocation5 + $0x788] ss:$24 sps:$4 sm:$0xff]  }
  0xf4   :  { %2135 = vmatprep.mubr.bf16.mxu1 %v7200_v34 }
  0xf5   :  { %2065 = vmatpush1.bf16.msra.mxu0 %v6117_v19  ;;  %v6209_v19 = vld [vmem:[#allocation5 + $0x164] ss:$24 sps:$4 sm:$0xff]  }
  0xf6   :  { %2106 = vmatpush1.bf16.msra.mxu1 %v6120_v20  ;;  %2066 = vmatprep.subr.bf16.mxu0 %v6125_v21  ;;  %v6212_v20 = vld [vmem:[#allocation5 + $0x464] ss:$24 sps:$4 sm:$0xff]   ;;  %v6207_v21 = vld [vmem:[#allocation5 + $0x160] ss:$24 sps:$4 sm:$0xff]  }
  0xf7   :  { %2107 = vmatprep.subr.bf16.mxu1 %v6128_v22  ;;  %v6210_v22 = vld [vmem:[#allocation5 + $0x460] ss:$24 sps:$4 sm:$0xff]  }
  0xf9   :  { %2067 = vmatpush1.bf16.msra.mxu0 %v6123_v23  ;;  %v6215_v23 = vld [vmem:[#allocation5 + $0x134] ss:$24 sps:$4 sm:$0xff]  }
  0xfa   :  { %2108 = vmatpush1.bf16.msra.mxu1 %v6126_v24  ;;  %2068 = vmatprep.subr.bf16.mxu0 %v6131_v25  ;;  %v6218_v24 = vld [vmem:[#allocation5 + $0x434] ss:$24 sps:$4 sm:$0xff]   ;;  %v6213_v25 = vld [vmem:[#allocation5 + $0x130] ss:$24 sps:$4 sm:$0xff]  }
  0xfb   :  { %2109 = vmatprep.subr.bf16.mxu1 %v6134_v26  ;;  %v6216_v26 = vld [vmem:[#allocation5 + $0x430] ss:$24 sps:$4 sm:$0xff]  }
  0xfd   :  { %2069 = vmatpush1.bf16.msra.mxu0 %v6129_v27  ;;  %v6221_v27 = vld [vmem:[#allocation5 + $0x104] ss:$24 sps:$4 sm:$0xff]  }
  0xfe   :  { %2110 = vmatpush1.bf16.msra.mxu1 %v6132_v28  ;;  %2070 = vmatprep.subr.bf16.mxu0 %v6137_v29  ;;  %v6224_v28 = vld [vmem:[#allocation5 + $0x404] ss:$24 sps:$4 sm:$0xff]   ;;  %v6219_v29 = vld [vmem:[#allocation5 + $0x100] ss:$24 sps:$4 sm:$0xff]  }
  0xff   :  { %2111 = vmatprep.subr.bf16.mxu1 %v6140_v30  ;;  %v6222_v30 = vld [vmem:[#allocation5 + $0x400] ss:$24 sps:$4 sm:$0xff]  }
 0x101   :  { %2071 = vmatpush1.bf16.msra.mxu0 %v6135_v31  ;;  %v6227_v31 = vld [vmem:[#allocation5 + $0xd4] ss:$24 sps:$4 sm:$0xff]  }
 0x102   :  { %2112 = vmatpush1.bf16.msra.mxu1 %v6138_v32  ;;  %2072 = vmatprep.subr.bf16.mxu0 %v6143_v33  ;;  %v6230_v32 = vld [vmem:[#allocation5 + $0x3d4] ss:$24 sps:$4 sm:$0xff]   ;;  %v6225_v33 = vld [vmem:[#allocation5 + $0xd0] ss:$24 sps:$4 sm:$0xff]  }
 0x103   :  { %2113 = vmatprep.subr.bf16.mxu1 %v6146_v35  ;;  %v6228_v35 = vld [vmem:[#allocation5 + $0x3d0] ss:$24 sps:$4 sm:$0xff]  }
 0x105   :  { %2073 = vmatpush1.bf16.msra.mxu0 %v6141_v36  ;;  %v6233_v36 = vld [vmem:[#allocation5 + $0xa4] ss:$24 sps:$4 sm:$0xff]  }
 0x106   :  { %2114 = vmatpush1.bf16.msra.mxu1 %v6144_v37  ;;  %2074 = vmatprep.subr.bf16.mxu0 %v6149_v38  ;;  %v6236_v37 = vld [vmem:[#allocation5 + $0x3a4] ss:$24 sps:$4 sm:$0xff]   ;;  %v6231_v38 = vld [vmem:[#allocation5 + $0xa0] ss:$24 sps:$4 sm:$0xff]  }
 0x107   :  { %2115 = vmatprep.subr.bf16.mxu1 %v6152_v39  ;;  %v6242_v39 = vld [vmem:[#allocation5 + $0x374] ss:$24 sps:$4 sm:$0xff]  }
 0x109   :  { %2075 = vmatpush1.bf16.msra.mxu0 %v6147_v40  ;;  %v6237_v40 = vld [vmem:[#allocation5 + $0x70] ss:$24 sps:$4 sm:$0xff]  }
 0x10a   :  { %2116 = vmatpush1.bf16.msra.mxu1 %v6150_v41  ;;  %2076 = vmatprep.subr.bf16.mxu0 %v6155_v42  ;;  %v6240_v41 = vld [vmem:[#allocation5 + $0x370] ss:$24 sps:$4 sm:$0xff]   ;;  %v6245_v42 = vld [vmem:[#allocation5 + $0x44] ss:$24 sps:$4 sm:$0xff]  }
 0x10b   :  { %2117 = vmatprep.subr.bf16.mxu1 %v6158_v43  ;;  %v6248_v43 = vld [vmem:[#allocation5 + $0x344] ss:$24 sps:$4 sm:$0xff]  }
 0x10d   :  { %2077 = vmatpush1.bf16.msra.mxu0 %v6153_v44  ;;  %v6243_v44 = vld [vmem:[#allocation5 + $0x40] ss:$24 sps:$4 sm:$0xff]  }
 0x10e   :  { %2118 = vmatpush1.bf16.msra.mxu1 %v6156_v45  ;;  %2078 = vmatprep.subr.bf16.mxu0 %v6161_v46  ;;  %v6246_v45 = vld [vmem:[#allocation5 + $0x340] ss:$24 sps:$4 sm:$0xff]   ;;  %v6251_v46 = vld [vmem:[#allocation5 + $0x14] ss:$24 sps:$4 sm:$0xff]  }
 0x10f   :  { %2119 = vmatprep.subr.bf16.mxu1 %v6164_v48  ;;  %v6254_v48 = vld [vmem:[#allocation5 + $0x314] ss:$24 sps:$4 sm:$0xff]  }
 0x111   :  { %2079 = vmatpush2.bf16.msra.mxu0 %v6159_v49  ;;  %v6249_v49 = vld [vmem:[#allocation5 + $0x10] ss:$24 sps:$4 sm:$0xff]  }
 0x112   :  { %2120 = vmatpush2.bf16.msra.mxu1 %v6162_v50  ;;  %2080 = vmatprep.subr.bf16.mxu0 %v6167_v52  ;;  %v6252_v50 = vld [vmem:[#allocation5 + $0x310] ss:$24 sps:$4 sm:$0xff]   ;;  %v6257_v52 = vld [vmem:[#allocation5 + $0x2e4] ss:$24 sps:$4 sm:$0xff]  }
 0x113   :  { %2121 = vmatprep.subr.bf16.mxu1 %v6170_v53  ;;  %v6260_v53 = vld [vmem:[#allocation5 + $0x5e4] ss:$24 sps:$4 sm:$0xff]  }
 0x115   :  { %2081 = vmatpush2.bf16.msra.mxu0 %v6165_v54  ;;  %v6255_v54 = vld [vmem:[#allocation5 + $0x2e0] ss:$24 sps:$4 sm:$0xff]  }
 0x116   :  { %2122 = vmatpush2.bf16.msra.mxu1 %v6168_v55  ;;  %2082 = vmatprep.subr.bf16.mxu0 %v6173_v56  ;;  %v6258_v55 = vld [vmem:[#allocation5 + $0x5e0] ss:$24 sps:$4 sm:$0xff]   ;;  %v6263_v56 = vld [vmem:[#allocation5 + $0x2b4] ss:$24 sps:$4 sm:$0xff]  }
 0x117   :  { %2123 = vmatprep.subr.bf16.mxu1 %v6176_v57  ;;  %v6266_v57 = vld [vmem:[#allocation5 + $0x5b4] ss:$24 sps:$4 sm:$0xff]  }
 0x119   :  { %2083 = vmatpush2.bf16.msra.mxu0 %v6171_v58  ;;  %v6261_v58 = vld [vmem:[#allocation5 + $0x2b0] ss:$24 sps:$4 sm:$0xff]  }
 0x11a   :  { %2124 = vmatpush2.bf16.msra.mxu1 %v6174_v59  ;;  %2084 = vmatprep.subr.bf16.mxu0 %v6179_v60  ;;  %v6264_v59 = vld [vmem:[#allocation5 + $0x5b0] ss:$24 sps:$4 sm:$0xff]   ;;  %v6269_v60 = vld [vmem:[#allocation5 + $0x284] ss:$24 sps:$4 sm:$0xff]  }
 0x11b   :  { %2125 = vmatprep.subr.bf16.mxu1 %v6182_v61  ;;  %v6272_v61 = vld [vmem:[#allocation5 + $0x584] ss:$24 sps:$4 sm:$0xff]  }
 0x11d   :  { %2085 = vmatpush2.bf16.msra.mxu0 %v6177_v62  ;;  %v6267_v62 = vld [vmem:[#allocation5 + $0x280] ss:$24 sps:$4 sm:$0xff]  }
 0x11e   :  { %2126 = vmatpush2.bf16.msra.mxu1 %v6180_v63  ;;  %2086 = vmatprep.subr.bf16.mxu0 %v6185_v0  ;;  %v6270_v63 = vld [vmem:[#allocation5 + $0x580] ss:$24 sps:$4 sm:$0xff]   ;;  %v6275_v0 = vld [vmem:[#allocation5 + $0x254] ss:$24 sps:$4 sm:$0xff]  }
 0x11f   :  { %2127 = vmatprep.subr.bf16.mxu1 %v6188_v1  ;;  %v6278_v1 = vld [vmem:[#allocation5 + $0x554] ss:$24 sps:$4 sm:$0xff]  }
 0x121   :  { %2087 = vmatpush2.bf16.msra.mxu0 %v6183_v2  ;;  %v6273_v2 = vld [vmem:[#allocation5 + $0x250] ss:$24 sps:$4 sm:$0xff]  }
 0x122   :  { %2128 = vmatpush2.bf16.msra.mxu1 %v6186_v3  ;;  %2088 = vmatprep.subr.bf16.mxu0 %v6191_v4  ;;  %v6276_v3 = vld [vmem:[#allocation5 + $0x550] ss:$24 sps:$4 sm:$0xff]   ;;  %v6281_v4 = vld [vmem:[#allocation5 + $0x224] ss:$24 sps:$4 sm:$0xff]  }
 0x123   :  { %2129 = vmatprep.subr.bf16.mxu1 %v6194_v5  ;;  %v6284_v5 = vld [vmem:[#allocation5 + $0x524] ss:$24 sps:$4 sm:$0xff]  }
 0x125   :  { %2089 = vmatpush2.bf16.msra.mxu0 %v6189_v8  ;;  %v6279_v8 = vld [vmem:[#allocation5 + $0x220] ss:$24 sps:$4 sm:$0xff]  }
 0x126   :  { %2130 = vmatpush2.bf16.msra.mxu1 %v6192_v9  ;;  %2090 = vmatprep.subr.bf16.mxu0 %v6197_v10  ;;  %v6282_v9 = vld [vmem:[#allocation5 + $0x520] ss:$24 sps:$4 sm:$0xff]   ;;  %v6287_v10 = vld [vmem:[#allocation5 + $0x1f4] ss:$24 sps:$4 sm:$0xff]  }
 0x127   :  { %2131 = vmatprep.subr.bf16.mxu1 %v6200_v11  ;;  %v6290_v11 = vld [vmem:[#allocation5 + $0x4f4] ss:$24 sps:$4 sm:$0xff]  }
 0x129   :  { %2091 = vmatpush2.bf16.msra.mxu0 %v6195_v12  ;;  %v6285_v12 = vld [vmem:[#allocation5 + $0x1f0] ss:$24 sps:$4 sm:$0xff]  }
 0x12a   :  { %2132 = vmatpush2.bf16.msra.mxu1 %v6198_v13  ;;  %2092 = vmatprep.subr.bf16.mxu0 %v6203_v15  ;;  %v6288_v13 = vld [vmem:[#allocation5 + $0x4f0] ss:$24 sps:$4 sm:$0xff]   ;;  %v6293_v15 = vld [vmem:[#allocation5 + $0x1c4] ss:$24 sps:$4 sm:$0xff]  }
 0x12b   :  { %2133 = vmatprep.subr.bf16.mxu1 %v6206_v16  ;;  %v6296_v16 = vld [vmem:[#allocation5 + $0x4c4] ss:$24 sps:$4 sm:$0xff]  }
 0x12d   :  { %2093 = vmatpush2.bf16.msra.mxu0 %v6201_v17  ;;  %v6291_v17 = vld [vmem:[#allocation5 + $0x1c0] ss:$24 sps:$4 sm:$0xff]  }
 0x12e   :  { %2134 = vmatpush2.bf16.msra.mxu1 %v6204_v18  ;;  %2144 = vmatprep.subr.bf16.mxu0 %v6209_v19  ;;  %v6294_v18 = vld [vmem:[#allocation5 + $0x4c0] ss:$24 sps:$4 sm:$0xff]   ;;  %v6299_v19 = vld [vmem:[#allocation5 + $0x194] ss:$24 sps:$4 sm:$0xff]  }
 0x12f   :  { %2185 = vmatprep.subr.bf16.mxu1 %v6212_v20  ;;  %v6302_v20 = vld [vmem:[#allocation5 + $0x494] ss:$24 sps:$4 sm:$0xff]  }
 0x130   :  { %2095 = vmatmul.mubr.bf16.vlgmr.msra.gmra.mxu0 %v7191_v7 }
 0x131   :  { %2136 = vmatmul.mubr.bf16.vlgmr.msra.gmra.mxu1 %v7205_v14  ;;  %2145 = vmatpush1.bf16.msra.mxu0 %v6207_v21  ;;  %v6297_v21 = vld [vmem:[#allocation5 + $0x190] ss:$24 sps:$4 sm:$0xff]  }
 0x132   :  { %2186 = vmatpush1.bf16.msra.mxu1 %v6210_v22  ;;  %2146 = vmatprep.subr.bf16.mxu0 %v6215_v23  ;;  %v6300_v22 = vld [vmem:[#allocation5 + $0x490] ss:$24 sps:$4 sm:$0xff]   ;;  %v6305_v23 = vld [vmem:[#allocation5 + $0x764] ss:$24 sps:$4 sm:$0xff]  }
 0x133   :  { %2187 = vmatprep.subr.bf16.mxu1 %v6218_v24  ;;  %2176 = vmatprep.mubr.bf16.mxu0 %v7183_v47  ;;  %v6234_v47 = vld [vmem:[#allocation5 + $0x3a0] ss:$24 sps:$4 sm:$0xff]  }
 0x134   :  { %2217 = vmatprep.mubr.bf16.mxu1 %v7185_v51  ;;  %v6239_v51 = vld [vmem:[#allocation5 + $0x74] ss:$24 sps:$4 sm:$0xff]  }
 0x135   :  { %2147 = vmatpush1.bf16.msra.mxu0 %v6213_v25  ;;  %v6326_v24 = vld [vmem:[#allocation8 + $0xe4] ss:$16 sps:$4 sm:$0xff]  }
 0x136   :  { %2188 = vmatpush1.bf16.msra.mxu1 %v6216_v26  ;;  %2148 = vmatprep.subr.bf16.mxu0 %v6221_v27  ;;  %v6303_v25 = vld [vmem:[#allocation5 + $0x760] ss:$24 sps:$4 sm:$0xff]   ;;  %v6308_v27 = vld [vmem:[#allocation5 + $0x734] ss:$24 sps:$4 sm:$0xff]  }
 0x137   :  { %2189 = vmatprep.subr.bf16.mxu1 %v6224_v28  ;;  %v6324_v26 = vld [vmem:[#allocation8 + $0xe0] ss:$16 sps:$4 sm:$0xff]   ;;  %v6332_v28 = vld [vmem:[#allocation8 + $0xc4] ss:$16 sps:$4 sm:$0xff]  }
 0x139   :  { %2149 = vmatpush1.bf16.msra.mxu0 %v6219_v29  ;;  %v6306_v29 = vld [vmem:[#allocation5 + $0x730] ss:$24 sps:$4 sm:$0xff]  }
 0x13a   :  { %2190 = vmatpush1.bf16.msra.mxu1 %v6222_v30  ;;  %2150 = vmatprep.subr.bf16.mxu0 %v6227_v31 }
 0x13b   :  { %2191 = vmatprep.subr.bf16.mxu1 %v6230_v32  ;;  %v6311_v32 = vld [vmem:[#allocation5 + $0x704] ss:$24 sps:$4 sm:$0xff]  }
 0x13d   :  { %2151 = vmatpush1.bf16.msra.mxu0 %v6225_v33  ;;  %v6330_v33 = vld [vmem:[#allocation8 + $0xc0] ss:$16 sps:$4 sm:$0xff]  }
 0x13e   :  { %2192 = vmatpush1.bf16.msra.mxu1 %v6228_v35  ;;  %2152 = vmatprep.subr.bf16.mxu0 %v6233_v36  ;;  %v6338_v36 = vld [vmem:[#allocation8 + $0xa4] ss:$16 sps:$4 sm:$0xff]  }
 0x13f   :  { %2193 = vmatprep.subr.bf16.mxu1 %v6236_v37 }
 0x141   :  { %2153 = vmatpush1.bf16.msra.mxu0 %v6231_v38 }
 0x142   :  { %2194 = vmatpush1.bf16.msra.mxu1 %v6234_v47  ;;  %2154 = vmatprep.subr.bf16.mxu0 %v6239_v51  ;;  %v6309_v47 = vld [vmem:[#allocation5 + $0x700] ss:$24 sps:$4 sm:$0xff]  }
 0x143   :  { %2195 = vmatprep.subr.bf16.mxu1 %v6242_v39  ;;  %v6336_v39 = vld [vmem:[#allocation8 + $0xa0] ss:$16 sps:$4 sm:$0xff]  }
 0x145   :  { %2155 = vmatpush1.bf16.msra.mxu0 %v6237_v40  ;;  %v6344_v40 = vld [vmem:[#allocation8 + $0x84] ss:$16 sps:$4 sm:$0xff]  }
 0x146   :  { %2196 = vmatpush1.bf16.msra.mxu1 %v6240_v41  ;;  %2156 = vmatprep.subr.bf16.mxu0 %v6245_v42 }
 0x147   :  { %2197 = vmatprep.subr.bf16.mxu1 %v6248_v43  ;;  %v6312_v43 = vld [vmem:[#allocation5 + $0x6d0] ss:$24 sps:$4 sm:$0xff]  }
 0x149   :  { %2157 = vmatpush1.bf16.msra.mxu0 %v6243_v44  ;;  %v6317_v44 = vld [vmem:[#allocation5 + $0x6a4] ss:$24 sps:$4 sm:$0xff]  }
 0x14a   :  { %2198 = vmatpush1.bf16.msra.mxu1 %v6246_v45  ;;  %2158 = vmatprep.subr.bf16.mxu0 %v6251_v46  ;;  %v6342_v45 = vld [vmem:[#allocation8 + $0x80] ss:$16 sps:$4 sm:$0xff]   ;;  %v6350_v46 = vld [vmem:[#allocation8 + $0x64] ss:$16 sps:$4 sm:$0xff]  }
 0x14b   :  { %2199 = vmatprep.subr.bf16.mxu1 %v6254_v48  ;;  %v6320_v48 = vld [vmem:[#allocation5 + $0x674] ss:$24 sps:$4 sm:$0xff]  }
 0x14d   :  { %2159 = vmatpush1.bf16.msra.mxu0 %v6249_v49  ;;  %v6348_v49 = vld [vmem:[#allocation8 + $0x60] ss:$16 sps:$4 sm:$0xff]  }
 0x14e   :  { %2200 = vmatpush1.bf16.msra.mxu1 %v6252_v50  ;;  %2160 = vmatprep.subr.bf16.mxu0 %v6257_v52  ;;  %v6356_v50 = vld [vmem:[#allocation8 + $0x44] ss:$16 sps:$4 sm:$0xff]  }
 0x14f   :  { %2201 = vmatprep.subr.bf16.mxu1 %v6260_v53  ;;  %v6318_v52 = vld [vmem:[#allocation5 + $0x670] ss:$24 sps:$4 sm:$0xff]  }
 0x150   :  { %v6354_v53 = vld [vmem:[#allocation8 + $0x40] ss:$16 sps:$4 sm:$0xff]  }
 0x151   :  { %2161 = vmatpush2.bf16.msra.mxu0 %v6255_v54  ;;  %v6323_v54 = vld [vmem:[#allocation5 + $0x644] ss:$24 sps:$4 sm:$0xff]  }
 0x152   :  { %2202 = vmatpush2.bf16.msra.mxu1 %v6258_v55  ;;  %2162 = vmatprep.subr.bf16.mxu0 %v6263_v56  ;;  %v6362_v55 = vld [vmem:[#allocation8 + $0x24] ss:$16 sps:$4 sm:$0xff]  }
 0x153   :  { %2203 = vmatprep.subr.bf16.mxu1 %v6266_v57  ;;  %v6321_v56 = vld [vmem:[#allocation5 + $0x640] ss:$24 sps:$4 sm:$0xff]  }
 0x154   :  { %v6360_v57 = vld [vmem:[#allocation8 + $0x20] ss:$16 sps:$4 sm:$0xff]  }
 0x155   :  { %2163 = vmatpush2.bf16.msra.mxu0 %v6261_v58  ;;  %v6329_v58 = vld [vmem:[#allocation5 + $0x614] ss:$24 sps:$4 sm:$0xff]  }
 0x156   :  { %2204 = vmatpush2.bf16.msra.mxu1 %v6264_v59  ;;  %2164 = vmatprep.subr.bf16.mxu0 %v6269_v60  ;;  %v6368_v59 = vld [vmem:[#allocation8 + $0x4] ss:$16 sps:$4 sm:$0xff]  }
 0x157   :  { %2205 = vmatprep.subr.bf16.mxu1 %v6272_v61  ;;  %v6327_v60 = vld [vmem:[#allocation5 + $0x610] ss:$24 sps:$4 sm:$0xff]   ;;  %v6335_v61 = vld [vmem:[#allocation5 + $0x8e4] ss:$24 sps:$4 sm:$0xff]  }
 0x159   :  { %2165 = vmatpush2.bf16.msra.mxu0 %v6267_v62  ;;  %v6366_v62 = vld [vmem:[#allocation8] ss:$16 sps:$4 sm:$0xff]  }
 0x15a   :  { %2206 = vmatpush2.bf16.msra.mxu1 %v6270_v63  ;;  %2166 = vmatprep.subr.bf16.mxu0 %v6275_v0  ;;  %v6374_v63 = vld [vmem:[#allocation8 + $0x1e4] ss:$16 sps:$4 sm:$0xff]  }
 0x15b   :  { %2207 = vmatprep.subr.bf16.mxu1 %v6278_v1  ;;  %v6333_v0 = vld [vmem:[#allocation5 + $0x8e0] ss:$24 sps:$4 sm:$0xff]   ;;  %v6341_v1 = vld [vmem:[#allocation5 + $0x8b4] ss:$24 sps:$4 sm:$0xff]  }
 0x15d   :  { %2167 = vmatpush2.bf16.msra.mxu0 %v6273_v2  ;;  %v6372_v2 = vld [vmem:[#allocation8 + $0x1e0] ss:$16 sps:$4 sm:$0xff]  }
 0x15e   :  { %2208 = vmatpush2.bf16.msra.mxu1 %v6276_v3  ;;  %2168 = vmatprep.subr.bf16.mxu0 %v6281_v4  ;;  %v6380_v3 = vld [vmem:[#allocation8 + $0x1c4] ss:$16 sps:$4 sm:$0xff]  }
 0x15f   :  { %2209 = vmatprep.subr.bf16.mxu1 %v6284_v5  ;;  %v6339_v4 = vld [vmem:[#allocation5 + $0x8b0] ss:$24 sps:$4 sm:$0xff]   ;;  %v6347_v5 = vld [vmem:[#allocation5 + $0x884] ss:$24 sps:$4 sm:$0xff]  }
 0x161   :  { %2169 = vmatpush2.bf16.msra.mxu0 %v6279_v8  ;;  %v6378_v8 = vld [vmem:[#allocation8 + $0x1c0] ss:$16 sps:$4 sm:$0xff]  }
 0x162   :  { %2210 = vmatpush2.bf16.msra.mxu1 %v6282_v9  ;;  %2170 = vmatprep.subr.bf16.mxu0 %v6287_v10  ;;  %v6383_v9 = vld [vmem:[#allocation8 + $0x1a4] ss:$16 sps:$4 sm:$0xff]  }
 0x163   :  { %2211 = vmatprep.subr.bf16.mxu1 %v6290_v11  ;;  %v6345_v10 = vld [vmem:[#allocation5 + $0x880] ss:$24 sps:$4 sm:$0xff]   ;;  %v6353_v11 = vld [vmem:[#allocation5 + $0x854] ss:$24 sps:$4 sm:$0xff]  }
 0x165   :  { %2171 = vmatpush2.bf16.msra.mxu0 %v6285_v12  ;;  %v6381_v12 = vld [vmem:[#allocation8 + $0x1a0] ss:$16 sps:$4 sm:$0xff]  }
 0x166   :  { %2212 = vmatpush2.bf16.msra.mxu1 %v6288_v13  ;;  %2172 = vmatprep.subr.bf16.mxu0 %v6293_v15  ;;  %v6386_v13 = vld [vmem:[#allocation8 + $0x184] ss:$16 sps:$4 sm:$0xff]  }
 0x167   :  { %2213 = vmatprep.subr.bf16.mxu1 %v6296_v16  ;;  %v6351_v15 = vld [vmem:[#allocation5 + $0x850] ss:$24 sps:$4 sm:$0xff]   ;;  %v7103_v16 = vmov 1966171168  }
 0x169   :  { %2173 = vmatpush2.bf16.msra.mxu0 %v6291_v17  ;;  %v2277_v17 = vunpack.c.l.s4 %v7103_v16  ;;  %v6497_v16 = vld [vmem:[#allocation8 + $0x4e4] ss:$16 sps:$4 sm:$0xff]  }
 0x16a   :  { %2214 = vmatpush2.bf16.msra.mxu1 %v6294_v18  ;;  %2174 = vmatprep.subr.bf16.mxu0 %v6299_v19  ;;  %v2279_v18 = vlaneseq  ;;  %v6359_v19 = vld [vmem:[#allocation5 + $0x824] ss:$24 sps:$4 sm:$0xff]  }
 0x16b   :  { %2215 = vmatprep.subr.bf16.mxu1 %v6302_v20  ;;  %v6384_v20 = vld [vmem:[#allocation8 + $0x180] ss:$16 sps:$4 sm:$0xff]  }
 0x16d   :  { %2175 = vmatpush2.bf16.msra.mxu0 %v6297_v21  ;;  %v6389_v21 = vld [vmem:[#allocation8 + $0x164] ss:$16 sps:$4 sm:$0xff]  }
 0x16e   :  { %2216 = vmatpush2.bf16.msra.mxu1 %v6300_v22  ;;  %2226 = vmatprep.subr.bf16.mxu0 %v6305_v23  ;;  %v6357_v22 = vld [vmem:[#allocation5 + $0x820] ss:$24 sps:$4 sm:$0xff]   ;;  %v2278_v23 = vunpack.c.0.s8 %v2277_v17 }
 0x16f   :  { %3528 = vmatprep.subr.bf16.mxu1 %v6326_v24  ;;  %v2280_v24 = vshrl.u32 %v2279_v18, 7  ;;  %v6495_v18 = vld [vmem:[#allocation8 + $0x4e0] ss:$16 sps:$4 sm:$0xff]  }
 0x170   :  { %v1932_v30 = vpop.f32.mrf.mxu0  ;;  %2177 = vmatmul.mubr.bf16.vlgmr.msra.gmra.mxu0 %v7189_v6  ;;  %v6314_v6 = vld [vmem:[#allocation5 + $0x6d4] ss:$24 sps:$4 sm:$0xff]  }
 0x171   :  { %v1973_v31 = vpop.f32.mrf.mxu1  ;;  %2218 = vmatmul.mubr.bf16.vlgmr.msra.gmra.mxu1 %v7191_v7  ;;  %2227 = vmatpush1.bf16.msra.mxu0 %v6303_v25  ;;  %v6365_v25 = vld [vmem:[#allocation5 + $0x7f4] ss:$24 sps:$4 sm:$0xff]  }
 0x172   :  { %v7217_v35 = vadd.f32 %v1973_v31, %v1932_v30  ;;  %3529 = vmatpush1.bf16.msra.mxu1 %v6324_v26  ;;  %v7219_v37 = vpop.f32.mrf.mxu0  ;;  %2228 = vmatprep.subr.bf16.mxu0 %v6308_v27  ;;  %v6387_v26 = vld [vmem:[#allocation8 + $0x160] ss:$16 sps:$4 sm:$0xff]   ;;  %v6392_v27 = vld [vmem:[#allocation8 + $0x144] ss:$16 sps:$4 sm:$0xff]   ;;  %v7226_v30 = vsub.s32 %v2278_v23, %v2280_v24 }
 0x173   :  { %v7221_v38 = vpop.f32.mrf.mxu1  ;;  %3530 = vmatprep.subr.bf16.mxu1 %v6332_v28  ;;  %2258 = vmatprep.mubr.bf16.mxu0 %v7200_v34  ;;  %v6315_v34 = vld [vmem:[#allocation5 + $0x6a0] ss:$24 sps:$4 sm:$0xff]   ;;  %v6371_v31 = vld [vmem:[#allocation5 + $0x7c4] ss:$24 sps:$4 sm:$0xff]  }
 0x174   :  { %v1936_v51 = vpop.f32.mrf.mxu0  ;;  %v7224_v28 = vld [vmem:[#allocation7] sm:$0x3f]  ;;  %v6428_v23 = vld [vmem:[#allocation8 + $0x3c4] ss:$16 sps:$4 sm:$0xff]  }
 0x175   :  { %v1977_v7 = vpop.f32.mrf.mxu1  ;;  %2229 = vmatpush1.bf16.msra.mxu0 %v6306_v29  ;;  %v6363_v29 = vld [vmem:[#allocation5 + $0x7f0] ss:$24 sps:$4 sm:$0xff]   ;;  %v6377_v51 = vld [vmem:[#allocation5 + $0x794] ss:$24 sps:$4 sm:$0xff]  }
 0x176   :  { %3531 = vmatpush1.bf16.msra.mxu1 %v6330_v33  ;;  %v1937_v41 = vpop.f32.mrf.mxu0  ;;  %2230 = vmatprep.subr.bf16.mxu0 %v6311_v32  ;;  %v6390_v32 = vld [vmem:[#allocation8 + $0x140] ss:$16 sps:$4 sm:$0xff]   ;;  %v6395_v33 = vld [vmem:[#allocation8 + $0x124] ss:$16 sps:$4 sm:$0xff]  }
 0x177   :  { %3532 = vmatprep.subr.bf16.mxu1 %v6338_v36  ;;  %v1978_v42 = vpop.f32.mrf.mxu1  ;;  %v6369_v36 = vld [vmem:[#allocation5 + $0x7c0] ss:$24 sps:$4 sm:$0xff]   ;;  %v6375_v7 = vld [vmem:[#allocation5 + $0x790] ss:$24 sps:$4 sm:$0xff]  }
 0x178   :  { %v6396_v41 = vld [vmem:[#allocation8 + $0x100] ss:$16 sps:$4 sm:$0xff]   ;;  %v6401_v42 = vld [vmem:[#allocation8 + $0x2e4] ss:$16 sps:$4 sm:$0xff]  }
 0x179   :  { %2231 = vmatpush1.bf16.msra.mxu0 %v6309_v47  ;;  %v2282_v47 = vrot.slane %v7224_v28, %v7226_v30 }
 0x17a   :  { %3533 = vmatpush1.bf16.msra.mxu1 %v6336_v39  ;;  %2232 = vmatprep.subr.bf16.mxu0 %v6314_v6  ;;  %v6393_v6 = vld [vmem:[#allocation8 + $0x120] ss:$16 sps:$4 sm:$0xff]   ;;  %v6398_v39 = vld [vmem:[#allocation8 + $0x104] ss:$16 sps:$4 sm:$0xff]  }
 0x17b   :  { %3534 = vmatprep.subr.bf16.mxu1 %v6344_v40  ;;  %v2290_v40 = vcombine.high %v2282_v47, %v2282_v47 }
 0x17d   :  { %2233 = vmatpush1.bf16.msra.mxu0 %v6312_v43  ;;  %v7231_v43 = vrot.slane %v2282_v47, %v7226_v30  ;;  %v6521_v47 = vld [vmem:[#allocation8 + $0x464] ss:$16 sps:$4 sm:$0xff]  }
 0x17e   :  { %3535 = vmatpush1.bf16.msra.mxu1 %v6342_v45  ;;  %2234 = vmatprep.subr.bf16.mxu0 %v6317_v44  ;;  %v7234_v44 = vrot.slane %v2290_v40, %v7226_v30  ;;  %v6399_v45 = vld [vmem:[#allocation8 + $0x2e0] ss:$16 sps:$4 sm:$0xff]  }
 0x17f   :  { %3536 = vmatprep.subr.bf16.mxu1 %v6350_v46  ;;  %v6404_v46 = vld [vmem:[#allocation8 + $0x2c4] ss:$16 sps:$4 sm:$0xff]   ;;  %v6525_v40 = vld [vmem:[#allocation8 + $0x440] ss:$16 sps:$4 sm:$0xff]  }
 0x181   :  { %2235 = vmatpush1.bf16.msra.mxu0 %v6315_v34  ;;  %v2323_v34 = vpack.i.b16 %v7231_v43, %v7231_v43 }
 0x182   :  { %3537 = vmatpush1.bf16.msra.mxu1 %v6348_v49  ;;  %2236 = vmatprep.subr.bf16.mxu0 %v6320_v48  ;;  %v7238_v48 = vsub.s32 0, %v2280_v24  ;;  %v2330_v49 = vpack.i.b16 %v7234_v44, %v7234_v44  ;;  %v6501_v24 = vld [vmem:[#allocation8 + $0x4c0] ss:$16 sps:$4 sm:$0xff]  }
 0x183   :  { %3538 = vmatprep.subr.bf16.mxu1 %v6356_v50 }
 0x185   :  { %2237 = vmatpush1.bf16.msra.mxu0 %v6318_v52 }
 0x186   :  { %3539 = vmatpush1.bf16.msra.mxu1 %v6354_v53  ;;  %2238 = vmatprep.subr.bf16.mxu0 %v6323_v54  ;;  %v1976_v53 = vadd.f32 %v7221_v38, %v7219_v37  ;;  %v6405_v37 = vld [vmem:[#allocation8 + $0x2a0] ss:$16 sps:$4 sm:$0xff]  }
 0x187   :  { %3540 = vmatprep.subr.bf16.mxu1 %v6362_v55  ;;  %v6402_v55 = vld [vmem:[#allocation8 + $0x2c0] ss:$16 sps:$4 sm:$0xff]  }
 0x189   :  { %2239 = vmatpush1.bf16.msra.mxu0 %v6321_v56  ;;  %v2328_v56 = vrot.slane %v2323_v34, %v7238_v48  ;;  %v6438_v34 = vld [vmem:[#allocation8 + $0x340] ss:$16 sps:$4 sm:$0xff]  }
 0x18a   :  { %3541 = vmatpush1.bf16.msra.mxu1 %v6360_v57  ;;  %2240 = vmatprep.subr.bf16.mxu0 %v6329_v58  ;;  %v6407_v58 = vld [vmem:[#allocation8 + $0x2a4] ss:$16 sps:$4 sm:$0xff]  }
 0x18b   :  { %3542 = vmatprep.subr.bf16.mxu1 %v6368_v59 }
 0x18d   :  { %2241 = vmatpush1.bf16.msra.mxu0 %v6327_v60 }
 0x18e   :  { %3543 = vmatpush1.bf16.msra.mxu1 %v6366_v62  ;;  %2242 = vmatprep.subr.bf16.mxu0 %v6335_v61 }
 0x18f   :  { %3544 = vmatprep.subr.bf16.mxu1 %v6374_v63 }
 0x191   :  { %2243 = vmatpush2.bf16.msra.mxu0 %v6333_v0 }
 0x192   :  { %3545 = vmatpush2.bf16.msra.mxu1 %v6372_v2  ;;  %2244 = vmatprep.subr.bf16.mxu0 %v6341_v1  ;;  %v6410_v1 = vld [vmem:[#allocation8 + $0x284] ss:$16 sps:$4 sm:$0xff]  }
 0x193   :  { %3546 = vmatprep.subr.bf16.mxu1 %v6380_v3 }
 0x195   :  { %2245 = vmatpush2.bf16.msra.mxu0 %v6339_v4  ;;  %v6408_v4 = vld [vmem:[#allocation8 + $0x280] ss:$16 sps:$4 sm:$0xff]  }
 0x196   :  { %3547 = vmatpush2.bf16.msra.mxu1 %v6378_v8  ;;  %2246 = vmatprep.subr.bf16.mxu0 %v6347_v5  ;;  %v6413_v5 = vld [vmem:[#allocation8 + $0x264] ss:$16 sps:$4 sm:$0xff]   ;;  %v6411_v8 = vld [vmem:[#allocation8 + $0x260] ss:$16 sps:$4 sm:$0xff]  }
 0x197   :  { %3548 = vmatprep.subr.bf16.mxu1 %v6383_v9  ;;  %v6416_v9 = vld [vmem:[#allocation8 + $0x244] ss:$16 sps:$4 sm:$0xff]  }
 0x199   :  { %2247 = vmatpush2.bf16.msra.mxu0 %v6345_v10  ;;  %v6414_v10 = vld [vmem:[#allocation8 + $0x240] ss:$16 sps:$4 sm:$0xff]  }
 0x19a   :  { %3549 = vmatpush2.bf16.msra.mxu1 %v6381_v12  ;;  %2248 = vmatprep.subr.bf16.mxu0 %v6353_v11  ;;  %v6419_v11 = vld [vmem:[#allocation8 + $0x224] ss:$16 sps:$4 sm:$0xff]   ;;  %v6417_v12 = vld [vmem:[#allocation8 + $0x220] ss:$16 sps:$4 sm:$0xff]  }
 0x19b   :  { %3550 = vmatprep.subr.bf16.mxu1 %v6386_v13  ;;  %v6422_v13 = vld [vmem:[#allocation8 + $0x204] ss:$16 sps:$4 sm:$0xff]  }
 0x19d   :  { %2249 = vmatpush2.bf16.msra.mxu0 %v6351_v15 }
 0x19e   :  { %3551 = vmatpush2.bf16.msra.mxu1 %v6384_v20  ;;  %2250 = vmatprep.subr.bf16.mxu0 %v6359_v19  ;;  %v6420_v19 = vld [vmem:[#allocation8 + $0x200] ss:$16 sps:$4 sm:$0xff]   ;;  %v6425_v20 = vld [vmem:[#allocation8 + $0x3e4] ss:$16 sps:$4 sm:$0xff]  }
 0x19f   :  { %3552 = vmatprep.subr.bf16.mxu1 %v6389_v21  ;;  %v6503_v21 = vld [vmem:[#allocation8 + $0x4c4] ss:$16 sps:$4 sm:$0xff]  }
 0x1a1   :  { %2251 = vmatpush2.bf16.msra.mxu0 %v6357_v22  ;;  %v6423_v22 = vld [vmem:[#allocation8 + $0x3e0] ss:$16 sps:$4 sm:$0xff]  }
 0x1a2   :  { %3553 = vmatpush2.bf16.msra.mxu1 %v6387_v26  ;;  %2252 = vmatprep.subr.bf16.mxu0 %v6365_v25  ;;  %v6509_v25 = vld [vmem:[#allocation8 + $0x4a4] ss:$16 sps:$4 sm:$0xff]   ;;  %v6426_v26 = vld [vmem:[#allocation8 + $0x3c0] ss:$16 sps:$4 sm:$0xff]  }
 0x1a3   :  { %3554 = vmatprep.subr.bf16.mxu1 %v6392_v27  ;;  %v6507_v27 = vld [vmem:[#allocation8 + $0x4a0] ss:$16 sps:$4 sm:$0xff]  }
 0x1a5   :  { %2253 = vmatpush2.bf16.msra.mxu0 %v6363_v29  ;;  %v6431_v29 = vld [vmem:[#allocation8 + $0x3a4] ss:$16 sps:$4 sm:$0xff]  }
 0x1a6   :  { %3555 = vmatpush2.bf16.msra.mxu1 %v6390_v32  ;;  %2254 = vmatprep.subr.bf16.mxu0 %v6371_v31  ;;  %v6515_v31 = vld [vmem:[#allocation8 + $0x484] ss:$16 sps:$4 sm:$0xff]   ;;  %v6513_v32 = vld [vmem:[#allocation8 + $0x480] ss:$16 sps:$4 sm:$0xff]  }
 0x1a7   :  { %3556 = vmatprep.subr.bf16.mxu1 %v6395_v33  ;;  %v6429_v33 = vld [vmem:[#allocation8 + $0x3a0] ss:$16 sps:$4 sm:$0xff]  }
 0x1a9   :  { %2255 = vmatpush2.bf16.msra.mxu0 %v6369_v36  ;;  %v6434_v36 = vld [vmem:[#allocation8 + $0x384] ss:$16 sps:$4 sm:$0xff]  }
 0x1aa   :  { %3557 = vmatpush2.bf16.msra.mxu1 %v6393_v6  ;;  %2256 = vmatprep.subr.bf16.mxu0 %v6377_v51  ;;  %v6519_v51 = vld [vmem:[#allocation8 + $0x460] ss:$16 sps:$4 sm:$0xff]  }
 0x1ab   :  { %3558 = vmatprep.subr.bf16.mxu1 %v6398_v39  ;;  %v6432_v6 = vld [vmem:[#allocation8 + $0x380] ss:$16 sps:$4 sm:$0xff]   ;;  %v6437_v39 = vld [vmem:[#allocation8 + $0x364] ss:$16 sps:$4 sm:$0xff]  }
 0x1ad   :  { %2257 = vmatpush2.bf16.msra.mxu0 %v6375_v7  ;;  %v6527_v7 = vld [vmem:[#allocation8 + $0x444] ss:$16 sps:$4 sm:$0xff]  }
 0x1ae   :  { %3559 = vmatpush2.bf16.msra.mxu1 %v6396_v41  ;;  %3569 = vmatprep.subr.bf16.mxu0 %v6401_v42  ;;  %v6435_v41 = vld [vmem:[#allocation8 + $0x360] ss:$16 sps:$4 sm:$0xff]   ;;  %v6440_v42 = vld [vmem:[#allocation8 + $0x344] ss:$16 sps:$4 sm:$0xff]  }
 0x1af   :  { %3610 = vmatprep.subr.bf16.mxu1 %v6497_v16 }
 0x1b0   :  { %v2014_v50 = vpop.f32.mrf.mxu0  ;;  %2259 = vmatmul.mubr.bf16.vlgmr.msra.gmra.mxu0 %v7205_v14  ;;  %v2335_v14 = vrot.slane %v2330_v49, %v7238_v48  ;;  %v6443_v49 = vld [vmem:[#allocation8 + $0x324] ss:$16 sps:$4 sm:$0xff]  }
 0x1b1   :  { %v7243_v52 = vpop.f32.mrf.mxu1  ;;  %v2015_v54 = vadd.f32 %v2014_v50, %v7217_v35  ;;  %3570 = vmatpush1.bf16.msra.mxu0 %v6399_v45  ;;  %v6533_v45 = vld [vmem:[#allocation8 + $0x424] ss:$16 sps:$4 sm:$0xff]  }
 0x1b2   :  { %v2016_v57 = vpop.f32.mrf.mxu0  ;;  %3571 = vmatprep.subr.bf16.mxu0 %v6404_v46  ;;  %v6531_v46 = vld [vmem:[#allocation8 + $0x420] ss:$16 sps:$4 sm:$0xff]   ;;  %v6539_v50 = vld [vmem:[#allocation8 + $0x404] ss:$16 sps:$4 sm:$0xff]  }
 0x1b3   :  { %v7249_v59 = vpop.f32.mrf.mxu1  ;;  %v2267_v60 = vpack.c.bf16 %v2015_v54, %v2015_v54  ;;  %v2017_v61 = vadd.f32 %v2016_v57, %v1976_v53  ;;  %v6537_v53 = vld [vmem:[#allocation8 + $0x400] ss:$16 sps:$4 sm:$0xff]  }
 0x1b4   :  { %v2018_v62 = vpop.f32.mrf.mxu0  ;;  %v6441_v54 = vld [vmem:[#allocation8 + $0x320] ss:$16 sps:$4 sm:$0xff]  }
 0x1b5   :  { %v2059_v63 = vpop.f32.mrf.mxu1  ;;  %v2268_v0 = vpack.c.bf16 %v2017_v61, %v2017_v61  ;;  %3572 = vmatpush1.bf16.msra.mxu0 %v6402_v55  ;;  %v2364_v38 = vadd.bf16 %v2328_v56, %v2267_v60  ;;  %v6446_v55 = vld [vmem:[#allocation8 + $0x304] ss:$16 sps:$4 sm:$0xff]   ;;  %v6543_v57 = vld [vmem:[#allocation8 + $0x5e0] ss:$16 sps:$4 sm:$0xff]   ;;  %v6449_v60 = vld [vmem:[#allocation8 + $0xec] ss:$16 sps:$4 sm:$0xff]   ;;  %v2320_v61 = vcombine.high %v7231_v43, %v7231_v43 }
 0x1b6   :  { %v2019_v35 = vpop.f32.mrf.mxu0  ;;  %3573 = vmatprep.subr.bf16.mxu0 %v6407_v58  ;;  %v6545_v56 = vld [vmem:[#allocation8 + $0x5e4] ss:$16 sps:$4 sm:$0xff]   ;;  %v6444_v58 = vld [vmem:[#allocation8 + $0x300] ss:$16 sps:$4 sm:$0xff]   ;;  %v2321_v63 = vcombine.high %v7234_v44, %v7234_v44 }
 0x1b7   :  { %v2060_v2 = vpop.f32.mrf.mxu1  ;;  %v2365_v3 = vadd.bf16 %v2335_v14, %v2268_v0  ;;  %v6551_v14 = vld [vmem:[#allocation8 + $0x5c4] ss:$16 sps:$4 sm:$0xff]   ;;  %v6549_v62 = vld [vmem:[#allocation8 + $0x5c0] ss:$16 sps:$4 sm:$0xff]   ;;  %v2337_v0 = vpack.i.b16 %v2320_v61, %v2320_v61 }
 0x1b9   :  { %6864 = vtanh.bf16 %v2365_v3  ;;  %3574 = vmatpush1.bf16.msra.mxu0 %v6405_v37  ;;  %v6558_v37 = vld [vmem:[#allocation8 + $0x5a4] ss:$16 sps:$4 sm:$0xff]   ;;  %v2344_v3 = vpack.i.b16 %v2321_v63, %v2321_v63  ;;  %v2342_v44 = vrot.slane %v2337_v0, %v7238_v48  ;;  %v6482_v63 = vld [vmem:[#allocation8 + $0x18c] ss:$16 sps:$4 sm:$0xff]  }
 0x1ba   :  { %6866 = vtanh.bf16 %v2364_v38  ;;  %3575 = vmatprep.subr.bf16.mxu0 %v6410_v1  ;;  %v6556_v1 = vld [vmem:[#allocation8 + $0x5a0] ss:$16 sps:$4 sm:$0xff]  }
 0x1bd   :  { %3576 = vmatpush1.bf16.msra.mxu0 %v6408_v4 }
 0x1be   :  { %3577 = vmatprep.subr.bf16.mxu0 %v6413_v5 }
 0x1c1   :  { %3578 = vmatpush1.bf16.msra.mxu0 %v6411_v8 }
 0x1c2   :  { %3579 = vmatprep.subr.bf16.mxu0 %v6416_v9  ;;  %v6564_v9 = vld [vmem:[#allocation8 + $0x584] ss:$16 sps:$4 sm:$0xff]  }
 0x1c5   :  { %3580 = vmatpush1.bf16.msra.mxu0 %v6414_v10 }
 0x1c6   :  { %3581 = vmatprep.subr.bf16.mxu0 %v6419_v11 }
 0x1c7   :  { %v7252_v15 = vpop.eup %6864 }
 0x1c8   :  { %v7254_v17 = vpop.eup %6866  ;;  %3560 = vmatprep.mubr.bf16.mxu1 %v7252_v15 }
 0x1c9   :  { %3561 = vmatmul.mubr.bf16.vlgmr.msra.gmra.mxu1 %v7254_v17  ;;  %3582 = vmatpush1.bf16.msra.mxu0 %v6417_v12  ;;  %v6562_v12 = vld [vmem:[#allocation8 + $0x580] ss:$16 sps:$4 sm:$0xff]  }
 0x1ca   :  { %3583 = vmatprep.subr.bf16.mxu0 %v6422_v13  ;;  %3611 = vmatpush1.bf16.msra.mxu1 %v6495_v18  ;;  %v2349_v18 = vrot.slane %v2344_v3, %v7238_v48 }
 0x1cb   :  { %3612 = vmatprep.subr.bf16.mxu1 %v6503_v21 }
 0x1cd   :  { %3584 = vmatpush1.bf16.msra.mxu0 %v6420_v19 }
 0x1ce   :  { %3585 = vmatprep.subr.bf16.mxu0 %v6425_v20  ;;  %3613 = vmatpush1.bf16.msra.mxu1 %v6501_v24  ;;  %v6576_v24 = vld [vmem:[#allocation8 + $0x544] ss:$16 sps:$4 sm:$0xff]  }
 0x1cf   :  { %3614 = vmatprep.subr.bf16.mxu1 %v6509_v25  ;;  %v6574_v25 = vld [vmem:[#allocation8 + $0x540] ss:$16 sps:$4 sm:$0xff]  }
 0x1d1   :  { %3586 = vmatpush2.bf16.msra.mxu0 %v6423_v22  ;;  %v6570_v22 = vld [vmem:[#allocation8 + $0x564] ss:$16 sps:$4 sm:$0xff]  }
 0x1d2   :  { %3587 = vmatprep.subr.bf16.mxu0 %v6428_v23  ;;  %3615 = vmatpush1.bf16.msra.mxu1 %v6507_v27  ;;  %v6580_v27 = vld [vmem:[#allocation8 + $0x520] ss:$16 sps:$4 sm:$0xff]  }
 0x1d3   :  { %3616 = vmatprep.subr.bf16.mxu1 %v6515_v31  ;;  %v6586_v31 = vld [vmem:[#allocation8 + $0x500] ss:$16 sps:$4 sm:$0xff]  }
 0x1d5   :  { %3588 = vmatpush2.bf16.msra.mxu0 %v6426_v26  ;;  %v6582_v26 = vld [vmem:[#allocation8 + $0x524] ss:$16 sps:$4 sm:$0xff]  }
 0x1d6   :  { %3589 = vmatprep.subr.bf16.mxu0 %v6431_v29  ;;  %3617 = vmatpush1.bf16.msra.mxu1 %v6513_v32  ;;  %v6588_v29 = vld [vmem:[#allocation8 + $0x504] ss:$16 sps:$4 sm:$0xff]   ;;  %v6594_v32 = vld [vmem:[#allocation8 + $0x2ec] ss:$16 sps:$4 sm:$0xff]  }
 0x1d7   :  { %3618 = vmatprep.subr.bf16.mxu1 %v6521_v47  ;;  %v6452_v47 = vld [vmem:[#allocation8 + $0xcc] ss:$16 sps:$4 sm:$0xff]  }
 0x1d9   :  { %3590 = vmatpush2.bf16.msra.mxu0 %v6429_v33  ;;  %v6447_v33 = vld [vmem:[#allocation8 + $0xe8] ss:$16 sps:$4 sm:$0xff]  }
 0x1da   :  { %3591 = vmatprep.subr.bf16.mxu0 %v6434_v36  ;;  %3619 = vmatpush1.bf16.msra.mxu1 %v6519_v51 }
 0x1db   :  { %3620 = vmatprep.subr.bf16.mxu1 %v6527_v7  ;;  %v6453_v7 = vld [vmem:[#allocation8 + $0xa8] ss:$16 sps:$4 sm:$0xff]  }
 0x1dd   :  { %3592 = vmatpush2.bf16.msra.mxu0 %v6432_v6  ;;  %v6450_v6 = vld [vmem:[#allocation8 + $0xc8] ss:$16 sps:$4 sm:$0xff]  }
 0x1de   :  { %3593 = vmatprep.subr.bf16.mxu0 %v6437_v39  ;;  %3621 = vmatpush1.bf16.msra.mxu1 %v6525_v40  ;;  %v6455_v39 = vld [vmem:[#allocation8 + $0xac] ss:$16 sps:$4 sm:$0xff]  }
 0x1df   :  { %3622 = vmatprep.subr.bf16.mxu1 %v6533_v45  ;;  %v6458_v40 = vld [vmem:[#allocation8 + $0x8c] ss:$16 sps:$4 sm:$0xff]   ;;  %v6459_v45 = vld [vmem:[#allocation8 + $0x68] ss:$16 sps:$4 sm:$0xff]  }
 0x1e1   :  { %3594 = vmatpush2.bf16.msra.mxu0 %v6435_v41  ;;  %v6456_v41 = vld [vmem:[#allocation8 + $0x88] ss:$16 sps:$4 sm:$0xff]  }
 0x1e2   :  { %3595 = vmatprep.subr.bf16.mxu0 %v6440_v42  ;;  %3623 = vmatpush1.bf16.msra.mxu1 %v6531_v46  ;;  %v6461_v42 = vld [vmem:[#allocation8 + $0x6c] ss:$16 sps:$4 sm:$0xff]  }
 0x1e3   :  { %3624 = vmatprep.subr.bf16.mxu1 %v6539_v50  ;;  %v6464_v46 = vld [vmem:[#allocation8 + $0x4c] ss:$16 sps:$4 sm:$0xff]  }
 0x1e4   :  { %v6470_v50 = vld [vmem:[#allocation8 + $0xc] ss:$16 sps:$4 sm:$0xff]  }
 0x1e5   :  { %3596 = vmatpush2.bf16.msra.mxu0 %v6438_v34  ;;  %v6462_v34 = vld [vmem:[#allocation8 + $0x48] ss:$16 sps:$4 sm:$0xff]  }
 0x1e6   :  { %3597 = vmatprep.subr.bf16.mxu0 %v6443_v49  ;;  %3625 = vmatpush1.bf16.msra.mxu1 %v6537_v53  ;;  %v6467_v49 = vld [vmem:[#allocation8 + $0x2c] ss:$16 sps:$4 sm:$0xff]   ;;  %v6468_v53 = vld [vmem:[#allocation8 + $0x8] ss:$16 sps:$4 sm:$0xff]  }
 0x1e7   :  { %3626 = vmatprep.subr.bf16.mxu1 %v6545_v56  ;;  %v6476_v56 = vld [vmem:[#allocation8 + $0x1cc] ss:$16 sps:$4 sm:$0xff]  }
 0x1e9   :  { %3598 = vmatpush2.bf16.msra.mxu0 %v6441_v54  ;;  %v6473_v54 = vld [vmem:[#allocation8 + $0x1ec] ss:$16 sps:$4 sm:$0xff]  }
 0x1ea   :  { %3599 = vmatprep.subr.bf16.mxu0 %v6446_v55  ;;  %3627 = vmatpush2.bf16.msra.mxu1 %v6543_v57  ;;  %v6471_v55 = vld [vmem:[#allocation8 + $0x1e8] ss:$16 sps:$4 sm:$0xff]  }
 0x1eb   :  { %3628 = vmatprep.subr.bf16.mxu1 %v6551_v14  ;;  %v6474_v57 = vld [vmem:[#allocation8 + $0x1c8] ss:$16 sps:$4 sm:$0xff]  }
 0x1ec   :  { %v6477_v14 = vld [vmem:[#allocation8 + $0x1a8] ss:$16 sps:$4 sm:$0xff]  }
 0x1ed   :  { %3600 = vmatpush2.bf16.msra.mxu0 %v6444_v58  ;;  %v6479_v58 = vld [vmem:[#allocation8 + $0x1ac] ss:$16 sps:$4 sm:$0xff]  }
 0x1ee   :  { %3651 = vmatprep.subr.bf16.mxu0 %v6449_v60  ;;  %3629 = vmatpush2.bf16.msra.mxu1 %v6549_v62 }
 0x1ef   :  { %3630 = vmatprep.subr.bf16.mxu1 %v6558_v37 }
 0x1f0   :  { %v2096_v38 = vpop.f32.mrf.mxu0 }
 0x1f1   :  { %v2137_v35 = vpop.f32.mrf.mxu1  ;;  %v2097_v2 = vadd.f32 %v2096_v38, %v7243_v52 }
 0x1f2   :  { %v2098_v43 = vpop.f32.mrf.mxu0  ;;  %3631 = vmatpush2.bf16.msra.mxu1 %v6556_v1 }
 0x1f3   :  { %v2139_v4 = vpop.f32.mrf.mxu1  ;;  %v2099_v5 = vadd.f32 %v2098_v43, %v7249_v59  ;;  %v2138_v8 = vadd.f32 %v2137_v35, %v2097_v2  ;;  %3632 = vmatprep.subr.bf16.mxu1 %v6564_v9  ;;  %v6568_v59 = vld [vmem:[#allocation8 + $0x560] ss:$16 sps:$4 sm:$0xff]   ;;  %v6480_v35 = vld [vmem:[#allocation8 + $0x188] ss:$16 sps:$4 sm:$0xff]   ;;  %v6485_v2 = vld [vmem:[#allocation8 + $0x16c] ss:$16 sps:$4 sm:$0xff]  }
 0x1f4   :  { %v2100_v10 = vpop.f32.mrf.mxu0  ;;  %v6489_v9 = vld [vmem:[#allocation8 + $0x128] ss:$16 sps:$4 sm:$0xff]  }
 0x1f5   :  { %v2141_v11 = vpop.f32.mrf.mxu1  ;;  %v2269_v13 = vpack.c.bf16 %v2138_v8, %v2138_v8  ;;  %v2140_v16 = vadd.f32 %v2139_v4, %v2099_v5  ;;  %v6483_v4 = vld [vmem:[#allocation8 + $0x168] ss:$16 sps:$4 sm:$0xff]   ;;  %v6488_v5 = vld [vmem:[#allocation8 + $0x14c] ss:$16 sps:$4 sm:$0xff]  }
 0x1f6   :  { %v2101_v52 = vpop.f32.mrf.mxu0  ;;  %3633 = vmatpush2.bf16.msra.mxu1 %v6562_v12  ;;  %v6486_v8 = vld [vmem:[#allocation8 + $0x148] ss:$16 sps:$4 sm:$0xff]   ;;  %v6494_v10 = vld [vmem:[#allocation8 + $0x10c] ss:$16 sps:$4 sm:$0xff]  }
 0x1f7   :  { %v2142_v19 = vpop.f32.mrf.mxu1  ;;  %v2366_v20 = vadd.bf16 %v2342_v44, %v2269_v13  ;;  %v2270_v21 = vpack.c.bf16 %v2140_v16, %v2140_v16  ;;  %3634 = vmatprep.subr.bf16.mxu1 %v6570_v22  ;;  %v6491_v44 = vld [vmem:[#allocation8 + $0x12c] ss:$16 sps:$4 sm:$0xff]   ;;  %v6492_v11 = vld [vmem:[#allocation8 + $0x108] ss:$16 sps:$4 sm:$0xff]  }
 0x1f8   :  { %v6500_v12 = vld [vmem:[#allocation8 + $0x4ec] ss:$16 sps:$4 sm:$0xff]   ;;  %v6498_v13 = vld [vmem:[#allocation8 + $0x4e8] ss:$16 sps:$4 sm:$0xff]  }
 0x1f9   :  { %v2367_v23 = vadd.bf16 %v2349_v18, %v2270_v21  ;;  %v6506_v16 = vld [vmem:[#allocation8 + $0x4cc] ss:$16 sps:$4 sm:$0xff]   ;;  %v6504_v18 = vld [vmem:[#allocation8 + $0x4c8] ss:$16 sps:$4 sm:$0xff]  }
 0x1fa   :  { %3635 = vmatpush2.bf16.msra.mxu1 %v6568_v59  ;;  %v6512_v52 = vld [vmem:[#allocation8 + $0x4ac] ss:$16 sps:$4 sm:$0xff]   ;;  %v6510_v19 = vld [vmem:[#allocation8 + $0x4a8] ss:$16 sps:$4 sm:$0xff]  }
 0x1fb   :  { %6868 = vtanh.bf16 %v2367_v23  ;;  %3636 = vmatprep.subr.bf16.mxu1 %v6576_v24  ;;  %v6516_v21 = vld [vmem:[#allocation8 + $0x488] ss:$16 sps:$4 sm:$0xff]   ;;  %v6524_v22 = vld [vmem:[#allocation8 + $0x46c] ss:$16 sps:$4 sm:$0xff]  }
 0x1fc   :  { %6870 = vtanh.bf16 %v2366_v20  ;;  %v6518_v20 = vld [vmem:[#allocation8 + $0x48c] ss:$16 sps:$4 sm:$0xff]   ;;  %v6522_v59 = vld [vmem:[#allocation8 + $0x468] ss:$16 sps:$4 sm:$0xff]  }
 0x1fd   :  { %v6530_v23 = vld [vmem:[#allocation8 + $0x44c] ss:$16 sps:$4 sm:$0xff]   ;;  %v6528_v24 = vld [vmem:[#allocation8 + $0x448] ss:$16 sps:$4 sm:$0xff]  }
 0x1fe   :  { %3637 = vmatpush2.bf16.msra.mxu1 %v6574_v25  ;;  %v2275_v25 = vcombine.high %v7224_v28, %v7224_v28  ;;  %v6552_v28 = vld [vmem:[#allocation8 + $0x5c8] ss:$16 sps:$4 sm:$0xff]  }
 0x1ff   :  { %3638 = vmatprep.subr.bf16.mxu1 %v6582_v26  ;;  %v6534_v26 = vld [vmem:[#allocation8 + $0x428] ss:$16 sps:$4 sm:$0xff]  }
 0x202   :  { %3639 = vmatpush2.bf16.msra.mxu1 %v6580_v27  ;;  %v6542_v27 = vld [vmem:[#allocation8 + $0x40c] ss:$16 sps:$4 sm:$0xff]  }
 0x203   :  { %3640 = vmatprep.subr.bf16.mxu1 %v6588_v29  ;;  %v2289_v29 = vrot.slane %v2275_v25, %v7226_v30  ;;  %v6616_v25 = vld [vmem:[#allocation8 + $0x3e8] ss:$16 sps:$4 sm:$0xff]  }
 0x206   :  { %3641 = vmatpush2.bf16.msra.mxu1 %v6586_v31  ;;  %v6540_v31 = vld [vmem:[#allocation8 + $0x408] ss:$16 sps:$4 sm:$0xff]  }
 0x207   :  { %3692 = vmatprep.subr.bf16.mxu1 %v6594_v32  ;;  %v6548_v32 = vld [vmem:[#allocation8 + $0x5ec] ss:$16 sps:$4 sm:$0xff]  }
 0x209   :  { %v7266_v36 = vpop.eup %6868 }
 0x20a   :  { %v7268_v51 = vpop.eup %6870  ;;  %3601 = vmatprep.mubr.bf16.mxu0 %v7266_v36 }
 0x20b   :  { %3602 = vmatmul.mubr.bf16.vlgmr.msra.gmra.mxu0 %v7268_v51 }
 0x20c   :  { %3652 = vmatpush1.bf16.msra.mxu0 %v6447_v33  ;;  %3683 = vmatprep.mubr.bf16.mxu0 %v7252_v15  ;;  %v6465_v15 = vld [vmem:[#allocation8 + $0x28] ss:$16 sps:$4 sm:$0xff]   ;;  %v2291_v33 = vcombine.high %v2289_v29, %v2289_v29 }
 0x20d   :  { %3653 = vmatprep.subr.bf16.mxu0 %v6452_v47  ;;  %v6546_v47 = vld [vmem:[#allocation8 + $0x5e8] ss:$16 sps:$4 sm:$0xff]  }
 0x210   :  { %3654 = vmatpush1.bf16.msra.mxu0 %v6450_v6  ;;  %v6554_v6 = vld [vmem:[#allocation8 + $0x5cc] ss:$16 sps:$4 sm:$0xff]  }
 0x211   :  { %3655 = vmatprep.subr.bf16.mxu0 %v6455_v39  ;;  %v2305_v39 = vrot.slane %v2289_v29, %v7226_v30  ;;  %v6624_v29 = vld [vmem:[#allocation8 + $0x3ac] ss:$16 sps:$4 sm:$0xff]  }
 0x214   :  { %3656 = vmatpush1.bf16.msra.mxu0 %v6453_v7  ;;  %v2319_v7 = vrot.slane %v2291_v33, %v7226_v30  ;;  %v6625_v33 = vld [vmem:[#allocation8 + $0x388] ss:$16 sps:$4 sm:$0xff]  }
 0x215   :  { %3657 = vmatprep.subr.bf16.mxu0 %v6458_v40  ;;  %v6561_v40 = vld [vmem:[#allocation8 + $0x5ac] ss:$16 sps:$4 sm:$0xff]  }
 0x218   :  { %3658 = vmatpush1.bf16.msra.mxu0 %v6456_v41  ;;  %v2351_v41 = vpack.i.b16 %v2305_v39, %v2305_v39  ;;  %v6633_v39 = vld [vmem:[#allocation8 + $0x34c] ss:$16 sps:$4 sm:$0xff]  }
 0x219   :  { %3659 = vmatprep.subr.bf16.mxu0 %v6461_v42  ;;  %v2358_v42 = vpack.i.b16 %v2319_v7, %v2319_v7  ;;  %v6631_v7 = vld [vmem:[#allocation8 + $0x348] ss:$16 sps:$4 sm:$0xff]  }
 0x21c   :  { %3660 = vmatpush1.bf16.msra.mxu0 %v6459_v45 }
 0x21d   :  { %3661 = vmatprep.subr.bf16.mxu0 %v6464_v46  ;;  %v6559_v46 = vld [vmem:[#allocation8 + $0x5a8] ss:$16 sps:$4 sm:$0xff]  }
 0x220   :  { %3662 = vmatpush1.bf16.msra.mxu0 %v6462_v34 }
 0x221   :  { %3663 = vmatprep.subr.bf16.mxu0 %v6467_v49 }
 0x224   :  { %3664 = vmatpush1.bf16.msra.mxu0 %v6465_v15  ;;  %v6567_v15 = vld [vmem:[#allocation8 + $0x58c] ss:$16 sps:$4 sm:$0xff]  }
 0x225   :  { %3665 = vmatprep.subr.bf16.mxu0 %v6470_v50  ;;  %v2356_v50 = vrot.slane %v2351_v41, %v7238_v48  ;;  %v6639_v41 = vld [vmem:[#allocation8 + $0x30c] ss:$16 sps:$4 sm:$0xff]  }
 0x228   :  { %3666 = vmatpush1.bf16.msra.mxu0 %v6468_v53 }
 0x229   :  { %3667 = vmatprep.subr.bf16.mxu0 %v6473_v54 }
 0x22c   :  { %3668 = vmatpush2.bf16.msra.mxu0 %v6471_v55 }
 0x22d   :  { %3669 = vmatprep.subr.bf16.mxu0 %v6476_v56  ;;  %v2363_v56 = vrot.slane %v2358_v42, %v7238_v48  ;;  %v6637_v42 = vld [vmem:[#allocation8 + $0x308] ss:$16 sps:$4 sm:$0xff]  }
 0x230   :  { %3670 = vmatpush2.bf16.msra.mxu0 %v6474_v57  ;;  %v2178_v60 = vpop.f32.mrf.mxu0 }
 0x231   :  { %v2219_v61 = vpop.f32.mrf.mxu1  ;;  %3671 = vmatprep.subr.bf16.mxu0 %v6479_v58  ;;  %v6565_v58 = vld [vmem:[#allocation8 + $0x588] ss:$16 sps:$4 sm:$0xff]  }
 0x232   :  { %v7273_v62 = vadd.f32 %v2219_v61, %v2178_v60  ;;  %v7275_v0 = vpop.f32.mrf.mxu0  ;;  %v6573_v61 = vld [vmem:[#allocation8 + $0x56c] ss:$16 sps:$4 sm:$0xff]  }
 0x233   :  { %v7277_v37 = vpop.f32.mrf.mxu1 }
 0x234   :  { %3672 = vmatpush2.bf16.msra.mxu0 %v6477_v14  ;;  %v2182_v38 = vpop.f32.mrf.mxu0  ;;  %v2222_v34 = vadd.f32 %v7277_v37, %v7275_v0  ;;  %v6579_v37 = vld [vmem:[#allocation8 + $0x54c] ss:$16 sps:$4 sm:$0xff]  }
 0x235   :  { %v2223_v1 = vpop.f32.mrf.mxu1  ;;  %3673 = vmatprep.subr.bf16.mxu0 %v6482_v63  ;;  %v6577_v38 = vld [vmem:[#allocation8 + $0x548] ss:$16 sps:$4 sm:$0xff]  }
 0x236   :  { %v2183_v3 = vpop.f32.mrf.mxu0  ;;  %v6583_v1 = vld [vmem:[#allocation8 + $0x528] ss:$16 sps:$4 sm:$0xff]  }
 0x237   :  { %v2224_v43 = vpop.f32.mrf.mxu1  ;;  %v6589_v3 = vld [vmem:[#allocation8 + $0x508] ss:$16 sps:$4 sm:$0xff]  }
 0x238   :  { %3674 = vmatpush2.bf16.msra.mxu0 %v6480_v35  ;;  %v6585_v35 = vld [vmem:[#allocation8 + $0x52c] ss:$16 sps:$4 sm:$0xff]   ;;  %v6592_v43 = vld [vmem:[#allocation8 + $0x2e8] ss:$16 sps:$4 sm:$0xff]  }
 0x239   :  { %3675 = vmatprep.subr.bf16.mxu0 %v6485_v2  ;;  %v6591_v2 = vld [vmem:[#allocation8 + $0x50c] ss:$16 sps:$4 sm:$0xff]  }
 0x23c   :  { %3676 = vmatpush2.bf16.msra.mxu0 %v6483_v4 }
 0x23d   :  { %3677 = vmatprep.subr.bf16.mxu0 %v6488_v5  ;;  %v6597_v5 = vld [vmem:[#allocation8 + $0x2cc] ss:$16 sps:$4 sm:$0xff]  }
 0x240   :  { %3678 = vmatpush2.bf16.msra.mxu0 %v6486_v8 }
 0x241   :  { %3679 = vmatprep.subr.bf16.mxu0 %v6491_v44 }
 0x244   :  { %3680 = vmatpush2.bf16.msra.mxu0 %v6489_v9  ;;  %v6595_v9 = vld [vmem:[#allocation8 + $0x2c8] ss:$16 sps:$4 sm:$0xff]  }
 0x245   :  { %3681 = vmatprep.subr.bf16.mxu0 %v6494_v10 }
 0x248   :  { %3682 = vmatpush2.bf16.msra.mxu0 %v6492_v11  ;;  %v6600_v11 = vld [vmem:[#allocation8 + $0x2ac] ss:$16 sps:$4 sm:$0xff]  }
 0x249   :  { %3733 = vmatprep.subr.bf16.mxu0 %v6500_v12 }
 0x24b   :  { %3684 = vmatmul.mubr.bf16.vlgmr.msra.gmra.mxu0 %v7254_v17  ;;  %v6536_v17 = vld [vmem:[#allocation8 + $0x42c] ss:$16 sps:$4 sm:$0xff]  }
 0x24c   :  { %3734 = vmatpush1.bf16.msra.mxu0 %v6498_v13  ;;  %v6598_v13 = vld [vmem:[#allocation8 + $0x2a8] ss:$16 sps:$4 sm:$0xff]  }
 0x24d   :  { %3735 = vmatprep.subr.bf16.mxu0 %v6506_v16 }
 0x250   :  { %3736 = vmatpush1.bf16.msra.mxu0 %v6504_v18  ;;  %v6603_v18 = vld [vmem:[#allocation8 + $0x28c] ss:$16 sps:$4 sm:$0xff]  }
 0x251   :  { %3737 = vmatprep.subr.bf16.mxu0 %v6512_v52  ;;  %v6601_v52 = vld [vmem:[#allocation8 + $0x288] ss:$16 sps:$4 sm:$0xff]  }
 0x254   :  { %3738 = vmatpush1.bf16.msra.mxu0 %v6510_v19  ;;  %v6606_v19 = vld [vmem:[#allocation8 + $0x26c] ss:$16 sps:$4 sm:$0xff]  }
 0x255   :  { %3739 = vmatprep.subr.bf16.mxu0 %v6518_v20  ;;  %v6604_v20 = vld [vmem:[#allocation8 + $0x268] ss:$16 sps:$4 sm:$0xff]  }
 0x258   :  { %3740 = vmatpush1.bf16.msra.mxu0 %v6516_v21  ;;  %v6607_v21 = vld [vmem:[#allocation8 + $0x248] ss:$16 sps:$4 sm:$0xff]  }
 0x259   :  { %3741 = vmatprep.subr.bf16.mxu0 %v6524_v22  ;;  %v6612_v22 = vld [vmem:[#allocation8 + $0x22c] ss:$16 sps:$4 sm:$0xff]  }
 0x25c   :  { %3742 = vmatpush1.bf16.msra.mxu0 %v6522_v59  ;;  %v6610_v59 = vld [vmem:[#allocation8 + $0x228] ss:$16 sps:$4 sm:$0xff]  }
 0x25d   :  { %3743 = vmatprep.subr.bf16.mxu0 %v6530_v23  ;;  %v6615_v23 = vld [vmem:[#allocation8 + $0x20c] ss:$16 sps:$4 sm:$0xff]  }
 0x260   :  { %3744 = vmatpush1.bf16.msra.mxu0 %v6528_v24  ;;  %v6613_v24 = vld [vmem:[#allocation8 + $0x208] ss:$16 sps:$4 sm:$0xff]  }
 0x261   :  { %3745 = vmatprep.subr.bf16.mxu0 %v6536_v17  ;;  %v6618_v17 = vld [vmem:[#allocation8 + $0x3ec] ss:$16 sps:$4 sm:$0xff]  }
 0x264   :  { %3746 = vmatpush1.bf16.msra.mxu0 %v6534_v26  ;;  %v6621_v26 = vld [vmem:[#allocation8 + $0x3cc] ss:$16 sps:$4 sm:$0xff]  }
 0x265   :  { %3747 = vmatprep.subr.bf16.mxu0 %v6542_v27  ;;  %v6619_v27 = vld [vmem:[#allocation8 + $0x3c8] ss:$16 sps:$4 sm:$0xff]  }
 0x268   :  { %3748 = vmatpush1.bf16.msra.mxu0 %v6540_v31  ;;  %v6622_v31 = vld [vmem:[#allocation8 + $0x3a8] ss:$16 sps:$4 sm:$0xff]  }
 0x269   :  { %3749 = vmatprep.subr.bf16.mxu0 %v6548_v32  ;;  %v6627_v32 = vld [vmem:[#allocation8 + $0x38c] ss:$16 sps:$4 sm:$0xff]  }
 0x26c   :  { %3750 = vmatpush2.bf16.msra.mxu0 %v6546_v47  ;;  %v6630_v47 = vld [vmem:[#allocation8 + $0x36c] ss:$16 sps:$4 sm:$0xff]  }
 0x26d   :  { %3751 = vmatprep.subr.bf16.mxu0 %v6554_v6  ;;  %v6628_v6 = vld [vmem:[#allocation8 + $0x368] ss:$16 sps:$4 sm:$0xff]  }
 0x270   :  { %3752 = vmatpush2.bf16.msra.mxu0 %v6552_v28  ;;  %v2260_v45 = vpop.f32.mrf.mxu0  ;;  %v6636_v28 = vld [vmem:[#allocation8 + $0x32c] ss:$16 sps:$4 sm:$0xff]  }
 0x271   :  { %v2261_v49 = vadd.f32 %v2260_v45, %v7273_v62  ;;  %3753 = vmatprep.subr.bf16.mxu0 %v6561_v40  ;;  %v6571_v62 = vld [vmem:[#allocation8 + $0x568] ss:$16 sps:$4 sm:$0xff]  }
 0x272   :  { %v2262_v53 = vpop.f32.mrf.mxu0  ;;  %v6634_v40 = vld [vmem:[#allocation8 + $0x328] ss:$16 sps:$4 sm:$0xff]  }
 0x273   :  { %v2271_v54 = vpack.c.bf16 %v2261_v49, %v2261_v49  ;;  %v2263_v55 = vadd.f32 %v2262_v53, %v2222_v34  ;;  %v6642_v45 = vld [vmem:[#allocation11 + $0xe4] ss:$16 sps:$4 sm:$0xff]   ;;  %v6643_v49 = vld [vmem:[#allocation11 + $0xc0] ss:$16 sps:$4 sm:$0xff]  }
 0x274   :  { %3754 = vmatpush2.bf16.msra.mxu0 %v6559_v46  ;;  %v2264_v57 = vpop.f32.mrf.mxu0  ;;  %v6640_v46 = vld [vmem:[#allocation11 + $0xe0] ss:$16 sps:$4 sm:$0xff]   ;;  %v6645_v34 = vld [vmem:[#allocation11 + $0xc4] ss:$16 sps:$4 sm:$0xff]  }
 0x275   :  { %v2272_v60 = vpack.c.bf16 %v2263_v55, %v2263_v55  ;;  %3755 = vmatprep.subr.bf16.mxu0 %v6567_v15  ;;  %v2368_v14 = vadd.bf16 %v2356_v50, %v2271_v54  ;;  %v6648_v50 = vld [vmem:[#allocation11 + $0xa4] ss:$16 sps:$4 sm:$0xff]   ;;  %v6646_v54 = vld [vmem:[#allocation11 + $0xa0] ss:$16 sps:$4 sm:$0xff]  }
 0x276   :  { %v2265_v63 = vpop.f32.mrf.mxu0 }
 0x277   :  { %v2369_v0 = vadd.bf16 %v2363_v56, %v2272_v60  ;;  %v6651_v56 = vld [vmem:[#allocation11 + $0x84] ss:$16 sps:$4 sm:$0xff]  }
 0x278   :  { %3756 = vmatpush2.bf16.msra.mxu0 %v6565_v58  ;;  %v6649_v58 = vld [vmem:[#allocation11 + $0x80] ss:$16 sps:$4 sm:$0xff]   ;;  %v6654_v60 = vld [vmem:[#allocation11 + $0x64] ss:$16 sps:$4 sm:$0xff]  }
 0x279   :  { %6872 = vtanh.bf16 %v2369_v0  ;;  %3757 = vmatprep.subr.bf16.mxu0 %v6573_v61  ;;  %v6693_v61 = vld [vmem:[#allocation11 + $0x2e4] ss:$16 sps:$4 sm:$0xff]   ;;  %v6697_v0 = vld [vmem:[#allocation11 + $0x2c0] ss:$16 sps:$4 sm:$0xff]  }
 0x27a   :  { %6874 = vtanh.bf16 %v2368_v14  ;;  %v6652_v14 = vld [vmem:[#allocation11 + $0x60] ss:$16 sps:$4 sm:$0xff]   ;;  %v6657_v63 = vld [vmem:[#allocation11 + $0x44] ss:$16 sps:$4 sm:$0xff]  }
 0x27c   :  { %3758 = vmatpush2.bf16.msra.mxu0 %v6571_v62  ;;  %v6699_v62 = vld [vmem:[#allocation11 + $0x2c4] ss:$16 sps:$4 sm:$0xff]  }
 0x27d   :  { %3759 = vmatprep.subr.bf16.mxu0 %v6579_v37  ;;  %v6655_v37 = vld [vmem:[#allocation11 + $0x40] ss:$16 sps:$4 sm:$0xff]  }
 0x280   :  { %3760 = vmatpush2.bf16.msra.mxu0 %v6577_v38  ;;  %v6660_v38 = vld [vmem:[#allocation11 + $0x24] ss:$16 sps:$4 sm:$0xff]  }
 0x281   :  { %3761 = vmatprep.subr.bf16.mxu0 %v6585_v35  ;;  %v6703_v35 = vld [vmem:[#allocation11 + $0x2a0] ss:$16 sps:$4 sm:$0xff]  }
 0x284   :  { %3762 = vmatpush2.bf16.msra.mxu0 %v6583_v1  ;;  %v6705_v1 = vld [vmem:[#allocation11 + $0x2a4] ss:$16 sps:$4 sm:$0xff]  }
 0x285   :  { %3763 = vmatprep.subr.bf16.mxu0 %v6591_v2  ;;  %v6658_v2 = vld [vmem:[#allocation11 + $0x20] ss:$16 sps:$4 sm:$0xff]  }
 0x287   :  { %v6873_v4 = vpop.eup %6872 }
 0x288   :  { %v6875_v8 = vpop.eup %6874  ;;  %3764 = vmatpush2.bf16.msra.mxu0 %v6589_v3  ;;  %3642 = vmatprep.mubr.bf16.mxu1 %v6873_v4  ;;  %v6663_v3 = vld [vmem:[#allocation11 + $0x4] ss:$16 sps:$4 sm:$0xff]  }
 0x289   :  { %3765 = vmatprep.mubr.bf16.mxu0 %v6873_v4  ;;  %v7290_v44 = vpop.f32.mrf.mxu1  ;;  %3643 = vmatmul.mubr.bf16.vlgmr.msra.gmra.mxu1 %v6875_v8  ;;  %v6711_v4 = vld [vmem:[#allocation11 + $0x284] ss:$16 sps:$4 sm:$0xff]  }
 0x28a   :  { %3693 = vmatpush1.bf16.msra.mxu1 %v6592_v43  ;;  %3724 = vmatprep.mubr.bf16.mxu1 %v7266_v36  ;;  %v6609_v36 = vld [vmem:[#allocation8 + $0x24c] ss:$16 sps:$4 sm:$0xff]   ;;  %v6709_v43 = vld [vmem:[#allocation11 + $0x280] ss:$16 sps:$4 sm:$0xff]  }
 0x28b   :  { %3766 = vmatmul.mubr.bf16.vlgmr.msra.gmra.mxu0 %v6875_v8  ;;  %v7293_v10 = vpop.f32.mrf.mxu1  ;;  %3694 = vmatprep.subr.bf16.mxu1 %v6597_v5  ;;  %v6661_v5 = vld [vmem:[#allocation11] ss:$16 sps:$4 sm:$0xff]   ;;  %v6666_v8 = vld [vmem:[#allocation11 + $0x1e4] ss:$16 sps:$4 sm:$0xff]  }
 0x28c   :  { %4649 = vmatprep.subr.bf16.mxu0 %v6693_v61 }
 0x28d   :  { %v3566_v12 = vpop.f32.mrf.mxu1 }
 0x28e   :  { %3695 = vmatpush1.bf16.msra.mxu1 %v6595_v9  ;;  %v6715_v9 = vld [vmem:[#allocation11 + $0x260] ss:$16 sps:$4 sm:$0xff]  }
 0x28f   :  { %v3567_v16 = vpop.f32.mrf.mxu1  ;;  %3696 = vmatprep.subr.bf16.mxu1 %v6600_v11  ;;  %v6717_v11 = vld [vmem:[#allocation11 + $0x264] ss:$16 sps:$4 sm:$0xff]   ;;  %v6664_v12 = vld [vmem:[#allocation11 + $0x1e0] ss:$16 sps:$4 sm:$0xff]  }
 0x290   :  { %v6721_v16 = vld [vmem:[#allocation11 + $0x240] ss:$16 sps:$4 sm:$0xff]  }
 0x292   :  { %3697 = vmatpush1.bf16.msra.mxu1 %v6598_v13  ;;  %v6669_v13 = vld [vmem:[#allocation11 + $0x1c4] ss:$16 sps:$4 sm:$0xff]  }
 0x293   :  { %3698 = vmatprep.subr.bf16.mxu1 %v6603_v18  ;;  %v6723_v18 = vld [vmem:[#allocation11 + $0x244] ss:$16 sps:$4 sm:$0xff]  }
 0x296   :  { %3699 = vmatpush1.bf16.msra.mxu1 %v6601_v52  ;;  %v6667_v52 = vld [vmem:[#allocation11 + $0x1c0] ss:$16 sps:$4 sm:$0xff]  }
 0x297   :  { %3700 = vmatprep.subr.bf16.mxu1 %v6606_v19  ;;  %v6672_v19 = vld [vmem:[#allocation11 + $0x1a4] ss:$16 sps:$4 sm:$0xff]  }
 0x29a   :  { %3701 = vmatpush1.bf16.msra.mxu1 %v6604_v20  ;;  %v6727_v20 = vld [vmem:[#allocation11 + $0x220] ss:$16 sps:$4 sm:$0xff]  }
 0x29b   :  { %3702 = vmatprep.subr.bf16.mxu1 %v6609_v36  ;;  %v6729_v36 = vld [vmem:[#allocation11 + $0x224] ss:$16 sps:$4 sm:$0xff]  }
 0x29e   :  { %3703 = vmatpush1.bf16.msra.mxu1 %v6607_v21  ;;  %v6670_v21 = vld [vmem:[#allocation11 + $0x1a0] ss:$16 sps:$4 sm:$0xff]  }
 0x29f   :  { %3704 = vmatprep.subr.bf16.mxu1 %v6612_v22  ;;  %v6675_v22 = vld [vmem:[#allocation11 + $0x184] ss:$16 sps:$4 sm:$0xff]  }
 0x2a2   :  { %3705 = vmatpush1.bf16.msra.mxu1 %v6610_v59  ;;  %v6733_v59 = vld [vmem:[#allocation11 + $0x200] ss:$16 sps:$4 sm:$0xff]  }
 0x2a3   :  { %3706 = vmatprep.subr.bf16.mxu1 %v6615_v23  ;;  %v6735_v23 = vld [vmem:[#allocation11 + $0x204] ss:$16 sps:$4 sm:$0xff]  }
 0x2a6   :  { %3707 = vmatpush1.bf16.msra.mxu1 %v6613_v24  ;;  %v6673_v24 = vld [vmem:[#allocation11 + $0x180] ss:$16 sps:$4 sm:$0xff]  }
 0x2a7   :  { %3708 = vmatprep.subr.bf16.mxu1 %v6618_v17  ;;  %v6678_v17 = vld [vmem:[#allocation11 + $0x164] ss:$16 sps:$4 sm:$0xff]  }
 0x2aa   :  { %3709 = vmatpush2.bf16.msra.mxu1 %v6616_v25  ;;  %v6739_v25 = vld [vmem:[#allocation11 + $0x3e0] ss:$16 sps:$4 sm:$0xff]  }
 0x2ab   :  { %3710 = vmatprep.subr.bf16.mxu1 %v6621_v26  ;;  %v6741_v26 = vld [vmem:[#allocation11 + $0x3e4] ss:$16 sps:$4 sm:$0xff]  }
 0x2ae   :  { %3711 = vmatpush2.bf16.msra.mxu1 %v6619_v27  ;;  %v6676_v27 = vld [vmem:[#allocation11 + $0x160] ss:$16 sps:$4 sm:$0xff]  }
 0x2af   :  { %3712 = vmatprep.subr.bf16.mxu1 %v6624_v29  ;;  %v6681_v29 = vld [vmem:[#allocation11 + $0x144] ss:$16 sps:$4 sm:$0xff]  }
 0x2b2   :  { %3713 = vmatpush2.bf16.msra.mxu1 %v6622_v31  ;;  %v6745_v31 = vld [vmem:[#allocation11 + $0x3c0] ss:$16 sps:$4 sm:$0xff]  }
 0x2b3   :  { %3714 = vmatprep.subr.bf16.mxu1 %v6627_v32  ;;  %v6747_v32 = vld [vmem:[#allocation11 + $0x3c4] ss:$16 sps:$4 sm:$0xff]  }
 0x2b6   :  { %3715 = vmatpush2.bf16.msra.mxu1 %v6625_v33  ;;  %v6679_v33 = vld [vmem:[#allocation11 + $0x140] ss:$16 sps:$4 sm:$0xff]  }
 0x2b7   :  { %3716 = vmatprep.subr.bf16.mxu1 %v6630_v47  ;;  %v6684_v47 = vld [vmem:[#allocation11 + $0x124] ss:$16 sps:$4 sm:$0xff]  }
 0x2ba   :  { %3717 = vmatpush2.bf16.msra.mxu1 %v6628_v6  ;;  %v6751_v6 = vld [vmem:[#allocation11 + $0x3a0] ss:$16 sps:$4 sm:$0xff]  }
 0x2bb   :  { %3718 = vmatprep.subr.bf16.mxu1 %v6633_v39  ;;  %v6753_v39 = vld [vmem:[#allocation11 + $0x3a4] ss:$16 sps:$4 sm:$0xff]  }
 0x2be   :  { %3719 = vmatpush2.bf16.msra.mxu1 %v6631_v7  ;;  %v6682_v7 = vld [vmem:[#allocation11 + $0x120] ss:$16 sps:$4 sm:$0xff]  }
 0x2bf   :  { %3720 = vmatprep.subr.bf16.mxu1 %v6636_v28  ;;  %v6687_v28 = vld [vmem:[#allocation11 + $0x104] ss:$16 sps:$4 sm:$0xff]  }
 0x2c2   :  { %3721 = vmatpush2.bf16.msra.mxu1 %v6634_v40  ;;  %v6757_v40 = vld [vmem:[#allocation11 + $0x380] ss:$16 sps:$4 sm:$0xff]  }
 0x2c3   :  { %3722 = vmatprep.subr.bf16.mxu1 %v6639_v41  ;;  %v6759_v41 = vld [vmem:[#allocation11 + $0x384] ss:$16 sps:$4 sm:$0xff]  }
 0x2c6   :  { %3723 = vmatpush2.bf16.msra.mxu1 %v6637_v42  ;;  %v6685_v42 = vld [vmem:[#allocation11 + $0x100] ss:$16 sps:$4 sm:$0xff]  }
 0x2c7   :  { %4608 = vmatprep.subr.bf16.mxu1 %v6642_v45  ;;  %v6690_v45 = vld [vmem:[#allocation11 + $0xec] ss:$16 sps:$4 sm:$0xff]  }
 0x2c9   :  { %3725 = vmatmul.mubr.bf16.vlgmr.msra.gmra.mxu1 %v7268_v51  ;;  %v6691_v51 = vld [vmem:[#allocation11 + $0x2e0] ss:$16 sps:$4 sm:$0xff]  }
 0x2ca   :  { %4609 = vmatpush1.bf16.msra.mxu1 %v6640_v46  ;;  %4650 = vmatpush1.bf16.msra.mxu0 %v6691_v51  ;;  %v6763_v46 = vld [vmem:[#allocation11 + $0x360] ss:$16 sps:$4 sm:$0xff]  }
 0x2cb   :  { %v7296_v15 = vpop.f32.mrf.mxu0  ;;  %4610 = vmatprep.subr.bf16.mxu1 %v6645_v34  ;;  %4651 = vmatprep.subr.bf16.mxu0 %v6699_v62  ;;  %v6765_v34 = vld [vmem:[#allocation11 + $0x364] ss:$16 sps:$4 sm:$0xff]   ;;  %v6781_v51 = vld [vmem:[#allocation11 + $0x300] ss:$16 sps:$4 sm:$0xff]  }
 0x2cd   :  { %v7298_v53 = vpop.f32.mrf.mxu0 }
 0x2ce   :  { %4611 = vmatpush1.bf16.msra.mxu1 %v6643_v49  ;;  %4652 = vmatpush1.bf16.msra.mxu0 %v6697_v0  ;;  %v6771_v49 = vld [vmem:[#allocation11 + $0x344] ss:$16 sps:$4 sm:$0xff]  }
 0x2cf   :  { %v3607_v55 = vpop.f32.mrf.mxu0  ;;  %4612 = vmatprep.subr.bf16.mxu1 %v6648_v50  ;;  %4653 = vmatprep.subr.bf16.mxu0 %v6705_v1  ;;  %v6769_v50 = vld [vmem:[#allocation11 + $0x340] ss:$16 sps:$4 sm:$0xff]  }
 0x2d0   :  { %v6777_v55 = vld [vmem:[#allocation11 + $0x324] ss:$16 sps:$4 sm:$0xff]  }
 0x2d1   :  { %v3608_v57 = vpop.f32.mrf.mxu0 }
 0x2d2   :  { %4613 = vmatpush1.bf16.msra.mxu1 %v6646_v54  ;;  %4654 = vmatpush1.bf16.msra.mxu0 %v6703_v35  ;;  %v6775_v57 = vld [vmem:[#allocation11 + $0x320] ss:$16 sps:$4 sm:$0xff]   ;;  %v3604_v35 = vadd.f32 %v7296_v15, %v7290_v44 }
 0x2d3   :  { %4614 = vmatprep.subr.bf16.mxu1 %v6651_v56  ;;  %4655 = vmatprep.subr.bf16.mxu0 %v6711_v4 }
 0x2d6   :  { %4615 = vmatpush1.bf16.msra.mxu1 %v6649_v58  ;;  %4656 = vmatpush1.bf16.msra.mxu0 %v6709_v43 }
 0x2d7   :  { %4616 = vmatprep.subr.bf16.mxu1 %v6654_v60  ;;  %4657 = vmatprep.subr.bf16.mxu0 %v6717_v11  ;;  %v6783_v60 = vld [vmem:[#allocation11 + $0x304] ss:$16 sps:$4 sm:$0xff]  }
 0x2da   :  { %4617 = vmatpush1.bf16.msra.mxu1 %v6652_v14  ;;  %4658 = vmatpush1.bf16.msra.mxu0 %v6715_v9  ;;  %v6786_v14 = vld [vmem:[#allocation11 + $0x2ec] ss:$16 sps:$4 sm:$0xff]  }
 0x2db   :  { %4618 = vmatprep.subr.bf16.mxu1 %v6657_v63  ;;  %4659 = vmatprep.subr.bf16.mxu0 %v6723_v18  ;;  %v5688_v63 = vld.sshfl [vmem:[#allocation10] sm:$0x33 pattern:$0x75316420] }
 0x2dc   :  { %v3787_v0 = vcombine.high %v5688_v63, %v5688_v63  ;;  %v7305_v62 = vrot.slane %v5688_v63, %v7226_v30 }
 0x2de   :  { %4619 = vmatpush1.bf16.msra.mxu1 %v6655_v37  ;;  %4660 = vmatpush1.bf16.msra.mxu0 %v6721_v16  ;;  %v7308_v37 = vrot.slane %v3787_v0, %v7226_v30  ;;  %v6772_v0 = vld [vmem:[#allocation11 + $0x128] ss:$16 sps:$4 sm:$0xff]  }
 0x2df   :  { %4620 = vmatprep.subr.bf16.mxu1 %v6660_v38  ;;  %4661 = vmatprep.subr.bf16.mxu0 %v6729_v36  ;;  %v3805_v38 = vpack.i.b16 %v7305_v62, %v7305_v62  ;;  %v6688_v36 = vld [vmem:[#allocation11 + $0xe8] ss:$16 sps:$4 sm:$0xff]  }
 0x2e0   :  { %v3812_v1 = vpack.i.b16 %v7308_v37, %v7308_v37 }
 0x2e1   :  { %v3810_v4 = vrot.slane %v3805_v38, %v7238_v48 }
 0x2e2   :  { %4621 = vmatpush1.bf16.msra.mxu1 %v6658_v2  ;;  %4662 = vmatpush1.bf16.msra.mxu0 %v6727_v20 }
 0x2e3   :  { %4622 = vmatprep.subr.bf16.mxu1 %v6663_v3  ;;  %4663 = vmatprep.subr.bf16.mxu0 %v6735_v23  ;;  %v3606_v3 = vadd.f32 %v7298_v53, %v7293_v10  ;;  %v7104_v10 = vmov 0   ;;  %v6702_v23 = vld [vmem:[#allocation11 + $0xac] ss:$16 sps:$4 sm:$0xff]  }
 0x2e6   :  { %4623 = vmatpush1.bf16.msra.mxu1 %v6661_v5  ;;  %4664 = vmatpush1.bf16.msra.mxu0 %v6733_v59  ;;  %v6694_v59 = vld [vmem:[#allocation11 + $0xc8] ss:$16 sps:$4 sm:$0xff]  }
 0x2e7   :  { %4624 = vmatprep.subr.bf16.mxu1 %v6666_v8  ;;  %4665 = vmatprep.subr.bf16.mxu0 %v6741_v26  ;;  %v6714_v26 = vld [vmem:[#allocation11 + $0x6c] ss:$16 sps:$4 sm:$0xff]  }
 0x2ea   :  { %4625 = vmatpush2.bf16.msra.mxu1 %v6664_v12  ;;  %4666 = vmatpush2.bf16.msra.mxu0 %v6739_v25  ;;  %v3817_v12 = vrot.slane %v3812_v1, %v7238_v48  ;;  %v6706_v25 = vld [vmem:[#allocation11 + $0x88] ss:$16 sps:$4 sm:$0xff]  }
 0x2eb   :  { %4626 = vmatprep.subr.bf16.mxu1 %v6669_v13  ;;  %4667 = vmatprep.subr.bf16.mxu0 %v6747_v32  ;;  %v6726_v32 = vld [vmem:[#allocation11 + $0x2c] ss:$16 sps:$4 sm:$0xff]  }
 0x2ee   :  { %4627 = vmatpush2.bf16.msra.mxu1 %v6667_v52  ;;  %4668 = vmatpush2.bf16.msra.mxu0 %v6745_v31  ;;  %v6718_v31 = vld [vmem:[#allocation11 + $0x48] ss:$16 sps:$4 sm:$0xff]  }
 0x2ef   :  { %4628 = vmatprep.subr.bf16.mxu1 %v6672_v19  ;;  %4669 = vmatprep.subr.bf16.mxu0 %v6753_v39  ;;  %v6738_v39 = vld [vmem:[#allocation11 + $0x1ec] ss:$16 sps:$4 sm:$0xff]  }
 0x2f2   :  { %4629 = vmatpush2.bf16.msra.mxu1 %v6670_v21  ;;  %4670 = vmatpush2.bf16.msra.mxu0 %v6751_v6  ;;  %v6730_v6 = vld [vmem:[#allocation11 + $0x8] ss:$16 sps:$4 sm:$0xff]  }
 0x2f3   :  { %4630 = vmatprep.subr.bf16.mxu1 %v6675_v22  ;;  %4671 = vmatprep.subr.bf16.mxu0 %v6759_v41  ;;  %v6696_v22 = vld [vmem:[#allocation11 + $0xcc] ss:$16 sps:$4 sm:$0xff]  }
 0x2f4   :  { %v6750_v41 = vld [vmem:[#allocation11 + $0x1ac] ss:$16 sps:$4 sm:$0xff]  }
 0x2f6   :  { %4631 = vmatpush2.bf16.msra.mxu1 %v6673_v24  ;;  %4672 = vmatpush2.bf16.msra.mxu0 %v6757_v40  ;;  %v6700_v24 = vld [vmem:[#allocation11 + $0xa8] ss:$16 sps:$4 sm:$0xff]  }
 0x2f7   :  { %4632 = vmatprep.subr.bf16.mxu1 %v6678_v17  ;;  %4673 = vmatprep.subr.bf16.mxu0 %v6765_v34  ;;  %v6708_v17 = vld [vmem:[#allocation11 + $0x8c] ss:$16 sps:$4 sm:$0xff]   ;;  %v6742_v40 = vld [vmem:[#allocation11 + $0x1c8] ss:$16 sps:$4 sm:$0xff]  }
 0x2f8   :  { %v6762_v34 = vld [vmem:[#allocation11 + $0x16c] ss:$16 sps:$4 sm:$0xff]  }
 0x2fa   :  { %4633 = vmatpush2.bf16.msra.mxu1 %v6676_v27  ;;  %4674 = vmatpush2.bf16.msra.mxu0 %v6763_v46  ;;  %v6712_v27 = vld [vmem:[#allocation11 + $0x68] ss:$16 sps:$4 sm:$0xff]  }
 0x2fb   :  { %4634 = vmatprep.subr.bf16.mxu1 %v6681_v29  ;;  %4675 = vmatprep.subr.bf16.mxu0 %v6771_v49  ;;  %v6720_v29 = vld [vmem:[#allocation11 + $0x4c] ss:$16 sps:$4 sm:$0xff]   ;;  %v6754_v46 = vld [vmem:[#allocation11 + $0x188] ss:$16 sps:$4 sm:$0xff]  }
 0x2fc   :  { %v6760_v49 = vld [vmem:[#allocation11 + $0x168] ss:$16 sps:$4 sm:$0xff]  }
 0x2fe   :  { %4635 = vmatpush2.bf16.msra.mxu1 %v6679_v33  ;;  %4676 = vmatpush2.bf16.msra.mxu0 %v6769_v50  ;;  %v6724_v33 = vld [vmem:[#allocation11 + $0x28] ss:$16 sps:$4 sm:$0xff]   ;;  %v6768_v50 = vld [vmem:[#allocation11 + $0x14c] ss:$16 sps:$4 sm:$0xff]  }
 0x2ff   :  { %4636 = vmatprep.subr.bf16.mxu1 %v6684_v47  ;;  %4677 = vmatprep.subr.bf16.mxu0 %v6777_v55  ;;  %v6732_v47 = vld [vmem:[#allocation11 + $0xc] ss:$16 sps:$4 sm:$0xff]   ;;  %v3802_v55 = vcombine.high %v7305_v62, %v7305_v62 }
 0x302   :  { %4637 = vmatpush2.bf16.msra.mxu1 %v6682_v7  ;;  %4678 = vmatpush2.bf16.msra.mxu0 %v6775_v57  ;;  %v6736_v7 = vld [vmem:[#allocation11 + $0x1e8] ss:$16 sps:$4 sm:$0xff]  }
 0x303   :  { %4638 = vmatprep.subr.bf16.mxu1 %v6687_v28  ;;  %4679 = vmatprep.subr.bf16.mxu0 %v6783_v60  ;;  %v6744_v28 = vld [vmem:[#allocation11 + $0x1cc] ss:$16 sps:$4 sm:$0xff]   ;;  %v6766_v57 = vld [vmem:[#allocation11 + $0x148] ss:$16 sps:$4 sm:$0xff]  }
 0x304   :  { %v6774_v60 = vld [vmem:[#allocation11 + $0x12c] ss:$16 sps:$4 sm:$0xff]  }
 0x306   :  { %4639 = vmatpush2.bf16.msra.mxu1 %v6685_v42  ;;  %4680 = vmatpush2.bf16.msra.mxu0 %v6781_v51  ;;  %v6748_v42 = vld [vmem:[#allocation11 + $0x1a8] ss:$16 sps:$4 sm:$0xff]  }
 0x307   :  { %4690 = vmatprep.subr.bf16.mxu1 %v6690_v45  ;;  %4731 = vmatprep.subr.bf16.mxu0 %v6786_v14  ;;  %v6756_v45 = vld [vmem:[#allocation11 + $0x18c] ss:$16 sps:$4 sm:$0xff]  }
 0x30b   :  { %v7300_v54 = vpop.f32.mrf.mxu0 }
 0x30d   :  { %v7302_v56 = vpop.f32.mrf.mxu0 }
 0x30f   :  { %v3689_v58 = vpop.f32.mrf.mxu0 }
 0x310   :  { %v3803_v58 = vcombine.high %v7308_v37, %v7308_v37 }
 0x311   :  { %v3690_v61 = vpop.f32.mrf.mxu0 }
 0x312   :  { %v3819_v61 = vpack.i.b16 %v3802_v55, %v3802_v55  ;;  %v3826_v63 = vpack.i.b16 %v3803_v58, %v3803_v58  ;;  %v6823_v55 = vld [vmem:[#allocation11 + $0x348] ss:$16 sps:$4 sm:$0xff]  }
 0x313   :  { %v6826_v58 = vld [vmem:[#allocation11 + $0x328] ss:$16 sps:$4 sm:$0xff]  }
 0x314   :  { %v3824_v62 = vrot.slane %v3819_v61, %v7238_v48  ;;  %v6829_v61 = vld [vmem:[#allocation11 + $0x308] ss:$16 sps:$4 sm:$0xff]  }
 0x349   :  { %v3644_v2 = vpop.f32.mrf.mxu1 }
 0x34a   :  { %v3645_v43 = vadd.f32 %v3644_v2, %v3604_v35  ;;  %v6780_v35 = vld [vmem:[#allocation11 + $0x10c] ss:$16 sps:$4 sm:$0xff]  }
 0x34b   :  { %v7319_v5 = vpop.f32.mrf.mxu0  ;;  %v3646_v8 = vpop.f32.mrf.mxu1 }
 0x34c   :  { %v3774_v9 = vpack.c.bf16 %v3645_v43, %v3645_v43  ;;  %v3647_v11 = vadd.f32 %v3646_v8, %v3606_v3 }
 0x34d   :  { %v7322_v13 = vpop.f32.mrf.mxu0  ;;  %v3648_v44 = vpop.f32.mrf.mxu1 }
 0x34e   :  { %v3775_v15 = vpack.c.bf16 %v3647_v11, %v3647_v11  ;;  %v3832_v16 = vadd.bf16 %v3810_v4, %v3774_v9  ;;  %v3831_v4 = vrot.slane %v3826_v63, %v7238_v48  ;;  %v6784_v44 = vld [vmem:[#allocation11 + $0x2e8] ss:$16 sps:$4 sm:$0xff]   ;;  %v6844_v63 = vld [vmem:[#allocation14 + $0x48] sm:$0xff]  }
 0x34f   :  { %v3771_v18 = vpop.f32.mrf.mxu0  ;;  %v3649_v52 = vpop.f32.mrf.mxu1 }
 0x350   :  { %v3833_v19 = vadd.bf16 %v3817_v12, %v3775_v15  ;;  %v7326_v21 = vmax.bf16 %v7104_v10, %v3832_v16  ;;  %v6792_v16 = vld [vmem:[#allocation11 + $0x2ac] ss:$16 sps:$4 sm:$0xff]  }
 0x351   :  { %v3772_v20 = vpop.f32.mrf.mxu0  ;;  %v6832_v18 = vld [vmem:[#allocation14 + $0x78] sm:$0xff]  }
 0x352   :  { %v3837_v53 = vmax.bf16 %v7104_v10, %v3833_v19  ;;  %v6833_v52 = vld [vmem:[#allocation14 + $0x38] sm:$0xff]   ;;  %v6834_v19 = vld [vmem:[#allocation14 + $0x70] sm:$0xff]  }
 0x353   :  { %v6790_v20 = vld [vmem:[#allocation11 + $0x2a8] ss:$16 sps:$4 sm:$0xff]  }
 0x354   :  { %4640 = vmatprep.mubr.bf16.mxu1 %v3837_v53 }
 0x355   :  { %4641 = vmatmul.mubr.bf16.vlgmr.msra.gmra.mxu1 %v7326_v21 }
 0x356   :  { %4691 = vmatpush1.bf16.msra.mxu1 %v6688_v36  ;;  %4722 = vmatprep.mubr.bf16.mxu1 %v3837_v53  ;;  %v6795_v53 = vld [vmem:[#allocation11 + $0x28c] ss:$16 sps:$4 sm:$0xff]   ;;  %v6835_v36 = vld [vmem:[#allocation14 + $0x30] sm:$0xff]  }
 0x357   :  { %4692 = vmatprep.subr.bf16.mxu1 %v6696_v22  ;;  %v6793_v22 = vld [vmem:[#allocation11 + $0x288] ss:$16 sps:$4 sm:$0xff]  }
 0x35a   :  { %4693 = vmatpush1.bf16.msra.mxu1 %v6694_v59  ;;  %v6798_v59 = vld [vmem:[#allocation11 + $0x26c] ss:$16 sps:$4 sm:$0xff]  }
 0x35b   :  { %4694 = vmatprep.subr.bf16.mxu1 %v6702_v23  ;;  %v6837_v23 = vld [vmem:[#allocation14 + $0x28] sm:$0xff]  }
 0x35e   :  { %4695 = vmatpush1.bf16.msra.mxu1 %v6700_v24  ;;  %v6838_v24 = vld [vmem:[#allocation14 + $0x60] sm:$0xff]  }
 0x35f   :  { %4696 = vmatprep.subr.bf16.mxu1 %v6708_v17  ;;  %v6796_v17 = vld [vmem:[#allocation11 + $0x268] ss:$16 sps:$4 sm:$0xff]  }
 0x362   :  { %4697 = vmatpush1.bf16.msra.mxu1 %v6706_v25  ;;  %v6801_v25 = vld [vmem:[#allocation11 + $0x24c] ss:$16 sps:$4 sm:$0xff]  }
 0x363   :  { %4698 = vmatprep.subr.bf16.mxu1 %v6714_v26  ;;  %v6839_v26 = vld [vmem:[#allocation14 + $0x20] sm:$0xff]  }
 0x366   :  { %4699 = vmatpush1.bf16.msra.mxu1 %v6712_v27  ;;  %v6840_v27 = vld [vmem:[#allocation14 + $0x58] sm:$0xff]  }
 0x367   :  { %4700 = vmatprep.subr.bf16.mxu1 %v6720_v29  ;;  %v6799_v29 = vld [vmem:[#allocation11 + $0x248] ss:$16 sps:$4 sm:$0xff]  }
 0x36a   :  { %4701 = vmatpush1.bf16.msra.mxu1 %v6718_v31  ;;  %v6804_v31 = vld [vmem:[#allocation11 + $0x22c] ss:$16 sps:$4 sm:$0xff]  }
 0x36b   :  { %4702 = vmatprep.subr.bf16.mxu1 %v6726_v32  ;;  %v6841_v32 = vld [vmem:[#allocation14 + $0x18] sm:$0xff]  }
 0x36e   :  { %4703 = vmatpush1.bf16.msra.mxu1 %v6724_v33  ;;  %v6802_v33 = vld [vmem:[#allocation11 + $0x228] ss:$16 sps:$4 sm:$0xff]  }
 0x36f   :  { %4704 = vmatprep.subr.bf16.mxu1 %v6732_v47  ;;  %v6807_v47 = vld [vmem:[#allocation11 + $0x20c] ss:$16 sps:$4 sm:$0xff]  }
 0x372   :  { %4705 = vmatpush1.bf16.msra.mxu1 %v6730_v6  ;;  %v6805_v6 = vld [vmem:[#allocation11 + $0x208] ss:$16 sps:$4 sm:$0xff]  }
 0x373   :  { %4706 = vmatprep.subr.bf16.mxu1 %v6738_v39  ;;  %v6810_v39 = vld [vmem:[#allocation11 + $0x3ec] ss:$16 sps:$4 sm:$0xff]  }
 0x376   :  { %4707 = vmatpush2.bf16.msra.mxu1 %v6736_v7  ;;  %v6808_v7 = vld [vmem:[#allocation11 + $0x3e8] ss:$16 sps:$4 sm:$0xff]  }
 0x377   :  { %4708 = vmatprep.subr.bf16.mxu1 %v6744_v28  ;;  %v6813_v28 = vld [vmem:[#allocation11 + $0x3cc] ss:$16 sps:$4 sm:$0xff]  }
 0x37a   :  { %4709 = vmatpush2.bf16.msra.mxu1 %v6742_v40  ;;  %v6811_v40 = vld [vmem:[#allocation11 + $0x3c8] ss:$16 sps:$4 sm:$0xff]  }
 0x37b   :  { %4710 = vmatprep.subr.bf16.mxu1 %v6750_v41  ;;  %v6816_v41 = vld [vmem:[#allocation11 + $0x3ac] ss:$16 sps:$4 sm:$0xff]  }
 0x37e   :  { %4711 = vmatpush2.bf16.msra.mxu1 %v6748_v42  ;;  %v6814_v42 = vld [vmem:[#allocation11 + $0x3a8] ss:$16 sps:$4 sm:$0xff]  }
 0x37f   :  { %4712 = vmatprep.subr.bf16.mxu1 %v6756_v45  ;;  %v6819_v45 = vld [vmem:[#allocation11 + $0x38c] ss:$16 sps:$4 sm:$0xff]  }
 0x382   :  { %4713 = vmatpush2.bf16.msra.mxu1 %v6754_v46  ;;  %v6817_v46 = vld [vmem:[#allocation11 + $0x388] ss:$16 sps:$4 sm:$0xff]  }
 0x383   :  { %4714 = vmatprep.subr.bf16.mxu1 %v6762_v34  ;;  %v6822_v34 = vld [vmem:[#allocation11 + $0x36c] ss:$16 sps:$4 sm:$0xff]  }
 0x386   :  { %4715 = vmatpush2.bf16.msra.mxu1 %v6760_v49  ;;  %v6820_v49 = vld [vmem:[#allocation11 + $0x368] ss:$16 sps:$4 sm:$0xff]  }
 0x387   :  { %4716 = vmatprep.subr.bf16.mxu1 %v6768_v50  ;;  %v6825_v50 = vld [vmem:[#allocation11 + $0x34c] ss:$16 sps:$4 sm:$0xff]  }
 0x389   :  { %v3726_v51 = vpop.f32.mrf.mxu1 }
 0x38a   :  { %v3727_v14 = vadd.f32 %v3726_v51, %v7300_v54  ;;  %4717 = vmatpush2.bf16.msra.mxu1 %v6766_v57  ;;  %v6778_v54 = vld [vmem:[#allocation11 + $0x108] ss:$16 sps:$4 sm:$0xff]   ;;  %v6828_v57 = vld [vmem:[#allocation11 + $0x32c] ss:$16 sps:$4 sm:$0xff]  }
 0x38b   :  { %v3728_v38 = vpop.f32.mrf.mxu1  ;;  %4718 = vmatprep.subr.bf16.mxu1 %v6774_v60  ;;  %v6831_v60 = vld [vmem:[#allocation11 + $0x30c] ss:$16 sps:$4 sm:$0xff]   ;;  %v6842_v51 = vld [vmem:[#allocation14 + $0x50] sm:$0xff]  }
 0x38c   :  { %v3768_v1 = vadd.f32 %v7319_v5, %v3727_v14  ;;  %v3729_v2 = vadd.f32 %v3728_v38, %v7302_v56  ;;  %v6789_v56 = vld [vmem:[#allocation11 + $0x2cc] ss:$16 sps:$4 sm:$0xff]   ;;  %v6843_v14 = vld [vmem:[#allocation14 + $0x10] sm:$0xff]   ;;  %v6846_v38 = vld [vmem:[#allocation14 + $0x40] sm:$0xff]  }
 0x38d   :  { %v3730_v3 = vpop.f32.mrf.mxu1 }
 0x38e   :  { %v3776_v37 = vpack.c.bf16 %v3768_v1, %v3768_v1  ;;  %v3770_v43 = vadd.f32 %v7322_v13, %v3729_v2  ;;  %4719 = vmatpush2.bf16.msra.mxu1 %v6772_v0  ;;  %v6787_v13 = vld [vmem:[#allocation11 + $0x2c8] ss:$16 sps:$4 sm:$0xff]   ;;  %v6845_v0 = vld [vmem:[#allocation14 + $0x8] sm:$0xff]   ;;  %v6848_v1 = vld [vmem:[#allocation14 + $0xf8] sm:$0xff]  }
 0x38f   :  { %v3731_v8 = vpop.f32.mrf.mxu1  ;;  %4720 = vmatprep.subr.bf16.mxu1 %v6780_v35  ;;  %v6847_v35 = vld [vmem:[#allocation14] sm:$0xff]  }
 0x390   :  { %v3834_v9 = vadd.bf16 %v3824_v62, %v3776_v37  ;;  %v3777_v11 = vpack.c.bf16 %v3770_v43, %v3770_v43  ;;  %v5817_v43 = vld.sshfl [vmem:[#allocation13] sm:$0x33 pattern:$0x75316420] }
 0x392   :  { %v3835_v12 = vadd.bf16 %v3831_v4, %v3777_v11  ;;  %4721 = vmatpush2.bf16.msra.mxu1 %v6778_v54  ;;  %v7341_v15 = vmax.bf16 %v7104_v10, %v3834_v9  ;;  %v4785_v4 = vcombine.high %v5817_v43, %v5817_v43  ;;  %v4792_v54 = vrot.slane %v5817_v43, %v7226_v30  ;;  %v5818_v43 = vld [vmem:[#allocation16] ss:$0 sm:$0xff] }
 0x393   :  { %5851 = vmatprep.subr.bf16.mxu1 %v6832_v18 }
 0x394   :  { %v3839_v5 = vmax.bf16 %v7104_v10, %v3835_v12  ;;  %v4799_v8 = vrot.slane %v4785_v4, %v7226_v30  ;;  %v4803_v11 = vpack.i.b16 %v4792_v54, %v4792_v54 }
 0x395   :  { %4723 = vmatmul.mubr.bf16.vlgmr.msra.gmra.mxu1 %v7326_v21  ;;  %v6836_v21 = vld [vmem:[#allocation14 + $0x68] sm:$0xff]  }
 0x396   :  { %4681 = vmatprep.mubr.bf16.mxu0 %v3839_v5  ;;  %5852 = vmatpush3.bf16.msra.mxu1 %v6833_v52  ;;  %v4810_v12 = vpack.i.b16 %v4799_v8, %v4799_v8 }
 0x397   :  { %4682 = vmatmul.mubr.bf16.vlgmr.msra.gmra.mxu0 %v7341_v15  ;;  %5853 = vmatprep.subr.bf16.mxu1 %v6834_v19 }
 0x398   :  { %4732 = vmatpush1.bf16.msra.mxu0 %v6784_v44  ;;  %4763 = vmatprep.mubr.bf16.mxu0 %v3839_v5  ;;  %v4815_v19 = vrot.slane %v4810_v12, %v7238_v48 }
 0x399   :  { %4733 = vmatprep.subr.bf16.mxu0 %v6789_v56  ;;  %v4808_v56 = vrot.slane %v4803_v11, %v7238_v48 }
 0x39a   :  { %5854 = vmatpush3.bf16.msra.mxu1 %v6835_v36 }
 0x39b   :  { %5855 = vmatprep.subr.bf16.mxu1 %v6836_v21 }
 0x39c   :  { %4734 = vmatpush1.bf16.msra.mxu0 %v6787_v13 }
 0x39d   :  { %4735 = vmatprep.subr.bf16.mxu0 %v6792_v16 }
 0x39e   :  { %5856 = vmatpush3.bf16.msra.mxu1 %v6837_v23  ;;  %v6849_v23 = vld [vmem:[#allocation14 + $0xb8] sm:$0xff]  }
 0x39f   :  { %5857 = vmatprep.subr.bf16.mxu1 %v6838_v24 }
 0x3a0   :  { %4736 = vmatpush1.bf16.msra.mxu0 %v6790_v20 }
 0x3a1   :  { %4737 = vmatprep.subr.bf16.mxu0 %v6795_v53 }
 0x3a2   :  { %5858 = vmatpush3.bf16.msra.mxu1 %v6839_v26  ;;  %v6852_v26 = vld [vmem:[#allocation14 + $0xe8] sm:$0xff]  }
 0x3a3   :  { %5859 = vmatprep.subr.bf16.mxu1 %v6840_v27  ;;  %v6853_v27 = vld [vmem:[#allocation14 + $0xa8] sm:$0xff]  }
 0x3a4   :  { %4738 = vmatpush1.bf16.msra.mxu0 %v6793_v22 }
 0x3a5   :  { %4739 = vmatprep.subr.bf16.mxu0 %v6798_v59 }
 0x3a6   :  { %5860 = vmatpush3.bf16.msra.mxu1 %v6841_v32  ;;  %v6856_v32 = vld [vmem:[#allocation14 + $0xd8] sm:$0xff]  }
 0x3a7   :  { %5861 = vmatprep.subr.bf16.mxu1 %v6842_v51 }
 0x3a8   :  { %4740 = vmatpush1.bf16.msra.mxu0 %v6796_v17  ;;  %v6850_v17 = vld [vmem:[#allocation14 + $0xf0] sm:$0xff]  }
 0x3a9   :  { %4741 = vmatprep.subr.bf16.mxu0 %v6801_v25  ;;  %v6851_v25 = vld [vmem:[#allocation14 + $0xb0] sm:$0xff]  }
 0x3aa   :  { %5862 = vmatpush3.bf16.msra.mxu1 %v6843_v14 }
 0x3ab   :  { %5863 = vmatprep.subr.bf16.mxu1 %v6844_v63 }
 0x3ac   :  { %4742 = vmatpush1.bf16.msra.mxu0 %v6799_v29  ;;  %v6854_v29 = vld [vmem:[#allocation14 + $0xe0] sm:$0xff]  }
 0x3ad   :  { %4743 = vmatprep.subr.bf16.mxu0 %v6804_v31  ;;  %v6855_v31 = vld [vmem:[#allocation14 + $0xa0] sm:$0xff]  }
 0x3ae   :  { %5864 = vmatpush3.bf16.msra.mxu1 %v6845_v0 }
 0x3af   :  { %5865 = vmatprep.subr.bf16.mxu1 %v6846_v38 }
 0x3b0   :  { %4744 = vmatpush1.bf16.msra.mxu0 %v6802_v33  ;;  %v6857_v33 = vld [vmem:[#allocation14 + $0x98] sm:$0xff]  }
 0x3b1   :  { %4745 = vmatprep.subr.bf16.mxu0 %v6807_v47  ;;  %v6858_v47 = vld [vmem:[#allocation14 + $0xd0] sm:$0xff]  }
 0x3b2   :  { %5866 = vmatpush3.bf16.msra.mxu1 %v6847_v35 }
 0x3b3   :  { %5873 = vmatprep.subr.bf16.mxu1 %v6848_v1 }
 0x3b4   :  { %4746 = vmatpush1.bf16.msra.mxu0 %v6805_v6  ;;  %v6859_v6 = vld [vmem:[#allocation14 + $0x90] sm:$0xff]  }
 0x3b5   :  { %4747 = vmatprep.subr.bf16.mxu0 %v6810_v39  ;;  %v6860_v39 = vld [vmem:[#allocation14 + $0xc8] sm:$0xff]  }
 0x3b8   :  { %4748 = vmatpush2.bf16.msra.mxu0 %v6808_v7  ;;  %v6861_v7 = vld [vmem:[#allocation14 + $0x88] sm:$0xff]  }
 0x3b9   :  { %4749 = vmatprep.subr.bf16.mxu0 %v6813_v28  ;;  %v6862_v28 = vld [vmem:[#allocation14 + $0xc0] sm:$0xff]  }
 0x3bc   :  { %4750 = vmatpush2.bf16.msra.mxu0 %v6811_v40  ;;  %v6863_v40 = vld [vmem:[#allocation14 + $0x80] sm:$0xff]  }
 0x3bd   :  { %4751 = vmatprep.subr.bf16.mxu0 %v6816_v41  ;;  %v4800_v41 = vcombine.high %v4792_v54, %v4792_v54 }
 0x3c0   :  { %4752 = vmatpush2.bf16.msra.mxu0 %v6814_v42  ;;  %v4801_v42 = vcombine.high %v4799_v8, %v4799_v8 }
 0x3c1   :  { %4753 = vmatprep.subr.bf16.mxu0 %v6819_v45  ;;  %v4817_v45 = vpack.i.b16 %v4800_v41, %v4800_v41 }
 0x3c4   :  { %4754 = vmatpush2.bf16.msra.mxu0 %v6817_v46  ;;  %v4824_v46 = vpack.i.b16 %v4801_v42, %v4801_v42 }
 0x3c5   :  { %4755 = vmatprep.subr.bf16.mxu0 %v6822_v34 }
 0x3c8   :  { %4756 = vmatpush2.bf16.msra.mxu0 %v6820_v49 }
 0x3c9   :  { %4757 = vmatprep.subr.bf16.mxu0 %v6825_v50  ;;  %v4822_v50 = vrot.slane %v4817_v45, %v7238_v48 }
 0x3cc   :  { %4758 = vmatpush2.bf16.msra.mxu0 %v6823_v55 }
 0x3cd   :  { %4759 = vmatprep.subr.bf16.mxu0 %v6828_v57 }
 0x3d0   :  { %4760 = vmatpush2.bf16.msra.mxu0 %v6826_v58 }
 0x3d1   :  { %4761 = vmatprep.subr.bf16.mxu0 %v6831_v60  ;;  %v4829_v60 = vrot.slane %v4824_v46, %v7238_v48 }
 0x3d4   :  { %4762 = vmatpush2.bf16.msra.mxu0 %v6829_v61 }
 0x3d7   :  { %4764 = vmatmul.mubr.bf16.vlgmr.msra.gmra.mxu0 %v7341_v15 }
 0x415   :  { %v4642_v62 = vpop.f32.mrf.mxu1 }
 0x417   :  { %v4644_v2 = vpop.f32.mrf.mxu1 }
 0x419   :  { %v4646_v3 = vpop.f32.mrf.mxu1 }
 0x41b   :  { %v4647_v37 = vpop.f32.mrf.mxu1 }
 0x455   :  { %v4724_v9 = vpop.f32.mrf.mxu1 }
 0x457   :  { %v4683_v5 = vpop.f32.mrf.mxu0  ;;  %v4726_v44 = vpop.f32.mrf.mxu1 }
 0x458   :  { %v4684_v15 = vadd.f32 %v4683_v5, %v4642_v62 }
 0x459   :  { %v4685_v13 = vpop.f32.mrf.mxu0  ;;  %v4728_v16 = vpop.f32.mrf.mxu1 }
 0x45a   :  { %v4772_v18 = vpack.c.bf16 %v4684_v15, %v4684_v15  ;;  %v4686_v52 = vadd.f32 %v4685_v13, %v4644_v2 }
 0x45b   :  { %v4687_v20 = vpop.f32.mrf.mxu0  ;;  %v4729_v53 = vpop.f32.mrf.mxu1 }
 0x45c   :  { %v4773_v36 = vpack.c.bf16 %v4686_v52, %v4686_v52  ;;  %v4830_v21 = vadd.bf16 %v4808_v56, %v4772_v18 }
 0x45d   :  { %v4688_v22 = vpop.f32.mrf.mxu0 }
 0x45e   :  { %v4831_v30 = vadd.bf16 %v4815_v19, %v4773_v36  ;;  %v4834_v24 = vmax.bf16 %v7104_v10, %v4830_v21 }
 0x460   :  { %v4835_v59 = vmax.bf16 %v7104_v10, %v4831_v30 }
 0x462   :  { %5133 = vmatprep.mubr.bf16.mxu1 %v4835_v59 }
 0x463   :  { %5134 = vmatmul.mubr.bf16.vlgmr.msra.gmra.mxu1 %v4834_v24 }
 0x464   :  { %5874 = vmatpush3.bf16.msra.mxu1 %v6849_v23 }
 0x465   :  { %5875 = vmatprep.subr.bf16.mxu1 %v6850_v17 }
 0x468   :  { %5876 = vmatpush3.bf16.msra.mxu1 %v6851_v25 }
 0x469   :  { %5877 = vmatprep.subr.bf16.mxu1 %v6852_v26 }
 0x46c   :  { %5878 = vmatpush3.bf16.msra.mxu1 %v6853_v27 }
 0x46d   :  { %5879 = vmatprep.subr.bf16.mxu1 %v6854_v29 }
 0x470   :  { %5880 = vmatpush3.bf16.msra.mxu1 %v6855_v31 }
 0x471   :  { %5881 = vmatprep.subr.bf16.mxu1 %v6856_v32 }
 0x474   :  { %5882 = vmatpush3.bf16.msra.mxu1 %v6857_v33 }
 0x475   :  { %5883 = vmatprep.subr.bf16.mxu1 %v6858_v47 }
 0x478   :  { %5884 = vmatpush3.bf16.msra.mxu1 %v6859_v6 }
 0x479   :  { %5885 = vmatprep.subr.bf16.mxu1 %v6860_v39 }
 0x47c   :  { %5886 = vmatpush3.bf16.msra.mxu1 %v6861_v7 }
 0x47d   :  { %5887 = vmatprep.subr.bf16.mxu1 %v6862_v28 }
 0x480   :  { %5888 = vmatpush3.bf16.msra.mxu1 %v6863_v40 }
 0x497   :  { %v4765_v34 = vpop.f32.mrf.mxu0 }
 0x498   :  { %v4766_v49 = vadd.f32 %v4765_v34, %v4724_v9 }
 0x499   :  { %v4767_v55 = vpop.f32.mrf.mxu0 }
 0x49a   :  { %v4774_v57 = vpack.c.bf16 %v4766_v49, %v4766_v49  ;;  %v4768_v58 = vadd.f32 %v4767_v55, %v4726_v44 }
 0x49b   :  { %v4769_v61 = vpop.f32.mrf.mxu0 }
 0x49c   :  { %v4775_v51 = vpack.c.bf16 %v4768_v58, %v4768_v58  ;;  %v4832_v14 = vadd.bf16 %v4822_v50, %v4774_v57 }
 0x49d   :  { %v4770_v63 = vpop.f32.mrf.mxu0 }
 0x49e   :  { %v4833_v0 = vadd.bf16 %v4829_v60, %v4775_v51  ;;  %v4836_v35 = vmax.bf16 %v7104_v10, %v4832_v14 }
 0x4a0   :  { %v4837_v38 = vmax.bf16 %v7104_v10, %v4833_v0 }
 0x4a2   :  { %5173 = vmatprep.mubr.bf16.mxu1 %v4837_v38 }
 0x4a3   :  { %5174 = vmatmul.mubr.bf16.vlgmr.msra.gmra.mxu1 %v4836_v35 }
 0x523   :  { %v5867_v1 = vpop.f32.mrf.mxu1 }
 0x525   :  { %v5868_v62 = vpop.f32.mrf.mxu1 }
 0x526   :  { %v5869_v37 = vadd.f32 %v5868_v62, %v5867_v1 }
 0x527   :  { %v5870_v2 = vpop.f32.mrf.mxu1 }
 0x528   :  { %v5136_v48 = vadd.f32 %v5869_v37, %v5818_v43 }
 0x529   :  { %v5871_v3 = vpop.f32.mrf.mxu1 }
 0x563   :  { %v5889_v4 = vpop.f32.mrf.mxu1 }
 0x565   :  { %v5890_v54 = vpop.f32.mrf.mxu1 }
 0x566   :  { %v5891_v8 = vadd.f32 %v5890_v54, %v5889_v4 }
 0x567   :  { %v5892_v9 = vpop.f32.mrf.mxu1 }
 0x568   :  { %v5176_v11 = vadd.f32 %v5891_v8, %v5136_v48 }
 0x569   :  { %v5893_v12 = vpop.f32.mrf.mxu1 }
 0x56a   :  { %v5181_v5 = vpack.c.bf16 %v5176_v11, %v5176_v11 }
 0x56c   :  { %5182 = vst [vmem:[#allocation17] sm:$0xf] %v5181_v5 }
 0x56d   :  { %7067 = shalt.err (!%p7064_p7)
}
 0x56e   :  { %5192 = dma.vmem_to_hbm [thread:$0]  %s5190_s8, 64, %s7368_s9, [#allocation4]  }
 0x56f   :  { %7086 = dma.done.wait [#allocation4], 64  }
 0x570   :  { %7087 = vsyncadd [#allocation4], 4294967232 }
 0x571   :  { %5196 = vsyncpa [#allocation3], 1 }
 0x572   :  { %5197 = vsyncpa [#allocation6], 1 }
 0x573   :  { %5198 = vsyncpa [#allocation9], 1 }
 0x574   :  { %5199 = vsyncpa [#allocation12], 1 }
 0x575   :  { %5200 = vsyncpa [#allocation15], 1 }
 0x576   :  { %5201 = vsyncpa [#allocation4], 1 }

</bundles_post_ra>
